<compile_context>
chip_gen: v6e
topology: v6e:2x2x1
jax: 0.10.0
libtpu: 0.0.40
codegen_flags: <defaults>
</compile_context>

<pallas_src>
import numpy as np
import jax
import jax.numpy as jnp
from jax.experimental import pallas as pl
from jax.experimental.pallas import tpu as pltpu


# ----------------------------- small helpers --------------------------------

def _lrelu(y):
    # LeakyReLU(negative_slope=0.01), PyTorch default
    return jnp.where(y >= 0, y, 0.01 * y)


def _dot(a, b):
    return jnp.dot(a, b, preferred_element_type=jnp.float32)


def _bspec(shape):
    """Block over the leading (batch) axis, full extent on the remaining dims."""
    nd = len(shape)

    def imap(b):
        return (b,) + (0,) * (nd - 1)

    return pl.BlockSpec((1,) + tuple(shape[1:]), imap)


def _cspec(shape):
    """Same full-array block for every grid step (weights / shared tables)."""
    nd = len(shape)

    def imap(b):
        return (0,) * nd

    return pl.BlockSpec(tuple(shape), imap)


# ----------------------------- Pallas kernels --------------------------------

def _conv_layer_kernel(
    # per-batch data ----------------------------------------------------------
    node_ref,      # (1, K, c_in)
    embt_ref,      # (1, 1, T)
    ppe_ref,       # (K, P)          shared across batch
    esym_ref,      # (1, K*K, E_sym)
    edir_ref,      # (1, K*K, E_dir)
    mask_ref,      # (1, K, K, 1)    valid_agg_mask
    invd_ref,      # (1, K, 1)       1 / (mask.sum(j) + 1e-6)
    # layer weights (resident across grid steps) ------------------------------
    te0_w, te0_b, te1_w, te1_b,
    pe0_w, pe0_b, pe1_w, pe1_b,
    v0_wn, v0_wp, v0_b,
    v1_wn, v1_wt, v1_b,
    es_w, es_b, ed_w, ed_b,
    ec0_ws, ec0_wd, ec0_wself, ec0_wnb, ec0_b,
    ec1_w, ec1_b,
    v2_wn, v2_wa, v2_b,
    # outputs ------------------------------------------------------------------
    node_out_ref,  # (1, K, c_out)
    e_out_ref,     # (1, K, K, c_out)
):
    node_f = node_ref[0]                 # (K, c_in)
    emb_t = embt_ref[0]                  # (1, T)
    p_pe = ppe_ref[...]                  # (K, P)
    e_sym = esym_ref[0]                  # (K*K, E_sym)
    e_dir = edir_ref[0]                  # (K*K, E_dir)
    mask = mask_ref[0]                   # (K, K, 1)
    inv_den = invd_ref[0]                # (K, 1)

    K = node_f.shape[0]

    # time / position embedding heads: Linear -> LeakyReLU -> Linear (fused)
    pe_t = _lrelu(_dot(emb_t, te0_w[...]) + te0_b[...])
    pe_t = _dot(pe_t, te1_w[...]) + te1_b[...]                      # (1, T)
    pe_p = _lrelu(_dot(p_pe, pe0_w[...]) + pe0_b[...])
    pe_p = _dot(pe_p, pe1_w[...]) + pe1_b[...]                      # (K, P)

    # node self path; concatenations folded into split weights (v0 then v1)
    h = _lrelu(_dot(node_f, v0_wn[...]) + _dot(pe_p, v0_wp[...]) + v0_b[...])
    h = _lrelu(_dot(h, v1_wn[...]) + _dot(pe_t, v1_wt[...]) + v1_b[...])  # (K, half)

    # edge-feature branch linears
    f_sym = _lrelu(_dot(e_sym, es_w[...]) + es_b[...])              # (K*K, half)
    f_dir = _lrelu(_dot(e_dir, ed_w[...]) + ed_b[...])              # (K*K, half)

    # ec0 decomposed: node-dependent terms computed on K rows, not K*K rows
    edge_term = _dot(f_sym, ec0_ws[...]) + _dot(f_dir, ec0_wd[...])  # (K*K, c_out)
    self_term = _dot(h, ec0_wself[...])                              # (K, c_out)
    nb_term = _dot(h, ec0_wnb[...])                                  # (K, c_out)
    c_out = edge_term.shape[-1]
    e1 = _lrelu(edge_term.reshape(K, K, c_out)
                + self_term[:, None, :] + nb_term[None, :, :] + ec0_b[...])

    # ec1
    e2 = _lrelu(_dot(e1.reshape(K * K, c_out), ec1_w[...]) + ec1_b[...])
    e3 = e2.reshape(K, K, c_out)
    e_out_ref[0] = e3

    # masked neighbor aggregation (mask & reciprocal denom are loop-invariant)
    agg = jnp.sum(e3 * mask, axis=1) * inv_den                       # (K, c_out)

    # v2: concat([node_f, agg]) folded into split weights
    node_out_ref[0] = _lrelu(_dot(node_f, v2_wn[...]) +
                             _dot(agg, v2_wa[...]) + v2_b[...])


def _make_mlp_kernel(n_hidden):
    """Fused NaiveMLP: hidden Linear+LeakyReLU chain + wide-concat output fc.

    ref order: x, (w_i, b_i)*n_hidden, out_w_seg_0..n_hidden, out_b, out.
    The wide concat([x, h1, ..., hn]) @ W_out is computed as a sum of
    per-segment matmuls, so nothing is concatenated or written back to HBM.
    """
    def kernel(*refs):
        x_ref = refs[0]
        o_ref = refs[-1]
        p = refs[1:-1]
        hidden = p[:2 * n_hidden]
        out_ws = p[2 * n_hidden:3 * n_hidden + 1]
        out_b = p[3 * n_hidden + 1]

        x = x_ref[0]                                 # (N, z)
        acc = _dot(x, out_ws[0][...])
        h = x
        for i in range(n_hidden):
            h = _lrelu(_dot(h, hidden[2 * i][...]) + hidden[2 * i + 1][...])
            acc = acc + _dot(h, out_ws[i + 1][...])
        o_ref[0] = acc + out_b[...]

    return kernel


# ----------------------------- kernel wrappers --------------------------------

_CONV_W_KEYS = (
    "te0_w", "te0_b", "te1_w", "te1_b",
    "pe0_w", "pe0_b", "pe1_w", "pe1_b",
    "v0_wn", "v0_wp", "v0_b",
    "v1_wn", "v1_wt", "v1_b",
    "es_w", "es_b", "ed_w", "ed_b",
    "ec0_ws", "ec0_wd", "ec0_wself", "ec0_wnb", "ec0_b",
    "ec1_w", "ec1_b",
    "v2_wn", "v2_wa", "v2_b",
)


def conv_layer_apply(layer, node_f, emb_t3, p_pe, e_sym, e_dir, mask4, inv_den):
    B, K, _ = node_f.shape
    c_out = layer["v2_b"].shape[-1]
    data = (node_f, emb_t3, p_pe, e_sym, e_dir, mask4, inv_den)
    ws = tuple(layer[k] for k in _CONV_W_KEYS)

    in_specs = ([_bspec(node_f.shape), _bspec(emb_t3.shape), _cspec(p_pe.shape),
                 _bspec(e_sym.shape), _bspec(e_dir.shape), _bspec(mask4.shape),
                 _bspec(inv_den.shape)]
                + [_cspec(w.shape) for w in ws])
    out_shape = (jax.ShapeDtypeStruct((B, K, c_out), jnp.float32),
                 jax.ShapeDtypeStruct((B, K, K, c_out), jnp.float32))
    out_specs = (_bspec((B, K, c_out)), _bspec((B, K, K, c_out)))

    return pl.pallas_call(
        _conv_layer_kernel,
        out_shape=out_shape,
        grid=(B,),
        in_specs=in_specs,
        out_specs=out_specs,
        compiler_params=pltpu.CompilerParams(dimension_semantics=("parallel",)),
    )(*data, *ws)


def mlp_apply(mlp, x):
    B, N, _ = x.shape
    n_hidden = len(mlp["hidden"])
    out_dim = mlp["out_b"].shape[-1]

    args = [x]
    for w, b in mlp["hidden"]:
        args += [w, b]
    args += list(mlp["out_ws"])
    args.append(mlp["out_b"])

    in_specs = [_bspec(x.shape)] + [_cspec(a.shape) for a in args[1:]]
    return pl.pallas_call(
        _make_mlp_kernel(n_hidden),
        out_shape=jax.ShapeDtypeStruct((B, N, out_dim), jnp.float32),
        grid=(B,),
        in_specs=in_specs,
        out_specs=_bspec((B, N, out_dim)),
        compiler_params=pltpu.CompilerParams(dimension_semantics=("parallel",)),
    )(*args)


# ----------------------------- parameters ------------------------------------

class KeyGen:
    def __init__(self, key):
        self.key = key

    def __call__(self):
        self.key, sub = jax.random.split(self.key)
        return sub


def init_linear(kg, din, dout):
    lim = 1.0 / np.sqrt(din)
    w = jax.random.uniform(kg(), (din, dout), jnp.float32, -lim, lim)
    b = jax.random.uniform(kg(), (1, dout), jnp.float32, -lim, lim)
    return w, b


def init_mlp(kg, z_dim, out_dim, hidden_dims):
    hidden, widths, c_in = [], [z_dim], z_dim
    for h in hidden_dims:
        hidden.append(init_linear(kg, c_in, h))
        widths.append(h)
        c_in = h
    out_w, out_b = init_linear(kg, sum(widths), out_dim)
    out_ws, off = [], 0
    for w in widths:          # split wide out-fc weight per concat segment
        out_ws.append(out_w[off:off + w])
        off += w
    return {"hidden": hidden, "out_ws": out_ws, "out_b": out_b}


def init_conv_layer(kg, c_in, c_out, p_pe_dim, t_pe_dim, E_sym_dim, E_dir_dim):
    half = c_out // 2
    layer = {}
    layer["te0_w"], layer["te0_b"] = init_linear(kg, t_pe_dim, t_pe_dim)
    layer["te1_w"], layer["te1_b"] = init_linear(kg, t_pe_dim, t_pe_dim)
    layer["pe0_w"], layer["pe0_b"] = init_linear(kg, p_pe_dim, p_pe_dim)
    layer["pe1_w"], layer["pe1_b"] = init_linear(kg, p_pe_dim, p_pe_dim)

    v0_w, layer["v0_b"] = init_linear(kg, c_in + p_pe_dim, half)
    layer["v0_wn"], layer["v0_wp"] = v0_w[:c_in], v0_w[c_in:]

    v1_w, layer["v1_b"] = init_linear(kg, half + t_pe_dim, half)
    layer["v1_wn"], layer["v1_wt"] = v1_w[:half], v1_w[half:]

    layer["ed_w"], layer["ed_b"] = init_linear(kg, E_dir_dim, half)
    layer["es_w"], layer["es_b"] = init_linear(kg, E_sym_dim, half)

    # e_conv input is cat([e_f_sym, e_f_dir, node_self, node_neighbor]) = 4*half
    ec0_w, layer["ec0_b"] = init_linear(kg, 2 * c_out, c_out)
    layer["ec0_ws"] = ec0_w[:half]
    layer["ec0_wd"] = ec0_w[half:2 * half]
    layer["ec0_wself"] = ec0_w[2 * half:3 * half]
    layer["ec0_wnb"] = ec0_w[3 * half:]

    layer["ec1_w"], layer["ec1_b"] = init_linear(kg, c_out, c_out)

    # v_self_layers2 input is cat([node_f (c_in), agg_f (c_out)])
    v2_w, layer["v2_b"] = init_linear(kg, c_out + c_in, c_out)
    layer["v2_wn"], layer["v2_wa"] = v2_w[:c_in], v2_w[c_in:]
    return layer


def init_params(kg, V_dim, node_conv_dims, p_pe_dim, t_pe_dim,
                node_pred_head_dims, edge_sym_head_dims, edge_dir_head_dims,
                E_sym_dim=10, E_dir_dim=3):
    conv, c_in, edge_wide = [], V_dim, 0
    for c_out in node_conv_dims:
        conv.append(init_conv_layer(kg, c_in, c_out, p_pe_dim, t_pe_dim,
                                    E_sym_dim, E_dir_dim))
        edge_wide += c_out
        c_in = c_out
    return {
        "conv": conv,
        "node_mlp": init_mlp(kg, c_in, V_dim, node_pred_head_dims),
        "edge_sym_mlp": init_mlp(kg, c_in * 2 + edge_wide + E_sym_dim,
                                 E_sym_dim, edge_sym_head_dims),
        "edge_dir_mlp": init_mlp(kg, c_in * 2 + edge_wide + E_dir_dim,
                                 E_dir_dim, edge_dir_head_dims),
    }


def sinusoidal_embedding(n, d):
    wk = np.array([1.0 / 10000 ** (2 * j / d) for j in range(d)], np.float64)
    t = np.arange(n).reshape(n, 1).astype(np.float64)
    emb = np.zeros((n, d), np.float32)
    emb[:, ::2] = np.sin(t * wk[::2][None, :])
    emb[:, 1::2] = np.cos(t * wk[::2][None, :])
    return jnp.asarray(emb)


# ----------------------------- forward pass -----------------------------------

def graph_denoise_forward(params, cfg, V_noisy, E_noisy, t):
    K = cfg["K"]
    B = V_noisy.shape[0]
    full_ind, src_ind, dst_ind = cfg["full_ind"], cfg["src_ind"], cfg["dst_ind"]

    E_sym_l = E_noisy[..., 3:]
    E_dir_l = E_noisy[..., :3]

    # triangular scatter + symmetrization (plain-JAX glue)
    def scatter_tri(buf):
        F = buf.shape[-1]
        ret = jnp.zeros((B, K * K, F), jnp.float32)
        ret = ret.at[:, full_ind, :].set(buf.astype(jnp.float32))
        return ret.reshape(B, K, K, F)

    E_sym = scatter_tri(E_sym_l)
    E_sym = E_sym + jnp.transpose(E_sym, (0, 2, 1, 3))
    E_dir = scatter_tri(E_dir_l)
    E_dir_neg = E_dir[..., jnp.array([0, 2, 1])]
    E_dir = E_dir + jnp.transpose(E_dir_neg, (0, 2, 1, 3))

    eye = jnp.eye(K, dtype=jnp.float32)[None]
    E_cur_connect = 1.0 - E_dir[..., 0]
    E_cur_connect = jax.nn.sigmoid((E_cur_connect - 0.5) * cfg["edge_guide_factor"])
    E_cur_connect = E_cur_connect * (1.0 - eye)
    valid_agg_mask = E_cur_connect * (1.0 - eye)                 # matches reference
    # loop-invariant: mask (lane-broadcast shape) and reciprocal denominator
    mask4 = valid_agg_mask[..., None]                            # (B, K, K, 1)
    inv_den = 1.0 / (jnp.sum(valid_agg_mask, axis=2, keepdims=True) + 1e-6)  # (B,K,1)

    E_sym_flat = E_sym.reshape(B, K * K, -1)
    E_dir_flat = E_dir.reshape(B, K * K, -1)

    emb_t3 = cfg["t_pe"][t][:, None, :]                          # (B, 1, T)
    p_pe = cfg["p_pe"]                                           # (K, P)

    node_f = V_noisy.astype(jnp.float32)
    edge_f_list = []
    for layer in params["conv"]:
        node_f, e_f = conv_layer_apply(layer, node_f, emb_t3, p_pe,
                                       E_sym_flat, E_dir_flat, mask4, inv_den)
        edge_f_list.append(e_f)

    v_pred = mlp_apply(params["node_mlp"], node_f)

    # edge-head input assembly (plain-JAX glue: gathers / concats / transposes)
    src_f = node_f[:, src_ind, :]                                # (B, E, D)
    dst_f = node_f[:, dst_ind, :]

    edge_f_cat = jnp.concatenate(edge_f_list, -1)                # (B, K, K, W)
    edge_f_dir = jnp.concatenate([E_dir_flat.reshape(B, K, K, -1), edge_f_cat], -1)
    edge_f_sym = (edge_f_cat + jnp.transpose(edge_f_cat, (0, 2, 1, 3))) / 2.0
    edge_f_sym = jnp.concatenate([edge_f_sym, E_sym_flat.reshape(B, K, K, -1)], -1)
    edge_f_dir = edge_f_dir.reshape(B, K * K, -1)[:, full_ind, :]
    edge_f_sym = edge_f_sym.reshape(B, K * K, -1)[:, full_ind, :]

    e_stack = jnp.stack([src_f, dst_f], -1)                      # (B, E, D, 2)
    e_f_sym = jnp.concatenate([jnp.max(e_stack, -1), jnp.mean(e_stack, -1)], -1)
    e_f_dir = e_stack.reshape(B, e_stack.shape[1], 2 * node_f.shape[-1])
    e_f_sym = jnp.concatenate([e_f_sym, edge_f_sym], -1)
    e_f_dir = jnp.concatenate([e_f_dir, edge_f_dir], -1)

    e_pred_sym = mlp_apply(params["edge_sym_mlp"], e_f_sym)
    e_pred_dir = mlp_apply(params["edge_dir_mlp"], e_f_dir)
    e_pred = jnp.concatenate([e_pred_dir, e_pred_sym], -1)
    return v_pred, e_pred


# ----------------------------- driver ------------------------------------------

if __name__ == "__main__":
    # Small but structurally faithful configuration.
    K, M = 8, 16
    B = 2
    V_dim = 16
    E_sym_dim, E_dir_dim = 10, 3          # fixed by forward-pass semantics
    node_conv_dims = [32, 32]
    p_pe_dim, t_pe_dim = 16, 16
    node_pred_head_dims = [32, 16]
    edge_sym_head_dims = [32, 16]
    edge_dir_head_dims = [32, 16]
    E = K * (K - 1) // 2                  # 28

    # Upper-triangle index tables (tri_ind_to_full_ind equivalent).
    full_ind, src_ind, dst_ind = [], [], []
    for i in range(K):
        for j in range(K):
            if i < j:
                full_ind.append(i * K + j)
                src_ind.append(i)
                dst_ind.append(j)

    cfg = {
        "K": K,
        "edge_guide_factor": 10.0,
        "p_pe_dim": p_pe_dim,
        "t_pe": sinusoidal_embedding(M, t_pe_dim),
        "p_pe": sinusoidal_embedding(K, p_pe_dim),
        "full_ind": jnp.array(full_ind, jnp.int32),
        "src_ind": jnp.array(src_ind, jnp.int32),
        "dst_ind": jnp.array(dst_ind, jnp.int32),
    }

    kg = KeyGen(jax.random.PRNGKey(0))
    params = init_params(kg, V_dim, node_conv_dims, p_pe_dim, t_pe_dim,
                         node_pred_head_dims, edge_sym_head_dims,
                         edge_dir_head_dims, E_sym_dim, E_dir_dim)

    k0, k1, k2 = jax.random.split(jax.random.PRNGKey(0), 3)
    V_noisy = jax.random.normal(k0, (B, K, V_dim), jnp.float32)
    E_noisy = jax.random.normal(k1, (B, E, E_dir_dim + E_sym_dim), jnp.float32)
    t = jax.random.randint(k2, (B,), 0, M)

    fwd = jax.jit(lambda V, Ee, tt: graph_denoise_forward(params, cfg, V, Ee, tt))
    v_pred, e_pred = fwd(V_noisy, E_noisy, t)
    jax.block_until_ready((v_pred, e_pred))

    assert v_pred.shape == (B, K, V_dim), v_pred.shape
    assert e_pred.shape == (B, E, E_dir_dim + E_sym_dim), e_pred.shape
    assert bool(jnp.all(jnp.isfinite(v_pred))) and bool(jnp.all(jnp.isfinite(e_pred)))
    print("KERNEL_OK")
</pallas_src>

<mosaic_0001>
module attributes {stable_mosaic.version = 11 : i64} {
  func.func @_conv_layer_kernel(%arg0: i32, %arg1: memref<1x8x32xf32, #tpu.memory_space<vmem>>, %arg2: memref<1x1x16xf32, #tpu.memory_space<vmem>>, %arg3: memref<8x16xf32, #tpu.memory_space<vmem>>, %arg4: memref<1x64x10xf32, #tpu.memory_space<vmem>>, %arg5: memref<1x64x3xf32, #tpu.memory_space<vmem>>, %arg6: memref<1x8x8x1xf32, #tpu.memory_space<vmem>>, %arg7: memref<1x8x1xf32, #tpu.memory_space<vmem>>, %arg8: memref<16x16xf32, #tpu.memory_space<vmem>>, %arg9: memref<1x16xf32, #tpu.memory_space<vmem>>, %arg10: memref<16x16xf32, #tpu.memory_space<vmem>>, %arg11: memref<1x16xf32, #tpu.memory_space<vmem>>, %arg12: memref<16x16xf32, #tpu.memory_space<vmem>>, %arg13: memref<1x16xf32, #tpu.memory_space<vmem>>, %arg14: memref<16x16xf32, #tpu.memory_space<vmem>>, %arg15: memref<1x16xf32, #tpu.memory_space<vmem>>, %arg16: memref<32x16xf32, #tpu.memory_space<vmem>>, %arg17: memref<16x16xf32, #tpu.memory_space<vmem>>, %arg18: memref<1x16xf32, #tpu.memory_space<vmem>>, %arg19: memref<16x16xf32, #tpu.memory_space<vmem>>, %arg20: memref<16x16xf32, #tpu.memory_space<vmem>>, %arg21: memref<1x16xf32, #tpu.memory_space<vmem>>, %arg22: memref<10x16xf32, #tpu.memory_space<vmem>>, %arg23: memref<1x16xf32, #tpu.memory_space<vmem>>, %arg24: memref<3x16xf32, #tpu.memory_space<vmem>>, %arg25: memref<1x16xf32, #tpu.memory_space<vmem>>, %arg26: memref<16x32xf32, #tpu.memory_space<vmem>>, %arg27: memref<16x32xf32, #tpu.memory_space<vmem>>, %arg28: memref<16x32xf32, #tpu.memory_space<vmem>>, %arg29: memref<16x32xf32, #tpu.memory_space<vmem>>, %arg30: memref<1x32xf32, #tpu.memory_space<vmem>>, %arg31: memref<32x32xf32, #tpu.memory_space<vmem>>, %arg32: memref<1x32xf32, #tpu.memory_space<vmem>>, %arg33: memref<32x32xf32, #tpu.memory_space<vmem>>, %arg34: memref<32x32xf32, #tpu.memory_space<vmem>>, %arg35: memref<1x32xf32, #tpu.memory_space<vmem>>, %arg36: memref<1x8x32xf32, #tpu.memory_space<vmem>>, %arg37: memref<1x8x8x32xf32, #tpu.memory_space<vmem>>) attributes {dimension_semantics = [#tpu.dimension_semantics<parallel>], iteration_bounds = array<i64: 2>, scalar_prefetch = 0 : i64, scratch_operands = 0 : i64, tpu.core_type = #tpu.core_type<tc>, window_params = [{transform_indices = @transform_0, window_bounds = array<i64: 1, 8, 32>}, {transform_indices = @transform_1, window_bounds = array<i64: 1, 1, 16>}, {pipeline_mode = #tpu.pipeline_mode<synchronous>, transform_indices = @transform_2, window_bounds = array<i64: 8, 16>}, {transform_indices = @transform_3, window_bounds = array<i64: 1, 64, 10>}, {transform_indices = @transform_4, window_bounds = array<i64: 1, 64, 3>}, {transform_indices = @transform_5, window_bounds = array<i64: 1, 8, 8, 1>}, {transform_indices = @transform_6, window_bounds = array<i64: 1, 8, 1>}, {pipeline_mode = #tpu.pipeline_mode<synchronous>, transform_indices = @transform_7, window_bounds = array<i64: 16, 16>}, {pipeline_mode = #tpu.pipeline_mode<synchronous>, transform_indices = @transform_8, window_bounds = array<i64: 1, 16>}, {pipeline_mode = #tpu.pipeline_mode<synchronous>, transform_indices = @transform_9, window_bounds = array<i64: 16, 16>}, {pipeline_mode = #tpu.pipeline_mode<synchronous>, transform_indices = @transform_10, window_bounds = array<i64: 1, 16>}, {pipeline_mode = #tpu.pipeline_mode<synchronous>, transform_indices = @transform_11, window_bounds = array<i64: 16, 16>}, {pipeline_mode = #tpu.pipeline_mode<synchronous>, transform_indices = @transform_12, window_bounds = array<i64: 1, 16>}, {pipeline_mode = #tpu.pipeline_mode<synchronous>, transform_indices = @transform_13, window_bounds = array<i64: 16, 16>}, {pipeline_mode = #tpu.pipeline_mode<synchronous>, transform_indices = @transform_14, window_bounds = array<i64: 1, 16>}, {pipeline_mode = #tpu.pipeline_mode<synchronous>, transform_indices = @transform_15, window_bounds = array<i64: 32, 16>}, {pipeline_mode = #tpu.pipeline_mode<synchronous>, transform_indices = @transform_16, window_bounds = array<i64: 16, 16>}, {pipeline_mode = #tpu.pipeline_mode<synchronous>, transform_indices = @transform_17, window_bounds = array<i64: 1, 16>}, {pipeline_mode = #tpu.pipeline_mode<synchronous>, transform_indices = @transform_18, window_bounds = array<i64: 16, 16>}, {pipeline_mode = #tpu.pipeline_mode<synchronous>, transform_indices = @transform_19, window_bounds = array<i64: 16, 16>}, {pipeline_mode = #tpu.pipeline_mode<synchronous>, transform_indices = @transform_20, window_bounds = array<i64: 1, 16>}, {pipeline_mode = #tpu.pipeline_mode<synchronous>, transform_indices = @transform_21, window_bounds = array<i64: 10, 16>}, {pipeline_mode = #tpu.pipeline_mode<synchronous>, transform_indices = @transform_22, window_bounds = array<i64: 1, 16>}, {pipeline_mode = #tpu.pipeline_mode<synchronous>, transform_indices = @transform_23, window_bounds = array<i64: 3, 16>}, {pipeline_mode = #tpu.pipeline_mode<synchronous>, transform_indices = @transform_24, window_bounds = array<i64: 1, 16>}, {pipeline_mode = #tpu.pipeline_mode<synchronous>, transform_indices = @transform_25, window_bounds = array<i64: 16, 32>}, {pipeline_mode = #tpu.pipeline_mode<synchronous>, transform_indices = @transform_26, window_bounds = array<i64: 16, 32>}, {pipeline_mode = #tpu.pipeline_mode<synchronous>, transform_indices = @transform_27, window_bounds = array<i64: 16, 32>}, {pipeline_mode = #tpu.pipeline_mode<synchronous>, transform_indices = @transform_28, window_bounds = array<i64: 16, 32>}, {pipeline_mode = #tpu.pipeline_mode<synchronous>, transform_indices = @transform_29, window_bounds = array<i64: 1, 32>}, {pipeline_mode = #tpu.pipeline_mode<synchronous>, transform_indices = @transform_30, window_bounds = array<i64: 32, 32>}, {pipeline_mode = #tpu.pipeline_mode<synchronous>, transform_indices = @transform_31, window_bounds = array<i64: 1, 32>}, {pipeline_mode = #tpu.pipeline_mode<synchronous>, transform_indices = @transform_32, window_bounds = array<i64: 32, 32>}, {pipeline_mode = #tpu.pipeline_mode<synchronous>, transform_indices = @transform_33, window_bounds = array<i64: 32, 32>}, {pipeline_mode = #tpu.pipeline_mode<synchronous>, transform_indices = @transform_34, window_bounds = array<i64: 1, 32>}, {transform_indices = @transform_35, window_bounds = array<i64: 1, 8, 32>}, {transform_indices = @transform_36, window_bounds = array<i64: 1, 8, 8, 32>}]} {
    %c0 = arith.constant 0 : index
    %c0_0 = arith.constant 0 : index
    %c0_1 = arith.constant 0 : index
    %0 = vector.load %arg1[%c0, %c0_0, %c0_1] : memref<1x8x32xf32, #tpu.memory_space<vmem>>, vector<1x8x32xf32>
    %1 = vector.shape_cast %0 : vector<1x8x32xf32> to vector<8x32xf32>
    %c0_2 = arith.constant 0 : index
    %c0_3 = arith.constant 0 : index
    %c0_4 = arith.constant 0 : index
    %2 = vector.load %arg2[%c0_2, %c0_3, %c0_4] : memref<1x1x16xf32, #tpu.memory_space<vmem>>, vector<1x1x16xf32>
    %3 = vector.shape_cast %2 : vector<1x1x16xf32> to vector<1x16xf32>
    %c0_5 = arith.constant 0 : index
    %c0_6 = arith.constant 0 : index
    %4 = vector.load %arg3[%c0_5, %c0_6] : memref<8x16xf32, #tpu.memory_space<vmem>>, vector<8x16xf32>
    %c0_7 = arith.constant 0 : index
    %c0_8 = arith.constant 0 : index
    %c0_9 = arith.constant 0 : index
    %5 = vector.load %arg4[%c0_7, %c0_8, %c0_9] : memref<1x64x10xf32, #tpu.memory_space<vmem>>, vector<1x64x10xf32>
    %6 = vector.shape_cast %5 : vector<1x64x10xf32> to vector<64x10xf32>
    %c0_10 = arith.constant 0 : index
    %c0_11 = arith.constant 0 : index
    %c0_12 = arith.constant 0 : index
    %7 = vector.load %arg5[%c0_10, %c0_11, %c0_12] : memref<1x64x3xf32, #tpu.memory_space<vmem>>, vector<1x64x3xf32>
    %8 = vector.shape_cast %7 : vector<1x64x3xf32> to vector<64x3xf32>
    %c0_13 = arith.constant 0 : index
    %c0_14 = arith.constant 0 : index
    %c0_15 = arith.constant 0 : index
    %c0_16 = arith.constant 0 : index
    %9 = vector.load %arg6[%c0_13, %c0_14, %c0_15, %c0_16] : memref<1x8x8x1xf32, #tpu.memory_space<vmem>>, vector<1x8x8x1xf32>
    %10 = vector.shape_cast %9 : vector<1x8x8x1xf32> to vector<8x8x1xf32>
    %c0_17 = arith.constant 0 : index
    %c0_18 = arith.constant 0 : index
    %c0_19 = arith.constant 0 : index
    %11 = vector.load %arg7[%c0_17, %c0_18, %c0_19] : memref<1x8x1xf32, #tpu.memory_space<vmem>>, vector<1x8x1xf32>
    %12 = vector.shape_cast %11 : vector<1x8x1xf32> to vector<8x1xf32>
    %c0_20 = arith.constant 0 : index
    %c0_21 = arith.constant 0 : index
    %13 = vector.load %arg8[%c0_20, %c0_21] : memref<16x16xf32, #tpu.memory_space<vmem>>, vector<16x16xf32>
    %cst = arith.constant dense<0.000000e+00> : vector<1x16xf32>
    %14 = tpu.matmul %3, %13, %cst {dimension_numbers = #tpu.dot_dimension_numbers<[1], [0], [0], [1], [0, 0, 1, 1], [], []>} : vector<1x16xf32>, vector<16x16xf32>, vector<1x16xf32> -> vector<1x16xf32>
    %c0_22 = arith.constant 0 : index
    %c0_23 = arith.constant 0 : index
    %15 = vector.load %arg9[%c0_22, %c0_23] : memref<1x16xf32, #tpu.memory_space<vmem>>, vector<1x16xf32>
    %16 = arith.addf %14, %15 : vector<1x16xf32>
    %cst_24 = arith.constant 0.000000e+00 : f32
    %17 = vector.broadcast %cst_24 : f32 to vector<1x16xf32>
    %18 = arith.cmpf oge, %16, %17 : vector<1x16xf32>
    %cst_25 = arith.constant 0.00999999977 : f32
    %19 = vector.broadcast %cst_25 : f32 to vector<1x16xf32>
    %20 = arith.mulf %19, %16 : vector<1x16xf32>
    %21 = arith.select %18, %16, %20 : vector<1x16xi1>, vector<1x16xf32>
    %c0_26 = arith.constant 0 : index
    %c0_27 = arith.constant 0 : index
    %22 = vector.load %arg10[%c0_26, %c0_27] : memref<16x16xf32, #tpu.memory_space<vmem>>, vector<16x16xf32>
    %cst_28 = arith.constant dense<0.000000e+00> : vector<1x16xf32>
    %23 = tpu.matmul %21, %22, %cst_28 {dimension_numbers = #tpu.dot_dimension_numbers<[1], [0], [0], [1], [0, 0, 1, 1], [], []>} : vector<1x16xf32>, vector<16x16xf32>, vector<1x16xf32> -> vector<1x16xf32>
    %c0_29 = arith.constant 0 : index
    %c0_30 = arith.constant 0 : index
    %24 = vector.load %arg11[%c0_29, %c0_30] : memref<1x16xf32, #tpu.memory_space<vmem>>, vector<1x16xf32>
    %25 = arith.addf %23, %24 : vector<1x16xf32>
    %c0_31 = arith.constant 0 : index
    %c0_32 = arith.constant 0 : index
    %26 = vector.load %arg12[%c0_31, %c0_32] : memref<16x16xf32, #tpu.memory_space<vmem>>, vector<16x16xf32>
    %cst_33 = arith.constant dense<0.000000e+00> : vector<8x16xf32>
    %27 = tpu.matmul %4, %26, %cst_33 {dimension_numbers = #tpu.dot_dimension_numbers<[1], [0], [0], [1], [0, 0, 1, 1], [], []>} : vector<8x16xf32>, vector<16x16xf32>, vector<8x16xf32> -> vector<8x16xf32>
    %c0_34 = arith.constant 0 : index
    %c0_35 = arith.constant 0 : index
    %28 = vector.load %arg13[%c0_34, %c0_35] : memref<1x16xf32, #tpu.memory_space<vmem>>, vector<1x16xf32>
    %29 = vector.broadcast %28 : vector<1x16xf32> to vector<8x16xf32>
    %30 = arith.addf %27, %29 : vector<8x16xf32>
    %cst_36 = arith.constant 0.000000e+00 : f32
    %31 = vector.broadcast %cst_36 : f32 to vector<8x16xf32>
    %32 = arith.cmpf oge, %30, %31 : vector<8x16xf32>
    %cst_37 = arith.constant 0.00999999977 : f32
    %33 = vector.broadcast %cst_37 : f32 to vector<8x16xf32>
    %34 = arith.mulf %33, %30 : vector<8x16xf32>
    %35 = arith.select %32, %30, %34 : vector<8x16xi1>, vector<8x16xf32>
    %c0_38 = arith.constant 0 : index
    %c0_39 = arith.constant 0 : index
    %36 = vector.load %arg14[%c0_38, %c0_39] : memref<16x16xf32, #tpu.memory_space<vmem>>, vector<16x16xf32>
    %cst_40 = arith.constant dense<0.000000e+00> : vector<8x16xf32>
    %37 = tpu.matmul %35, %36, %cst_40 {dimension_numbers = #tpu.dot_dimension_numbers<[1], [0], [0], [1], [0, 0, 1, 1], [], []>} : vector<8x16xf32>, vector<16x16xf32>, vector<8x16xf32> -> vector<8x16xf32>
    %c0_41 = arith.constant 0 : index
    %c0_42 = arith.constant 0 : index
    %38 = vector.load %arg15[%c0_41, %c0_42] : memref<1x16xf32, #tpu.memory_space<vmem>>, vector<1x16xf32>
    %39 = vector.broadcast %38 : vector<1x16xf32> to vector<8x16xf32>
    %40 = arith.addf %37, %39 : vector<8x16xf32>
    %c0_43 = arith.constant 0 : index
    %c0_44 = arith.constant 0 : index
    %41 = vector.load %arg16[%c0_43, %c0_44] : memref<32x16xf32, #tpu.memory_space<vmem>>, vector<32x16xf32>
    %cst_45 = arith.constant dense<0.000000e+00> : vector<8x16xf32>
    %42 = tpu.matmul %1, %41, %cst_45 {dimension_numbers = #tpu.dot_dimension_numbers<[1], [0], [0], [1], [0, 0, 1, 1], [], []>} : vector<8x32xf32>, vector<32x16xf32>, vector<8x16xf32> -> vector<8x16xf32>
    %c0_46 = arith.constant 0 : index
    %c0_47 = arith.constant 0 : index
    %43 = vector.load %arg17[%c0_46, %c0_47] : memref<16x16xf32, #tpu.memory_space<vmem>>, vector<16x16xf32>
    %cst_48 = arith.constant dense<0.000000e+00> : vector<8x16xf32>
    %44 = tpu.matmul %40, %43, %cst_48 {dimension_numbers = #tpu.dot_dimension_numbers<[1], [0], [0], [1], [0, 0, 1, 1], [], []>} : vector<8x16xf32>, vector<16x16xf32>, vector<8x16xf32> -> vector<8x16xf32>
    %45 = arith.addf %42, %44 : vector<8x16xf32>
    %c0_49 = arith.constant 0 : index
    %c0_50 = arith.constant 0 : index
    %46 = vector.load %arg18[%c0_49, %c0_50] : memref<1x16xf32, #tpu.memory_space<vmem>>, vector<1x16xf32>
    %47 = vector.broadcast %46 : vector<1x16xf32> to vector<8x16xf32>
    %48 = arith.addf %45, %47 : vector<8x16xf32>
    %cst_51 = arith.constant 0.000000e+00 : f32
    %49 = vector.broadcast %cst_51 : f32 to vector<8x16xf32>
    %50 = arith.cmpf oge, %48, %49 : vector<8x16xf32>
    %cst_52 = arith.constant 0.00999999977 : f32
    %51 = vector.broadcast %cst_52 : f32 to vector<8x16xf32>
    %52 = arith.mulf %51, %48 : vector<8x16xf32>
    %53 = arith.select %50, %48, %52 : vector<8x16xi1>, vector<8x16xf32>
    %c0_53 = arith.constant 0 : index
    %c0_54 = arith.constant 0 : index
    %54 = vector.load %arg19[%c0_53, %c0_54] : memref<16x16xf32, #tpu.memory_space<vmem>>, vector<16x16xf32>
    %cst_55 = arith.constant dense<0.000000e+00> : vector<8x16xf32>
    %55 = tpu.matmul %53, %54, %cst_55 {dimension_numbers = #tpu.dot_dimension_numbers<[1], [0], [0], [1], [0, 0, 1, 1], [], []>} : vector<8x16xf32>, vector<16x16xf32>, vector<8x16xf32> -> vector<8x16xf32>
    %c0_56 = arith.constant 0 : index
    %c0_57 = arith.constant 0 : index
    %56 = vector.load %arg20[%c0_56, %c0_57] : memref<16x16xf32, #tpu.memory_space<vmem>>, vector<16x16xf32>
    %cst_58 = arith.constant dense<0.000000e+00> : vector<1x16xf32>
    %57 = tpu.matmul %25, %56, %cst_58 {dimension_numbers = #tpu.dot_dimension_numbers<[1], [0], [0], [1], [0, 0, 1, 1], [], []>} : vector<1x16xf32>, vector<16x16xf32>, vector<1x16xf32> -> vector<1x16xf32>
    %58 = vector.broadcast %57 : vector<1x16xf32> to vector<8x16xf32>
    %59 = arith.addf %55, %58 : vector<8x16xf32>
    %c0_59 = arith.constant 0 : index
    %c0_60 = arith.constant 0 : index
    %60 = vector.load %arg21[%c0_59, %c0_60] : memref<1x16xf32, #tpu.memory_space<vmem>>, vector<1x16xf32>
    %61 = vector.broadcast %60 : vector<1x16xf32> to vector<8x16xf32>
    %62 = arith.addf %59, %61 : vector<8x16xf32>
    %cst_61 = arith.constant 0.000000e+00 : f32
    %63 = vector.broadcast %cst_61 : f32 to vector<8x16xf32>
    %64 = arith.cmpf oge, %62, %63 : vector<8x16xf32>
    %cst_62 = arith.constant 0.00999999977 : f32
    %65 = vector.broadcast %cst_62 : f32 to vector<8x16xf32>
    %66 = arith.mulf %65, %62 : vector<8x16xf32>
    %67 = arith.select %64, %62, %66 : vector<8x16xi1>, vector<8x16xf32>
    %c0_63 = arith.constant 0 : index
    %c0_64 = arith.constant 0 : index
    %68 = vector.load %arg22[%c0_63, %c0_64] : memref<10x16xf32, #tpu.memory_space<vmem>>, vector<10x16xf32>
    %cst_65 = arith.constant dense<0.000000e+00> : vector<64x16xf32>
    %69 = tpu.matmul %6, %68, %cst_65 {dimension_numbers = #tpu.dot_dimension_numbers<[1], [0], [0], [1], [0, 0, 1, 1], [], []>} : vector<64x10xf32>, vector<10x16xf32>, vector<64x16xf32> -> vector<64x16xf32>
    %c0_66 = arith.constant 0 : index
    %c0_67 = arith.constant 0 : index
    %70 = vector.load %arg23[%c0_66, %c0_67] : memref<1x16xf32, #tpu.memory_space<vmem>>, vector<1x16xf32>
    %71 = vector.broadcast %70 : vector<1x16xf32> to vector<64x16xf32>
    %72 = arith.addf %69, %71 : vector<64x16xf32>
    %cst_68 = arith.constant 0.000000e+00 : f32
    %73 = vector.broadcast %cst_68 : f32 to vector<64x16xf32>
    %74 = arith.cmpf oge, %72, %73 : vector<64x16xf32>
    %cst_69 = arith.constant 0.00999999977 : f32
    %75 = vector.broadcast %cst_69 : f32 to vector<64x16xf32>
    %76 = arith.mulf %75, %72 : vector<64x16xf32>
    %77 = arith.select %74, %72, %76 : vector<64x16xi1>, vector<64x16xf32>
    %c0_70 = arith.constant 0 : index
    %c0_71 = arith.constant 0 : index
    %78 = vector.load %arg24[%c0_70, %c0_71] : memref<3x16xf32, #tpu.memory_space<vmem>>, vector<3x16xf32>
    %cst_72 = arith.constant dense<0.000000e+00> : vector<64x16xf32>
    %79 = tpu.matmul %8, %78, %cst_72 {dimension_numbers = #tpu.dot_dimension_numbers<[1], [0], [0], [1], [0, 0, 1, 1], [], []>} : vector<64x3xf32>, vector<3x16xf32>, vector<64x16xf32> -> vector<64x16xf32>
    %c0_73 = arith.constant 0 : index
    %c0_74 = arith.constant 0 : index
    %80 = vector.load %arg25[%c0_73, %c0_74] : memref<1x16xf32, #tpu.memory_space<vmem>>, vector<1x16xf32>
    %81 = vector.broadcast %80 : vector<1x16xf32> to vector<64x16xf32>
    %82 = arith.addf %79, %81 : vector<64x16xf32>
    %cst_75 = arith.constant 0.000000e+00 : f32
    %83 = vector.broadcast %cst_75 : f32 to vector<64x16xf32>
    %84 = arith.cmpf oge, %82, %83 : vector<64x16xf32>
    %cst_76 = arith.constant 0.00999999977 : f32
    %85 = vector.broadcast %cst_76 : f32 to vector<64x16xf32>
    %86 = arith.mulf %85, %82 : vector<64x16xf32>
    %87 = arith.select %84, %82, %86 : vector<64x16xi1>, vector<64x16xf32>
    %c0_77 = arith.constant 0 : index
    %c0_78 = arith.constant 0 : index
    %88 = vector.load %arg26[%c0_77, %c0_78] : memref<16x32xf32, #tpu.memory_space<vmem>>, vector<16x32xf32>
    %cst_79 = arith.constant dense<0.000000e+00> : vector<64x32xf32>
    %89 = tpu.matmul %77, %88, %cst_79 {dimension_numbers = #tpu.dot_dimension_numbers<[1], [0], [0], [1], [0, 0, 1, 1], [], []>} : vector<64x16xf32>, vector<16x32xf32>, vector<64x32xf32> -> vector<64x32xf32>
    %c0_80 = arith.constant 0 : index
    %c0_81 = arith.constant 0 : index
    %90 = vector.load %arg27[%c0_80, %c0_81] : memref<16x32xf32, #tpu.memory_space<vmem>>, vector<16x32xf32>
    %cst_82 = arith.constant dense<0.000000e+00> : vector<64x32xf32>
    %91 = tpu.matmul %87, %90, %cst_82 {dimension_numbers = #tpu.dot_dimension_numbers<[1], [0], [0], [1], [0, 0, 1, 1], [], []>} : vector<64x16xf32>, vector<16x32xf32>, vector<64x32xf32> -> vector<64x32xf32>
    %92 = arith.addf %89, %91 : vector<64x32xf32>
    %c0_83 = arith.constant 0 : index
    %c0_84 = arith.constant 0 : index
    %93 = vector.load %arg28[%c0_83, %c0_84] : memref<16x32xf32, #tpu.memory_space<vmem>>, vector<16x32xf32>
    %cst_85 = arith.constant dense<0.000000e+00> : vector<8x32xf32>
    %94 = tpu.matmul %67, %93, %cst_85 {dimension_numbers = #tpu.dot_dimension_numbers<[1], [0], [0], [1], [0, 0, 1, 1], [], []>} : vector<8x16xf32>, vector<16x32xf32>, vector<8x32xf32> -> vector<8x32xf32>
    %c0_86 = arith.constant 0 : index
    %c0_87 = arith.constant 0 : index
    %95 = vector.load %arg29[%c0_86, %c0_87] : memref<16x32xf32, #tpu.memory_space<vmem>>, vector<16x32xf32>
    %cst_88 = arith.constant dense<0.000000e+00> : vector<8x32xf32>
    %96 = tpu.matmul %67, %95, %cst_88 {dimension_numbers = #tpu.dot_dimension_numbers<[1], [0], [0], [1], [0, 0, 1, 1], [], []>} : vector<8x16xf32>, vector<16x32xf32>, vector<8x32xf32> -> vector<8x32xf32>
    %97 = vector.shape_cast %92 : vector<64x32xf32> to vector<8x8x32xf32>
    %98 = vector.shape_cast %94 : vector<8x32xf32> to vector<8x1x32xf32>
    %99 = vector.broadcast %98 : vector<8x1x32xf32> to vector<8x8x32xf32>
    %100 = arith.addf %97, %99 : vector<8x8x32xf32>
    %101 = vector.shape_cast %96 : vector<8x32xf32> to vector<1x8x32xf32>
    %102 = vector.broadcast %101 : vector<1x8x32xf32> to vector<8x8x32xf32>
    %103 = arith.addf %100, %102 : vector<8x8x32xf32>
    %c0_89 = arith.constant 0 : index
    %c0_90 = arith.constant 0 : index
    %104 = vector.load %arg30[%c0_89, %c0_90] : memref<1x32xf32, #tpu.memory_space<vmem>>, vector<1x32xf32>
    %105 = vector.shape_cast %104 : vector<1x32xf32> to vector<1x1x32xf32>
    %106 = vector.broadcast %105 : vector<1x1x32xf32> to vector<8x8x32xf32>
    %107 = arith.addf %103, %106 : vector<8x8x32xf32>
    %cst_91 = arith.constant 0.000000e+00 : f32
    %108 = vector.broadcast %cst_91 : f32 to vector<8x8x32xf32>
    %109 = arith.cmpf oge, %107, %108 : vector<8x8x32xf32>
    %cst_92 = arith.constant 0.00999999977 : f32
    %110 = vector.broadcast %cst_92 : f32 to vector<8x8x32xf32>
    %111 = arith.mulf %110, %107 : vector<8x8x32xf32>
    %112 = arith.select %109, %107, %111 : vector<8x8x32xi1>, vector<8x8x32xf32>
    %113 = vector.shape_cast %112 : vector<8x8x32xf32> to vector<64x32xf32>
    %c0_93 = arith.constant 0 : index
    %c0_94 = arith.constant 0 : index
    %114 = vector.load %arg31[%c0_93, %c0_94] : memref<32x32xf32, #tpu.memory_space<vmem>>, vector<32x32xf32>
    %cst_95 = arith.constant dense<0.000000e+00> : vector<64x32xf32>
    %115 = tpu.matmul %113, %114, %cst_95 {dimension_numbers = #tpu.dot_dimension_numbers<[1], [0], [0], [1], [0, 0, 1, 1], [], []>} : vector<64x32xf32>, vector<32x32xf32>, vector<64x32xf32> -> vector<64x32xf32>
    %c0_96 = arith.constant 0 : index
    %c0_97 = arith.constant 0 : index
    %116 = vector.load %arg32[%c0_96, %c0_97] : memref<1x32xf32, #tpu.memory_space<vmem>>, vector<1x32xf32>
    %117 = vector.broadcast %116 : vector<1x32xf32> to vector<64x32xf32>
    %118 = arith.addf %115, %117 : vector<64x32xf32>
    %cst_98 = arith.constant 0.000000e+00 : f32
    %119 = vector.broadcast %cst_98 : f32 to vector<64x32xf32>
    %120 = arith.cmpf oge, %118, %119 : vector<64x32xf32>
    %cst_99 = arith.constant 0.00999999977 : f32
    %121 = vector.broadcast %cst_99 : f32 to vector<64x32xf32>
    %122 = arith.mulf %121, %118 : vector<64x32xf32>
    %123 = arith.select %120, %118, %122 : vector<64x32xi1>, vector<64x32xf32>
    %124 = vector.shape_cast %123 : vector<64x32xf32> to vector<8x8x32xf32>
    %c0_100 = arith.constant 0 : index
    %c0_101 = arith.constant 0 : index
    %c0_102 = arith.constant 0 : index
    %c0_103 = arith.constant 0 : index
    %125 = vector.load %arg37[%c0_100, %c0_101, %c0_102, %c0_103] : memref<1x8x8x32xf32, #tpu.memory_space<vmem>>, vector<1x8x8x32xf32>
    %126 = vector.shape_cast %125 : vector<1x8x8x32xf32> to vector<8x8x32xf32>
    %127 = vector.shape_cast %124 : vector<8x8x32xf32> to vector<1x8x8x32xf32>
    tpu.vector_store %arg37[%c0_100, %c0_101, %c0_102, %c0_103], %127 {strides = array<i32>} : memref<1x8x8x32xf32, #tpu.memory_space<vmem>>, vector<1x8x8x32xf32>,
    %128 = vector.broadcast %10 : vector<8x8x1xf32> to vector<8x8x32xf32>
    %129 = arith.mulf %124, %128 : vector<8x8x32xf32>
    %cst_104 = arith.constant dense<0.000000e+00> : vector<8x32xf32>
    %130 = vector.multi_reduction <add>, %129, %cst_104 [1] : vector<8x8x32xf32> to vector<8x32xf32>
    %131 = vector.broadcast %12 : vector<8x1xf32> to vector<8x32xf32>
    %132 = arith.mulf %130, %131 : vector<8x32xf32>
    %c0_105 = arith.constant 0 : index
    %c0_106 = arith.constant 0 : index
    %133 = vector.load %arg33[%c0_105, %c0_106] : memref<32x32xf32, #tpu.memory_space<vmem>>, vector<32x32xf32>
    %cst_107 = arith.constant dense<0.000000e+00> : vector<8x32xf32>
    %134 = tpu.matmul %1, %133, %cst_107 {dimension_numbers = #tpu.dot_dimension_numbers<[1], [0], [0], [1], [0, 0, 1, 1], [], []>} : vector<8x32xf32>, vector<32x32xf32>, vector<8x32xf32> -> vector<8x32xf32>
    %c0_108 = arith.constant 0 : index
    %c0_109 = arith.constant 0 : index
    %135 = vector.load %arg34[%c0_108, %c0_109] : memref<32x32xf32, #tpu.memory_space<vmem>>, vector<32x32xf32>
    %cst_110 = arith.constant dense<0.000000e+00> : vector<8x32xf32>
    %136 = tpu.matmul %132, %135, %cst_110 {dimension_numbers = #tpu.dot_dimension_numbers<[1], [0], [0], [1], [0, 0, 1, 1], [], []>} : vector<8x32xf32>, vector<32x32xf32>, vector<8x32xf32> -> vector<8x32xf32>
    %137 = arith.addf %134, %136 : vector<8x32xf32>
    %c0_111 = arith.constant 0 : index
    %c0_112 = arith.constant 0 : index
    %138 = vector.load %arg35[%c0_111, %c0_112] : memref<1x32xf32, #tpu.memory_space<vmem>>, vector<1x32xf32>
    %139 = vector.broadcast %138 : vector<1x32xf32> to vector<8x32xf32>
    %140 = arith.addf %137, %139 : vector<8x32xf32>
    %cst_113 = arith.constant 0.000000e+00 : f32
    %141 = vector.broadcast %cst_113 : f32 to vector<8x32xf32>
    %142 = arith.cmpf oge, %140, %141 : vector<8x32xf32>
    %cst_114 = arith.constant 0.00999999977 : f32
    %143 = vector.broadcast %cst_114 : f32 to vector<8x32xf32>
    %144 = arith.mulf %143, %140 : vector<8x32xf32>
    %145 = arith.select %142, %140, %144 : vector<8x32xi1>, vector<8x32xf32>
    %c0_115 = arith.constant 0 : index
    %c0_116 = arith.constant 0 : index
    %c0_117 = arith.constant 0 : index
    %146 = vector.load %arg36[%c0_115, %c0_116, %c0_117] : memref<1x8x32xf32, #tpu.memory_space<vmem>>, vector<1x8x32xf32>
    %147 = vector.shape_cast %146 : vector<1x8x32xf32> to vector<8x32xf32>
    %148 = vector.shape_cast %145 : vector<8x32xf32> to vector<1x8x32xf32>
    tpu.vector_store %arg36[%c0_115, %c0_116, %c0_117], %148 {strides = array<i32>} : memref<1x8x32xf32, #tpu.memory_space<vmem>>, vector<1x8x32xf32>,
    return
  }
  func.func @transform_0(%arg0: i32) -> (i32, i32, i32) {
    %c0_i32 = arith.constant 0 : i32
    %c0_i32_0 = arith.constant 0 : i32
    %c0_i32_1 = arith.constant 0 : i32
    return %arg0, %c0_i32, %c0_i32_0 : i32, i32, i32
  }
  func.func @transform_1(%arg0: i32) -> (i32, i32, i32) {
    %c0_i32 = arith.constant 0 : i32
    %c0_i32_0 = arith.constant 0 : i32
    %c0_i32_1 = arith.constant 0 : i32
    return %arg0, %c0_i32, %c0_i32_0 : i32, i32, i32
  }
  func.func @transform_2(%arg0: i32) -> (i32, i32) {
    %c0_i32 = arith.constant 0 : i32
    %c0_i32_0 = arith.constant 0 : i32
    %c0_i32_1 = arith.constant 0 : i32
    return %c0_i32, %c0_i32_0 : i32, i32
  }
  func.func @transform_3(%arg0: i32) -> (i32, i32, i32) {
    %c0_i32 = arith.constant 0 : i32
    %c0_i32_0 = arith.constant 0 : i32
    %c0_i32_1 = arith.constant 0 : i32
    return %arg0, %c0_i32, %c0_i32_0 : i32, i32, i32
  }
  func.func @transform_4(%arg0: i32) -> (i32, i32, i32) {
    %c0_i32 = arith.constant 0 : i32
    %c0_i32_0 = arith.constant 0 : i32
    %c0_i32_1 = arith.constant 0 : i32
    return %arg0, %c0_i32, %c0_i32_0 : i32, i32, i32
  }
  func.func @transform_5(%arg0: i32) -> (i32, i32, i32, i32) {
    %c0_i32 = arith.constant 0 : i32
    %c0_i32_0 = arith.constant 0 : i32
    %c0_i32_1 = arith.constant 0 : i32
    %c0_i32_2 = arith.constant 0 : i32
    return %arg0, %c0_i32, %c0_i32_0, %c0_i32_1 : i32, i32, i32, i32
  }
  func.func @transform_6(%arg0: i32) -> (i32, i32, i32) {
    %c0_i32 = arith.constant 0 : i32
    %c0_i32_0 = arith.constant 0 : i32
    %c0_i32_1 = arith.constant 0 : i32
    return %arg0, %c0_i32, %c0_i32_0 : i32, i32, i32
  }
  func.func @transform_7(%arg0: i32) -> (i32, i32) {
    %c0_i32 = arith.constant 0 : i32
    %c0_i32_0 = arith.constant 0 : i32
    %c0_i32_1 = arith.constant 0 : i32
    return %c0_i32, %c0_i32_0 : i32, i32
  }
  func.func @transform_8(%arg0: i32) -> (i32, i32) {
    %c0_i32 = arith.constant 0 : i32
    %c0_i32_0 = arith.constant 0 : i32
    %c0_i32_1 = arith.constant 0 : i32
    return %c0_i32, %c0_i32_0 : i32, i32
  }
  func.func @transform_9(%arg0: i32) -> (i32, i32) {
    %c0_i32 = arith.constant 0 : i32
    %c0_i32_0 = arith.constant 0 : i32
    %c0_i32_1 = arith.constant 0 : i32
    return %c0_i32, %c0_i32_0 : i32, i32
  }
  func.func @transform_10(%arg0: i32) -> (i32, i32) {
    %c0_i32 = arith.constant 0 : i32
    %c0_i32_0 = arith.constant 0 : i32
    %c0_i32_1 = arith.constant 0 : i32
    return %c0_i32, %c0_i32_0 : i32, i32
  }
  func.func @transform_11(%arg0: i32) -> (i32, i32) {
    %c0_i32 = arith.constant 0 : i32
    %c0_i32_0 = arith.constant 0 : i32
    %c0_i32_1 = arith.constant 0 : i32
    return %c0_i32, %c0_i32_0 : i32, i32
  }
  func.func @transform_12(%arg0: i32) -> (i32, i32) {
    %c0_i32 = arith.constant 0 : i32
    %c0_i32_0 = arith.constant 0 : i32
    %c0_i32_1 = arith.constant 0 : i32
    return %c0_i32, %c0_i32_0 : i32, i32
  }
  func.func @transform_13(%arg0: i32) -> (i32, i32) {
    %c0_i32 = arith.constant 0 : i32
    %c0_i32_0 = arith.constant 0 : i32
    %c0_i32_1 = arith.constant 0 : i32
    return %c0_i32, %c0_i32_0 : i32, i32
  }
  func.func @transform_14(%arg0: i32) -> (i32, i32) {
    %c0_i32 = arith.constant 0 : i32
    %c0_i32_0 = arith.constant 0 : i32
    %c0_i32_1 = arith.constant 0 : i32
    return %c0_i32, %c0_i32_0 : i32, i32
  }
  func.func @transform_15(%arg0: i32) -> (i32, i32) {
    %c0_i32 = arith.constant 0 : i32
    %c0_i32_0 = arith.constant 0 : i32
    %c0_i32_1 = arith.constant 0 : i32
    return %c0_i32, %c0_i32_0 : i32, i32
  }
  func.func @transform_16(%arg0: i32) -> (i32, i32) {
    %c0_i32 = arith.constant 0 : i32
    %c0_i32_0 = arith.constant 0 : i32
    %c0_i32_1 = arith.constant 0 : i32
    return %c0_i32, %c0_i32_0 : i32, i32
  }
  func.func @transform_17(%arg0: i32) -> (i32, i32) {
    %c0_i32 = arith.constant 0 : i32
    %c0_i32_0 = arith.constant 0 : i32
    %c0_i32_1 = arith.constant 0 : i32
    return %c0_i32, %c0_i32_0 : i32, i32
  }
  func.func @transform_18(%arg0: i32) -> (i32, i32) {
    %c0_i32 = arith.constant 0 : i32
    %c0_i32_0 = arith.constant 0 : i32
    %c0_i32_1 = arith.constant 0 : i32
    return %c0_i32, %c0_i32_0 : i32, i32
  }
  func.func @transform_19(%arg0: i32) -> (i32, i32) {
    %c0_i32 = arith.constant 0 : i32
    %c0_i32_0 = arith.constant 0 : i32
    %c0_i32_1 = arith.constant 0 : i32
    return %c0_i32, %c0_i32_0 : i32, i32
  }
  func.func @transform_20(%arg0: i32) -> (i32, i32) {
    %c0_i32 = arith.constant 0 : i32
    %c0_i32_0 = arith.constant 0 : i32
    %c0_i32_1 = arith.constant 0 : i32
    return %c0_i32, %c0_i32_0 : i32, i32
  }
  func.func @transform_21(%arg0: i32) -> (i32, i32) {
    %c0_i32 = arith.constant 0 : i32
    %c0_i32_0 = arith.constant 0 : i32
    %c0_i32_1 = arith.constant 0 : i32
    return %c0_i32, %c0_i32_0 : i32, i32
  }
  func.func @transform_22(%arg0: i32) -> (i32, i32) {
    %c0_i32 = arith.constant 0 : i32
    %c0_i32_0 = arith.constant 0 : i32
    %c0_i32_1 = arith.constant 0 : i32
    return %c0_i32, %c0_i32_0 : i32, i32
  }
  func.func @transform_23(%arg0: i32) -> (i32, i32) {
    %c0_i32 = arith.constant 0 : i32
    %c0_i32_0 = arith.constant 0 : i32
    %c0_i32_1 = arith.constant 0 : i32
    return %c0_i32, %c0_i32_0 : i32, i32
  }
  func.func @transform_24(%arg0: i32) -> (i32, i32) {
    %c0_i32 = arith.constant 0 : i32
    %c0_i32_0 = arith.constant 0 : i32
    %c0_i32_1 = arith.constant 0 : i32
    return %c0_i32, %c0_i32_0 : i32, i32
  }
  func.func @transform_25(%arg0: i32) -> (i32, i32) {
    %c0_i32 = arith.constant 0 : i32
    %c0_i32_0 = arith.constant 0 : i32
    %c0_i32_1 = arith.constant 0 : i32
    return %c0_i32, %c0_i32_0 : i32, i32
  }
  func.func @transform_26(%arg0: i32) -> (i32, i32) {
    %c0_i32 = arith.constant 0 : i32
    %c0_i32_0 = arith.constant 0 : i32
    %c0_i32_1 = arith.constant 0 : i32
    return %c0_i32, %c0_i32_0 : i32, i32
  }
  func.func @transform_27(%arg0: i32) -> (i32, i32) {
    %c0_i32 = arith.constant 0 : i32
    %c0_i32_0 = arith.constant 0 : i32
    %c0_i32_1 = arith.constant 0 : i32
    return %c0_i32, %c0_i32_0 : i32, i32
  }
  func.func @transform_28(%arg0: i32) -> (i32, i32) {
    %c0_i32 = arith.constant 0 : i32
    %c0_i32_0 = arith.constant 0 : i32
    %c0_i32_1 = arith.constant 0 : i32
    return %c0_i32, %c0_i32_0 : i32, i32
  }
  func.func @transform_29(%arg0: i32) -> (i32, i32) {
    %c0_i32 = arith.constant 0 : i32
    %c0_i32_0 = arith.constant 0 : i32
    %c0_i32_1 = arith.constant 0 : i32
    return %c0_i32, %c0_i32_0 : i32, i32
  }
  func.func @transform_30(%arg0: i32) -> (i32, i32) {
    %c0_i32 = arith.constant 0 : i32
    %c0_i32_0 = arith.constant 0 : i32
    %c0_i32_1 = arith.constant 0 : i32
    return %c0_i32, %c0_i32_0 : i32, i32
  }
  func.func @transform_31(%arg0: i32) -> (i32, i32) {
    %c0_i32 = arith.constant 0 : i32
    %c0_i32_0 = arith.constant 0 : i32
    %c0_i32_1 = arith.constant 0 : i32
    return %c0_i32, %c0_i32_0 : i32, i32
  }
  func.func @transform_32(%arg0: i32) -> (i32, i32) {
    %c0_i32 = arith.constant 0 : i32
    %c0_i32_0 = arith.constant 0 : i32
    %c0_i32_1 = arith.constant 0 : i32
    return %c0_i32, %c0_i32_0 : i32, i32
  }
  func.func @transform_33(%arg0: i32) -> (i32, i32) {
    %c0_i32 = arith.constant 0 : i32
    %c0_i32_0 = arith.constant 0 : i32
    %c0_i32_1 = arith.constant 0 : i32
    return %c0_i32, %c0_i32_0 : i32, i32
  }
  func.func @transform_34(%arg0: i32) -> (i32, i32) {
    %c0_i32 = arith.constant 0 : i32
    %c0_i32_0 = arith.constant 0 : i32
    %c0_i32_1 = arith.constant 0 : i32
    return %c0_i32, %c0_i32_0 : i32, i32
  }
  func.func @transform_35(%arg0: i32) -> (i32, i32, i32) {
    %c0_i32 = arith.constant 0 : i32
    %c0_i32_0 = arith.constant 0 : i32
    %c0_i32_1 = arith.constant 0 : i32
    return %arg0, %c0_i32, %c0_i32_0 : i32, i32, i32
  }
  func.func @transform_36(%arg0: i32) -> (i32, i32, i32, i32) {
    %c0_i32 = arith.constant 0 : i32
    %c0_i32_0 = arith.constant 0 : i32
    %c0_i32_1 = arith.constant 0 : i32
    %c0_i32_2 = arith.constant 0 : i32
    return %arg0, %c0_i32, %c0_i32_0, %c0_i32_1 : i32, i32, i32, i32
  }
}

module attributes {stable_mosaic.version = 11 : i64} {
  func.func @_conv_layer_kernel(%arg0: i32, %arg1: memref<1x8x16xf32, #tpu.memory_space<vmem>>, %arg2: memref<1x1x16xf32, #tpu.memory_space<vmem>>, %arg3: memref<8x16xf32, #tpu.memory_space<vmem>>, %arg4: memref<1x64x10xf32, #tpu.memory_space<vmem>>, %arg5: memref<1x64x3xf32, #tpu.memory_space<vmem>>, %arg6: memref<1x8x8x1xf32, #tpu.memory_space<vmem>>, %arg7: memref<1x8x1xf32, #tpu.memory_space<vmem>>, %arg8: memref<16x16xf32, #tpu.memory_space<vmem>>, %arg9: memref<1x16xf32, #tpu.memory_space<vmem>>, %arg10: memref<16x16xf32, #tpu.memory_space<vmem>>, %arg11: memref<1x16xf32, #tpu.memory_space<vmem>>, %arg12: memref<16x16xf32, #tpu.memory_space<vmem>>, %arg13: memref<1x16xf32, #tpu.memory_space<vmem>>, %arg14: memref<16x16xf32, #tpu.memory_space<vmem>>, %arg15: memref<1x16xf32, #tpu.memory_space<vmem>>, %arg16: memref<16x16xf32, #tpu.memory_space<vmem>>, %arg17: memref<16x16xf32, #tpu.memory_space<vmem>>, %arg18: memref<1x16xf32, #tpu.memory_space<vmem>>, %arg19: memref<16x16xf32, #tpu.memory_space<vmem>>, %arg20: memref<16x16xf32, #tpu.memory_space<vmem>>, %arg21: memref<1x16xf32, #tpu.memory_space<vmem>>, %arg22: memref<10x16xf32, #tpu.memory_space<vmem>>, %arg23: memref<1x16xf32, #tpu.memory_space<vmem>>, %arg24: memref<3x16xf32, #tpu.memory_space<vmem>>, %arg25: memref<1x16xf32, #tpu.memory_space<vmem>>, %arg26: memref<16x32xf32, #tpu.memory_space<vmem>>, %arg27: memref<16x32xf32, #tpu.memory_space<vmem>>, %arg28: memref<16x32xf32, #tpu.memory_space<vmem>>, %arg29: memref<16x32xf32, #tpu.memory_space<vmem>>, %arg30: memref<1x32xf32, #tpu.memory_space<vmem>>, %arg31: memref<32x32xf32, #tpu.memory_space<vmem>>, %arg32: memref<1x32xf32, #tpu.memory_space<vmem>>, %arg33: memref<16x32xf32, #tpu.memory_space<vmem>>, %arg34: memref<32x32xf32, #tpu.memory_space<vmem>>, %arg35: memref<1x32xf32, #tpu.memory_space<vmem>>, %arg36: memref<1x8x32xf32, #tpu.memory_space<vmem>>, %arg37: memref<1x8x8x32xf32, #tpu.memory_space<vmem>>) attributes {dimension_semantics = [#tpu.dimension_semantics<parallel>], iteration_bounds = array<i64: 2>, scalar_prefetch = 0 : i64, scratch_operands = 0 : i64, tpu.core_type = #tpu.core_type<tc>, window_params = [{transform_indices = @transform_0, window_bounds = array<i64: 1, 8, 16>}, {transform_indices = @transform_1, window_bounds = array<i64: 1, 1, 16>}, {pipeline_mode = #tpu.pipeline_mode<synchronous>, transform_indices = @transform_2, window_bounds = array<i64: 8, 16>}, {transform_indices = @transform_3, window_bounds = array<i64: 1, 64, 10>}, {transform_indices = @transform_4, window_bounds = array<i64: 1, 64, 3>}, {transform_indices = @transform_5, window_bounds = array<i64: 1, 8, 8, 1>}, {transform_indices = @transform_6, window_bounds = array<i64: 1, 8, 1>}, {pipeline_mode = #tpu.pipeline_mode<synchronous>, transform_indices = @transform_7, window_bounds = array<i64: 16, 16>}, {pipeline_mode = #tpu.pipeline_mode<synchronous>, transform_indices = @transform_8, window_bounds = array<i64: 1, 16>}, {pipeline_mode = #tpu.pipeline_mode<synchronous>, transform_indices = @transform_9, window_bounds = array<i64: 16, 16>}, {pipeline_mode = #tpu.pipeline_mode<synchronous>, transform_indices = @transform_10, window_bounds = array<i64: 1, 16>}, {pipeline_mode = #tpu.pipeline_mode<synchronous>, transform_indices = @transform_11, window_bounds = array<i64: 16, 16>}, {pipeline_mode = #tpu.pipeline_mode<synchronous>, transform_indices = @transform_12, window_bounds = array<i64: 1, 16>}, {pipeline_mode = #tpu.pipeline_mode<synchronous>, transform_indices = @transform_13, window_bounds = array<i64: 16, 16>}, {pipeline_mode = #tpu.pipeline_mode<synchronous>, transform_indices = @transform_14, window_bounds = array<i64: 1, 16>}, {pipeline_mode = #tpu.pipeline_mode<synchronous>, transform_indices = @transform_15, window_bounds = array<i64: 16, 16>}, {pipeline_mode = #tpu.pipeline_mode<synchronous>, transform_indices = @transform_16, window_bounds = array<i64: 16, 16>}, {pipeline_mode = #tpu.pipeline_mode<synchronous>, transform_indices = @transform_17, window_bounds = array<i64: 1, 16>}, {pipeline_mode = #tpu.pipeline_mode<synchronous>, transform_indices = @transform_18, window_bounds = array<i64: 16, 16>}, {pipeline_mode = #tpu.pipeline_mode<synchronous>, transform_indices = @transform_19, window_bounds = array<i64: 16, 16>}, {pipeline_mode = #tpu.pipeline_mode<synchronous>, transform_indices = @transform_20, window_bounds = array<i64: 1, 16>}, {pipeline_mode = #tpu.pipeline_mode<synchronous>, transform_indices = @transform_21, window_bounds = array<i64: 10, 16>}, {pipeline_mode = #tpu.pipeline_mode<synchronous>, transform_indices = @transform_22, window_bounds = array<i64: 1, 16>}, {pipeline_mode = #tpu.pipeline_mode<synchronous>, transform_indices = @transform_23, window_bounds = array<i64: 3, 16>}, {pipeline_mode = #tpu.pipeline_mode<synchronous>, transform_indices = @transform_24, window_bounds = array<i64: 1, 16>}, {pipeline_mode = #tpu.pipeline_mode<synchronous>, transform_indices = @transform_25, window_bounds = array<i64: 16, 32>}, {pipeline_mode = #tpu.pipeline_mode<synchronous>, transform_indices = @transform_26, window_bounds = array<i64: 16, 32>}, {pipeline_mode = #tpu.pipeline_mode<synchronous>, transform_indices = @transform_27, window_bounds = array<i64: 16, 32>}, {pipeline_mode = #tpu.pipeline_mode<synchronous>, transform_indices = @transform_28, window_bounds = array<i64: 16, 32>}, {pipeline_mode = #tpu.pipeline_mode<synchronous>, transform_indices = @transform_29, window_bounds = array<i64: 1, 32>}, {pipeline_mode = #tpu.pipeline_mode<synchronous>, transform_indices = @transform_30, window_bounds = array<i64: 32, 32>}, {pipeline_mode = #tpu.pipeline_mode<synchronous>, transform_indices = @transform_31, window_bounds = array<i64: 1, 32>}, {pipeline_mode = #tpu.pipeline_mode<synchronous>, transform_indices = @transform_32, window_bounds = array<i64: 16, 32>}, {pipeline_mode = #tpu.pipeline_mode<synchronous>, transform_indices = @transform_33, window_bounds = array<i64: 32, 32>}, {pipeline_mode = #tpu.pipeline_mode<synchronous>, transform_indices = @transform_34, window_bounds = array<i64: 1, 32>}, {transform_indices = @transform_35, window_bounds = array<i64: 1, 8, 32>}, {transform_indices = @transform_36, window_bounds = array<i64: 1, 8, 8, 32>}]} {
    %c0 = arith.constant 0 : index
    %c0_0 = arith.constant 0 : index
    %c0_1 = arith.constant 0 : index
    %0 = vector.load %arg1[%c0, %c0_0, %c0_1] : memref<1x8x16xf32, #tpu.memory_space<vmem>>, vector<1x8x16xf32>
    %1 = vector.shape_cast %0 : vector<1x8x16xf32> to vector<8x16xf32>
    %c0_2 = arith.constant 0 : index
    %c0_3 = arith.constant 0 : index
    %c0_4 = arith.constant 0 : index
    %2 = vector.load %arg2[%c0_2, %c0_3, %c0_4] : memref<1x1x16xf32, #tpu.memory_space<vmem>>, vector<1x1x16xf32>
    %3 = vector.shape_cast %2 : vector<1x1x16xf32> to vector<1x16xf32>
    %c0_5 = arith.constant 0 : index
    %c0_6 = arith.constant 0 : index
    %4 = vector.load %arg3[%c0_5, %c0_6] : memref<8x16xf32, #tpu.memory_space<vmem>>, vector<8x16xf32>
    %c0_7 = arith.constant 0 : index
    %c0_8 = arith.constant 0 : index
    %c0_9 = arith.constant 0 : index
    %5 = vector.load %arg4[%c0_7, %c0_8, %c0_9] : memref<1x64x10xf32, #tpu.memory_space<vmem>>, vector<1x64x10xf32>
    %6 = vector.shape_cast %5 : vector<1x64x10xf32> to vector<64x10xf32>
    %c0_10 = arith.constant 0 : index
    %c0_11 = arith.constant 0 : index
    %c0_12 = arith.constant 0 : index
    %7 = vector.load %arg5[%c0_10, %c0_11, %c0_12] : memref<1x64x3xf32, #tpu.memory_space<vmem>>, vector<1x64x3xf32>
    %8 = vector.shape_cast %7 : vector<1x64x3xf32> to vector<64x3xf32>
    %c0_13 = arith.constant 0 : index
    %c0_14 = arith.constant 0 : index
    %c0_15 = arith.constant 0 : index
    %c0_16 = arith.constant 0 : index
    %9 = vector.load %arg6[%c0_13, %c0_14, %c0_15, %c0_16] : memref<1x8x8x1xf32, #tpu.memory_space<vmem>>, vector<1x8x8x1xf32>
    %10 = vector.shape_cast %9 : vector<1x8x8x1xf32> to vector<8x8x1xf32>
    %c0_17 = arith.constant 0 : index
    %c0_18 = arith.constant 0 : index
    %c0_19 = arith.constant 0 : index
    %11 = vector.load %arg7[%c0_17, %c0_18, %c0_19] : memref<1x8x1xf32, #tpu.memory_space<vmem>>, vector<1x8x1xf32>
    %12 = vector.shape_cast %11 : vector<1x8x1xf32> to vector<8x1xf32>
    %c0_20 = arith.constant 0 : index
    %c0_21 = arith.constant 0 : index
    %13 = vector.load %arg8[%c0_20, %c0_21] : memref<16x16xf32, #tpu.memory_space<vmem>>, vector<16x16xf32>
    %cst = arith.constant dense<0.000000e+00> : vector<1x16xf32>
    %14 = tpu.matmul %3, %13, %cst {dimension_numbers = #tpu.dot_dimension_numbers<[1], [0], [0], [1], [0, 0, 1, 1], [], []>} : vector<1x16xf32>, vector<16x16xf32>, vector<1x16xf32> -> vector<1x16xf32>
    %c0_22 = arith.constant 0 : index
    %c0_23 = arith.constant 0 : index
    %15 = vector.load %arg9[%c0_22, %c0_23] : memref<1x16xf32, #tpu.memory_space<vmem>>, vector<1x16xf32>
    %16 = arith.addf %14, %15 : vector<1x16xf32>
    %cst_24 = arith.constant 0.000000e+00 : f32
    %17 = vector.broadcast %cst_24 : f32 to vector<1x16xf32>
    %18 = arith.cmpf oge, %16, %17 : vector<1x16xf32>
    %cst_25 = arith.constant 0.00999999977 : f32
    %19 = vector.broadcast %cst_25 : f32 to vector<1x16xf32>
    %20 = arith.mulf %19, %16 : vector<1x16xf32>
    %21 = arith.select %18, %16, %20 : vector<1x16xi1>, vector<1x16xf32>
    %c0_26 = arith.constant 0 : index
    %c0_27 = arith.constant 0 : index
    %22 = vector.load %arg10[%c0_26, %c0_27] : memref<16x16xf32, #tpu.memory_space<vmem>>, vector<16x16xf32>
    %cst_28 = arith.constant dense<0.000000e+00> : vector<1x16xf32>
    %23 = tpu.matmul %21, %22, %cst_28 {dimension_numbers = #tpu.dot_dimension_numbers<[1], [0], [0], [1], [0, 0, 1, 1], [], []>} : vector<1x16xf32>, vector<16x16xf32>, vector<1x16xf32> -> vector<1x16xf32>
    %c0_29 = arith.constant 0 : index
    %c0_30 = arith.constant 0 : index
    %24 = vector.load %arg11[%c0_29, %c0_30] : memref<1x16xf32, #tpu.memory_space<vmem>>, vector<1x16xf32>
    %25 = arith.addf %23, %24 : vector<1x16xf32>
    %c0_31 = arith.constant 0 : index
    %c0_32 = arith.constant 0 : index
    %26 = vector.load %arg12[%c0_31, %c0_32] : memref<16x16xf32, #tpu.memory_space<vmem>>, vector<16x16xf32>
    %cst_33 = arith.constant dense<0.000000e+00> : vector<8x16xf32>
    %27 = tpu.matmul %4, %26, %cst_33 {dimension_numbers = #tpu.dot_dimension_numbers<[1], [0], [0], [1], [0, 0, 1, 1], [], []>} : vector<8x16xf32>, vector<16x16xf32>, vector<8x16xf32> -> vector<8x16xf32>
    %c0_34 = arith.constant 0 : index
    %c0_35 = arith.constant 0 : index
    %28 = vector.load %arg13[%c0_34, %c0_35] : memref<1x16xf32, #tpu.memory_space<vmem>>, vector<1x16xf32>
    %29 = vector.broadcast %28 : vector<1x16xf32> to vector<8x16xf32>
    %30 = arith.addf %27, %29 : vector<8x16xf32>
    %cst_36 = arith.constant 0.000000e+00 : f32
    %31 = vector.broadcast %cst_36 : f32 to vector<8x16xf32>
    %32 = arith.cmpf oge, %30, %31 : vector<8x16xf32>
    %cst_37 = arith.constant 0.00999999977 : f32
    %33 = vector.broadcast %cst_37 : f32 to vector<8x16xf32>
    %34 = arith.mulf %33, %30 : vector<8x16xf32>
    %35 = arith.select %32, %30, %34 : vector<8x16xi1>, vector<8x16xf32>
    %c0_38 = arith.constant 0 : index
    %c0_39 = arith.constant 0 : index
    %36 = vector.load %arg14[%c0_38, %c0_39] : memref<16x16xf32, #tpu.memory_space<vmem>>, vector<16x16xf32>
    %cst_40 = arith.constant dense<0.000000e+00> : vector<8x16xf32>
    %37 = tpu.matmul %35, %36, %cst_40 {dimension_numbers = #tpu.dot_dimension_numbers<[1], [0], [0], [1], [0, 0, 1, 1], [], []>} : vector<8x16xf32>, vector<16x16xf32>, vector<8x16xf32> -> vector<8x16xf32>
    %c0_41 = arith.constant 0 : index
    %c0_42 = arith.constant 0 : index
    %38 = vector.load %arg15[%c0_41, %c0_42] : memref<1x16xf32, #tpu.memory_space<vmem>>, vector<1x16xf32>
    %39 = vector.broadcast %38 : vector<1x16xf32> to vector<8x16xf32>
    %40 = arith.addf %37, %39 : vector<8x16xf32>
    %c0_43 = arith.constant 0 : index
    %c0_44 = arith.constant 0 : index
    %41 = vector.load %arg16[%c0_43, %c0_44] : memref<16x16xf32, #tpu.memory_space<vmem>>, vector<16x16xf32>
    %cst_45 = arith.constant dense<0.000000e+00> : vector<8x16xf32>
    %42 = tpu.matmul %1, %41, %cst_45 {dimension_numbers = #tpu.dot_dimension_numbers<[1], [0], [0], [1], [0, 0, 1, 1], [], []>} : vector<8x16xf32>, vector<16x16xf32>, vector<8x16xf32> -> vector<8x16xf32>
    %c0_46 = arith.constant 0 : index
    %c0_47 = arith.constant 0 : index
    %43 = vector.load %arg17[%c0_46, %c0_47] : memref<16x16xf32, #tpu.memory_space<vmem>>, vector<16x16xf32>
    %cst_48 = arith.constant dense<0.000000e+00> : vector<8x16xf32>
    %44 = tpu.matmul %40, %43, %cst_48 {dimension_numbers = #tpu.dot_dimension_numbers<[1], [0], [0], [1], [0, 0, 1, 1], [], []>} : vector<8x16xf32>, vector<16x16xf32>, vector<8x16xf32> -> vector<8x16xf32>
    %45 = arith.addf %42, %44 : vector<8x16xf32>
    %c0_49 = arith.constant 0 : index
    %c0_50 = arith.constant 0 : index
    %46 = vector.load %arg18[%c0_49, %c0_50] : memref<1x16xf32, #tpu.memory_space<vmem>>, vector<1x16xf32>
    %47 = vector.broadcast %46 : vector<1x16xf32> to vector<8x16xf32>
    %48 = arith.addf %45, %47 : vector<8x16xf32>
    %cst_51 = arith.constant 0.000000e+00 : f32
    %49 = vector.broadcast %cst_51 : f32 to vector<8x16xf32>
    %50 = arith.cmpf oge, %48, %49 : vector<8x16xf32>
    %cst_52 = arith.constant 0.00999999977 : f32
    %51 = vector.broadcast %cst_52 : f32 to vector<8x16xf32>
    %52 = arith.mulf %51, %48 : vector<8x16xf32>
    %53 = arith.select %50, %48, %52 : vector<8x16xi1>, vector<8x16xf32>
    %c0_53 = arith.constant 0 : index
    %c0_54 = arith.constant 0 : index
    %54 = vector.load %arg19[%c0_53, %c0_54] : memref<16x16xf32, #tpu.memory_space<vmem>>, vector<16x16xf32>
    %cst_55 = arith.constant dense<0.000000e+00> : vector<8x16xf32>
    %55 = tpu.matmul %53, %54, %cst_55 {dimension_numbers = #tpu.dot_dimension_numbers<[1], [0], [0], [1], [0, 0, 1, 1], [], []>} : vector<8x16xf32>, vector<16x16xf32>, vector<8x16xf32> -> vector<8x16xf32>
    %c0_56 = arith.constant 0 : index
    %c0_57 = arith.constant 0 : index
    %56 = vector.load %arg20[%c0_56, %c0_57] : memref<16x16xf32, #tpu.memory_space<vmem>>, vector<16x16xf32>
    %cst_58 = arith.constant dense<0.000000e+00> : vector<1x16xf32>
    %57 = tpu.matmul %25, %56, %cst_58 {dimension_numbers = #tpu.dot_dimension_numbers<[1], [0], [0], [1], [0, 0, 1, 1], [], []>} : vector<1x16xf32>, vector<16x16xf32>, vector<1x16xf32> -> vector<1x16xf32>
    %58 = vector.broadcast %57 : vector<1x16xf32> to vector<8x16xf32>
    %59 = arith.addf %55, %58 : vector<8x16xf32>
    %c0_59 = arith.constant 0 : index
    %c0_60 = arith.constant 0 : index
    %60 = vector.load %arg21[%c0_59, %c0_60] : memref<1x16xf32, #tpu.memory_space<vmem>>, vector<1x16xf32>
    %61 = vector.broadcast %60 : vector<1x16xf32> to vector<8x16xf32>
    %62 = arith.addf %59, %61 : vector<8x16xf32>
    %cst_61 = arith.constant 0.000000e+00 : f32
    %63 = vector.broadcast %cst_61 : f32 to vector<8x16xf32>
    %64 = arith.cmpf oge, %62, %63 : vector<8x16xf32>
    %cst_62 = arith.constant 0.00999999977 : f32
    %65 = vector.broadcast %cst_62 : f32 to vector<8x16xf32>
    %66 = arith.mulf %65, %62 : vector<8x16xf32>
    %67 = arith.select %64, %62, %66 : vector<8x16xi1>, vector<8x16xf32>
    %c0_63 = arith.constant 0 : index
    %c0_64 = arith.constant 0 : index
    %68 = vector.load %arg22[%c0_63, %c0_64] : memref<10x16xf32, #tpu.memory_space<vmem>>, vector<10x16xf32>
    %cst_65 = arith.constant dense<0.000000e+00> : vector<64x16xf32>
    %69 = tpu.matmul %6, %68, %cst_65 {dimension_numbers = #tpu.dot_dimension_numbers<[1], [0], [0], [1], [0, 0, 1, 1], [], []>} : vector<64x10xf32>, vector<10x16xf32>, vector<64x16xf32> -> vector<64x16xf32>
    %c0_66 = arith.constant 0 : index
    %c0_67 = arith.constant 0 : index
    %70 = vector.load %arg23[%c0_66, %c0_67] : memref<1x16xf32, #tpu.memory_space<vmem>>, vector<1x16xf32>
    %71 = vector.broadcast %70 : vector<1x16xf32> to vector<64x16xf32>
    %72 = arith.addf %69, %71 : vector<64x16xf32>
    %cst_68 = arith.constant 0.000000e+00 : f32
    %73 = vector.broadcast %cst_68 : f32 to vector<64x16xf32>
    %74 = arith.cmpf oge, %72, %73 : vector<64x16xf32>
    %cst_69 = arith.constant 0.00999999977 : f32
    %75 = vector.broadcast %cst_69 : f32 to vector<64x16xf32>
    %76 = arith.mulf %75, %72 : vector<64x16xf32>
    %77 = arith.select %74, %72, %76 : vector<64x16xi1>, vector<64x16xf32>
    %c0_70 = arith.constant 0 : index
    %c0_71 = arith.constant 0 : index
    %78 = vector.load %arg24[%c0_70, %c0_71] : memref<3x16xf32, #tpu.memory_space<vmem>>, vector<3x16xf32>
    %cst_72 = arith.constant dense<0.000000e+00> : vector<64x16xf32>
    %79 = tpu.matmul %8, %78, %cst_72 {dimension_numbers = #tpu.dot_dimension_numbers<[1], [0], [0], [1], [0, 0, 1, 1], [], []>} : vector<64x3xf32>, vector<3x16xf32>, vector<64x16xf32> -> vector<64x16xf32>
    %c0_73 = arith.constant 0 : index
    %c0_74 = arith.constant 0 : index
    %80 = vector.load %arg25[%c0_73, %c0_74] : memref<1x16xf32, #tpu.memory_space<vmem>>, vector<1x16xf32>
    %81 = vector.broadcast %80 : vector<1x16xf32> to vector<64x16xf32>
    %82 = arith.addf %79, %81 : vector<64x16xf32>
    %cst_75 = arith.constant 0.000000e+00 : f32
    %83 = vector.broadcast %cst_75 : f32 to vector<64x16xf32>
    %84 = arith.cmpf oge, %82, %83 : vector<64x16xf32>
    %cst_76 = arith.constant 0.00999999977 : f32
    %85 = vector.broadcast %cst_76 : f32 to vector<64x16xf32>
    %86 = arith.mulf %85, %82 : vector<64x16xf32>
    %87 = arith.select %84, %82, %86 : vector<64x16xi1>, vector<64x16xf32>
    %c0_77 = arith.constant 0 : index
    %c0_78 = arith.constant 0 : index
    %88 = vector.load %arg26[%c0_77, %c0_78] : memref<16x32xf32, #tpu.memory_space<vmem>>, vector<16x32xf32>
    %cst_79 = arith.constant dense<0.000000e+00> : vector<64x32xf32>
    %89 = tpu.matmul %77, %88, %cst_79 {dimension_numbers = #tpu.dot_dimension_numbers<[1], [0], [0], [1], [0, 0, 1, 1], [], []>} : vector<64x16xf32>, vector<16x32xf32>, vector<64x32xf32> -> vector<64x32xf32>
    %c0_80 = arith.constant 0 : index
    %c0_81 = arith.constant 0 : index
    %90 = vector.load %arg27[%c0_80, %c0_81] : memref<16x32xf32, #tpu.memory_space<vmem>>, vector<16x32xf32>
    %cst_82 = arith.constant dense<0.000000e+00> : vector<64x32xf32>
    %91 = tpu.matmul %87, %90, %cst_82 {dimension_numbers = #tpu.dot_dimension_numbers<[1], [0], [0], [1], [0, 0, 1, 1], [], []>} : vector<64x16xf32>, vector<16x32xf32>, vector<64x32xf32> -> vector<64x32xf32>
    %92 = arith.addf %89, %91 : vector<64x32xf32>
    %c0_83 = arith.constant 0 : index
    %c0_84 = arith.constant 0 : index
    %93 = vector.load %arg28[%c0_83, %c0_84] : memref<16x32xf32, #tpu.memory_space<vmem>>, vector<16x32xf32>
    %cst_85 = arith.constant dense<0.000000e+00> : vector<8x32xf32>
    %94 = tpu.matmul %67, %93, %cst_85 {dimension_numbers = #tpu.dot_dimension_numbers<[1], [0], [0], [1], [0, 0, 1, 1], [], []>} : vector<8x16xf32>, vector<16x32xf32>, vector<8x32xf32> -> vector<8x32xf32>
    %c0_86 = arith.constant 0 : index
    %c0_87 = arith.constant 0 : index
    %95 = vector.load %arg29[%c0_86, %c0_87] : memref<16x32xf32, #tpu.memory_space<vmem>>, vector<16x32xf32>
    %cst_88 = arith.constant dense<0.000000e+00> : vector<8x32xf32>
    %96 = tpu.matmul %67, %95, %cst_88 {dimension_numbers = #tpu.dot_dimension_numbers<[1], [0], [0], [1], [0, 0, 1, 1], [], []>} : vector<8x16xf32>, vector<16x32xf32>, vector<8x32xf32> -> vector<8x32xf32>
    %97 = vector.shape_cast %92 : vector<64x32xf32> to vector<8x8x32xf32>
    %98 = vector.shape_cast %94 : vector<8x32xf32> to vector<8x1x32xf32>
    %99 = vector.broadcast %98 : vector<8x1x32xf32> to vector<8x8x32xf32>
    %100 = arith.addf %97, %99 : vector<8x8x32xf32>
    %101 = vector.shape_cast %96 : vector<8x32xf32> to vector<1x8x32xf32>
    %102 = vector.broadcast %101 : vector<1x8x32xf32> to vector<8x8x32xf32>
    %103 = arith.addf %100, %102 : vector<8x8x32xf32>
    %c0_89 = arith.constant 0 : index
    %c0_90 = arith.constant 0 : index
    %104 = vector.load %arg30[%c0_89, %c0_90] : memref<1x32xf32, #tpu.memory_space<vmem>>, vector<1x32xf32>
    %105 = vector.shape_cast %104 : vector<1x32xf32> to vector<1x1x32xf32>
    %106 = vector.broadcast %105 : vector<1x1x32xf32> to vector<8x8x32xf32>
    %107 = arith.addf %103, %106 : vector<8x8x32xf32>
    %cst_91 = arith.constant 0.000000e+00 : f32
    %108 = vector.broadcast %cst_91 : f32 to vector<8x8x32xf32>
    %109 = arith.cmpf oge, %107, %108 : vector<8x8x32xf32>
    %cst_92 = arith.constant 0.00999999977 : f32
    %110 = vector.broadcast %cst_92 : f32 to vector<8x8x32xf32>
    %111 = arith.mulf %110, %107 : vector<8x8x32xf32>
    %112 = arith.select %109, %107, %111 : vector<8x8x32xi1>, vector<8x8x32xf32>
    %113 = vector.shape_cast %112 : vector<8x8x32xf32> to vector<64x32xf32>
    %c0_93 = arith.constant 0 : index
    %c0_94 = arith.constant 0 : index
    %114 = vector.load %arg31[%c0_93, %c0_94] : memref<32x32xf32, #tpu.memory_space<vmem>>, vector<32x32xf32>
    %cst_95 = arith.constant dense<0.000000e+00> : vector<64x32xf32>
    %115 = tpu.matmul %113, %114, %cst_95 {dimension_numbers = #tpu.dot_dimension_numbers<[1], [0], [0], [1], [0, 0, 1, 1], [], []>} : vector<64x32xf32>, vector<32x32xf32>, vector<64x32xf32> -> vector<64x32xf32>
    %c0_96 = arith.constant 0 : index
    %c0_97 = arith.constant 0 : index
    %116 = vector.load %arg32[%c0_96, %c0_97] : memref<1x32xf32, #tpu.memory_space<vmem>>, vector<1x32xf32>
    %117 = vector.broadcast %116 : vector<1x32xf32> to vector<64x32xf32>
    %118 = arith.addf %115, %117 : vector<64x32xf32>
    %cst_98 = arith.constant 0.000000e+00 : f32
    %119 = vector.broadcast %cst_98 : f32 to vector<64x32xf32>
    %120 = arith.cmpf oge, %118, %119 : vector<64x32xf32>
    %cst_99 = arith.constant 0.00999999977 : f32
    %121 = vector.broadcast %cst_99 : f32 to vector<64x32xf32>
    %122 = arith.mulf %121, %118 : vector<64x32xf32>
    %123 = arith.select %120, %118, %122 : vector<64x32xi1>, vector<64x32xf32>
    %124 = vector.shape_cast %123 : vector<64x32xf32> to vector<8x8x32xf32>
    %c0_100 = arith.constant 0 : index
    %c0_101 = arith.constant 0 : index
    %c0_102 = arith.constant 0 : index
    %c0_103 = arith.constant 0 : index
    %125 = vector.load %arg37[%c0_100, %c0_101, %c0_102, %c0_103] : memref<1x8x8x32xf32, #tpu.memory_space<vmem>>, vector<1x8x8x32xf32>
    %126 = vector.shape_cast %125 : vector<1x8x8x32xf32> to vector<8x8x32xf32>
    %127 = vector.shape_cast %124 : vector<8x8x32xf32> to vector<1x8x8x32xf32>
    tpu.vector_store %arg37[%c0_100, %c0_101, %c0_102, %c0_103], %127 {strides = array<i32>} : memref<1x8x8x32xf32, #tpu.memory_space<vmem>>, vector<1x8x8x32xf32>,
    %128 = vector.broadcast %10 : vector<8x8x1xf32> to vector<8x8x32xf32>
    %129 = arith.mulf %124, %128 : vector<8x8x32xf32>
    %cst_104 = arith.constant dense<0.000000e+00> : vector<8x32xf32>
    %130 = vector.multi_reduction <add>, %129, %cst_104 [1] : vector<8x8x32xf32> to vector<8x32xf32>
    %131 = vector.broadcast %12 : vector<8x1xf32> to vector<8x32xf32>
    %132 = arith.mulf %130, %131 : vector<8x32xf32>
    %c0_105 = arith.constant 0 : index
    %c0_106 = arith.constant 0 : index
    %133 = vector.load %arg33[%c0_105, %c0_106] : memref<16x32xf32, #tpu.memory_space<vmem>>, vector<16x32xf32>
    %cst_107 = arith.constant dense<0.000000e+00> : vector<8x32xf32>
    %134 = tpu.matmul %1, %133, %cst_107 {dimension_numbers = #tpu.dot_dimension_numbers<[1], [0], [0], [1], [0, 0, 1, 1], [], []>} : vector<8x16xf32>, vector<16x32xf32>, vector<8x32xf32> -> vector<8x32xf32>
    %c0_108 = arith.constant 0 : index
    %c0_109 = arith.constant 0 : index
    %135 = vector.load %arg34[%c0_108, %c0_109] : memref<32x32xf32, #tpu.memory_space<vmem>>, vector<32x32xf32>
    %cst_110 = arith.constant dense<0.000000e+00> : vector<8x32xf32>
    %136 = tpu.matmul %132, %135, %cst_110 {dimension_numbers = #tpu.dot_dimension_numbers<[1], [0], [0], [1], [0, 0, 1, 1], [], []>} : vector<8x32xf32>, vector<32x32xf32>, vector<8x32xf32> -> vector<8x32xf32>
    %137 = arith.addf %134, %136 : vector<8x32xf32>
    %c0_111 = arith.constant 0 : index
    %c0_112 = arith.constant 0 : index
    %138 = vector.load %arg35[%c0_111, %c0_112] : memref<1x32xf32, #tpu.memory_space<vmem>>, vector<1x32xf32>
    %139 = vector.broadcast %138 : vector<1x32xf32> to vector<8x32xf32>
    %140 = arith.addf %137, %139 : vector<8x32xf32>
    %cst_113 = arith.constant 0.000000e+00 : f32
    %141 = vector.broadcast %cst_113 : f32 to vector<8x32xf32>
    %142 = arith.cmpf oge, %140, %141 : vector<8x32xf32>
    %cst_114 = arith.constant 0.00999999977 : f32
    %143 = vector.broadcast %cst_114 : f32 to vector<8x32xf32>
    %144 = arith.mulf %143, %140 : vector<8x32xf32>
    %145 = arith.select %142, %140, %144 : vector<8x32xi1>, vector<8x32xf32>
    %c0_115 = arith.constant 0 : index
    %c0_116 = arith.constant 0 : index
    %c0_117 = arith.constant 0 : index
    %146 = vector.load %arg36[%c0_115, %c0_116, %c0_117] : memref<1x8x32xf32, #tpu.memory_space<vmem>>, vector<1x8x32xf32>
    %147 = vector.shape_cast %146 : vector<1x8x32xf32> to vector<8x32xf32>
    %148 = vector.shape_cast %145 : vector<8x32xf32> to vector<1x8x32xf32>
    tpu.vector_store %arg36[%c0_115, %c0_116, %c0_117], %148 {strides = array<i32>} : memref<1x8x32xf32, #tpu.memory_space<vmem>>, vector<1x8x32xf32>,
    return
  }
  func.func @transform_0(%arg0: i32) -> (i32, i32, i32) {
    %c0_i32 = arith.constant 0 : i32
    %c0_i32_0 = arith.constant 0 : i32
    %c0_i32_1 = arith.constant 0 : i32
    return %arg0, %c0_i32, %c0_i32_0 : i32, i32, i32
  }
  func.func @transform_1(%arg0: i32) -> (i32, i32, i32) {
    %c0_i32 = arith.constant 0 : i32
    %c0_i32_0 = arith.constant 0 : i32
    %c0_i32_1 = arith.constant 0 : i32
    return %arg0, %c0_i32, %c0_i32_0 : i32, i32, i32
  }
  func.func @transform_2(%arg0: i32) -> (i32, i32) {
    %c0_i32 = arith.constant 0 : i32
    %c0_i32_0 = arith.constant 0 : i32
    %c0_i32_1 = arith.constant 0 : i32
    return %c0_i32, %c0_i32_0 : i32, i32
  }
  func.func @transform_3(%arg0: i32) -> (i32, i32, i32) {
    %c0_i32 = arith.constant 0 : i32
    %c0_i32_0 = arith.constant 0 : i32
    %c0_i32_1 = arith.constant 0 : i32
    return %arg0, %c0_i32, %c0_i32_0 : i32, i32, i32
  }
  func.func @transform_4(%arg0: i32) -> (i32, i32, i32) {
    %c0_i32 = arith.constant 0 : i32
    %c0_i32_0 = arith.constant 0 : i32
    %c0_i32_1 = arith.constant 0 : i32
    return %arg0, %c0_i32, %c0_i32_0 : i32, i32, i32
  }
  func.func @transform_5(%arg0: i32) -> (i32, i32, i32, i32) {
    %c0_i32 = arith.constant 0 : i32
    %c0_i32_0 = arith.constant 0 : i32
    %c0_i32_1 = arith.constant 0 : i32
    %c0_i32_2 = arith.constant 0 : i32
    return %arg0, %c0_i32, %c0_i32_0, %c0_i32_1 : i32, i32, i32, i32
  }
  func.func @transform_6(%arg0: i32) -> (i32, i32, i32) {
    %c0_i32 = arith.constant 0 : i32
    %c0_i32_0 = arith.constant 0 : i32
    %c0_i32_1 = arith.constant 0 : i32
    return %arg0, %c0_i32, %c0_i32_0 : i32, i32, i32
  }
  func.func @transform_7(%arg0: i32) -> (i32, i32) {
    %c0_i32 = arith.constant 0 : i32
    %c0_i32_0 = arith.constant 0 : i32
    %c0_i32_1 = arith.constant 0 : i32
    return %c0_i32, %c0_i32_0 : i32, i32
  }
  func.func @transform_8(%arg0: i32) -> (i32, i32) {
    %c0_i32 = arith.constant 0 : i32
    %c0_i32_0 = arith.constant 0 : i32
    %c0_i32_1 = arith.constant 0 : i32
    return %c0_i32, %c0_i32_0 : i32, i32
  }
  func.func @transform_9(%arg0: i32) -> (i32, i32) {
    %c0_i32 = arith.constant 0 : i32
    %c0_i32_0 = arith.constant 0 : i32
    %c0_i32_1 = arith.constant 0 : i32
    return %c0_i32, %c0_i32_0 : i32, i32
  }
  func.func @transform_10(%arg0: i32) -> (i32, i32) {
    %c0_i32 = arith.constant 0 : i32
    %c0_i32_0 = arith.constant 0 : i32
    %c0_i32_1 = arith.constant 0 : i32
    return %c0_i32, %c0_i32_0 : i32, i32
  }
  func.func @transform_11(%arg0: i32) -> (i32, i32) {
    %c0_i32 = arith.constant 0 : i32
    %c0_i32_0 = arith.constant 0 : i32
    %c0_i32_1 = arith.constant 0 : i32
    return %c0_i32, %c0_i32_0 : i32, i32
  }
  func.func @transform_12(%arg0: i32) -> (i32, i32) {
    %c0_i32 = arith.constant 0 : i32
    %c0_i32_0 = arith.constant 0 : i32
    %c0_i32_1 = arith.constant 0 : i32
    return %c0_i32, %c0_i32_0 : i32, i32
  }
  func.func @transform_13(%arg0: i32) -> (i32, i32) {
    %c0_i32 = arith.constant 0 : i32
    %c0_i32_0 = arith.constant 0 : i32
    %c0_i32_1 = arith.constant 0 : i32
    return %c0_i32, %c0_i32_0 : i32, i32
  }
  func.func @transform_14(%arg0: i32) -> (i32, i32) {
    %c0_i32 = arith.constant 0 : i32
    %c0_i32_0 = arith.constant 0 : i32
    %c0_i32_1 = arith.constant 0 : i32
    return %c0_i32, %c0_i32_0 : i32, i32
  }
  func.func @transform_15(%arg0: i32) -> (i32, i32) {
    %c0_i32 = arith.constant 0 : i32
    %c0_i32_0 = arith.constant 0 : i32
    %c0_i32_1 = arith.constant 0 : i32
    return %c0_i32, %c0_i32_0 : i32, i32
  }
  func.func @transform_16(%arg0: i32) -> (i32, i32) {
    %c0_i32 = arith.constant 0 : i32
    %c0_i32_0 = arith.constant 0 : i32
    %c0_i32_1 = arith.constant 0 : i32
    return %c0_i32, %c0_i32_0 : i32, i32
  }
  func.func @transform_17(%arg0: i32) -> (i32, i32) {
    %c0_i32 = arith.constant 0 : i32
    %c0_i32_0 = arith.constant 0 : i32
    %c0_i32_1 = arith.constant 0 : i32
    return %c0_i32, %c0_i32_0 : i32, i32
  }
  func.func @transform_18(%arg0: i32) -> (i32, i32) {
    %c0_i32 = arith.constant 0 : i32
    %c0_i32_0 = arith.constant 0 : i32
    %c0_i32_1 = arith.constant 0 : i32
    return %c0_i32, %c0_i32_0 : i32, i32
  }
  func.func @transform_19(%arg0: i32) -> (i32, i32) {
    %c0_i32 = arith.constant 0 : i32
    %c0_i32_0 = arith.constant 0 : i32
    %c0_i32_1 = arith.constant 0 : i32
    return %c0_i32, %c0_i32_0 : i32, i32
  }
  func.func @transform_20(%arg0: i32) -> (i32, i32) {
    %c0_i32 = arith.constant 0 : i32
    %c0_i32_0 = arith.constant 0 : i32
    %c0_i32_1 = arith.constant 0 : i32
    return %c0_i32, %c0_i32_0 : i32, i32
  }
  func.func @transform_21(%arg0: i32) -> (i32, i32) {
    %c0_i32 = arith.constant 0 : i32
    %c0_i32_0 = arith.constant 0 : i32
    %c0_i32_1 = arith.constant 0 : i32
    return %c0_i32, %c0_i32_0 : i32, i32
  }
  func.func @transform_22(%arg0: i32) -> (i32, i32) {
    %c0_i32 = arith.constant 0 : i32
    %c0_i32_0 = arith.constant 0 : i32
    %c0_i32_1 = arith.constant 0 : i32
    return %c0_i32, %c0_i32_0 : i32, i32
  }
  func.func @transform_23(%arg0: i32) -> (i32, i32) {
    %c0_i32 = arith.constant 0 : i32
    %c0_i32_0 = arith.constant 0 : i32
    %c0_i32_1 = arith.constant 0 : i32
    return %c0_i32, %c0_i32_0 : i32, i32
  }
  func.func @transform_24(%arg0: i32) -> (i32, i32) {
    %c0_i32 = arith.constant 0 : i32
    %c0_i32_0 = arith.constant 0 : i32
    %c0_i32_1 = arith.constant 0 : i32
    return %c0_i32, %c0_i32_0 : i32, i32
  }
  func.func @transform_25(%arg0: i32) -> (i32, i32) {
    %c0_i32 = arith.constant 0 : i32
    %c0_i32_0 = arith.constant 0 : i32
    %c0_i32_1 = arith.constant 0 : i32
    return %c0_i32, %c0_i32_0 : i32, i32
  }
  func.func @transform_26(%arg0: i32) -> (i32, i32) {
    %c0_i32 = arith.constant 0 : i32
    %c0_i32_0 = arith.constant 0 : i32
    %c0_i32_1 = arith.constant 0 : i32
    return %c0_i32, %c0_i32_0 : i32, i32
  }
  func.func @transform_27(%arg0: i32) -> (i32, i32) {
    %c0_i32 = arith.constant 0 : i32
    %c0_i32_0 = arith.constant 0 : i32
    %c0_i32_1 = arith.constant 0 : i32
    return %c0_i32, %c0_i32_0 : i32, i32
  }
  func.func @transform_28(%arg0: i32) -> (i32, i32) {
    %c0_i32 = arith.constant 0 : i32
    %c0_i32_0 = arith.constant 0 : i32
    %c0_i32_1 = arith.constant 0 : i32
    return %c0_i32, %c0_i32_0 : i32, i32
  }
  func.func @transform_29(%arg0: i32) -> (i32, i32) {
    %c0_i32 = arith.constant 0 : i32
    %c0_i32_0 = arith.constant 0 : i32
    %c0_i32_1 = arith.constant 0 : i32
    return %c0_i32, %c0_i32_0 : i32, i32
  }
  func.func @transform_30(%arg0: i32) -> (i32, i32) {
    %c0_i32 = arith.constant 0 : i32
    %c0_i32_0 = arith.constant 0 : i32
    %c0_i32_1 = arith.constant 0 : i32
    return %c0_i32, %c0_i32_0 : i32, i32
  }
  func.func @transform_31(%arg0: i32) -> (i32, i32) {
    %c0_i32 = arith.constant 0 : i32
    %c0_i32_0 = arith.constant 0 : i32
    %c0_i32_1 = arith.constant 0 : i32
    return %c0_i32, %c0_i32_0 : i32, i32
  }
  func.func @transform_32(%arg0: i32) -> (i32, i32) {
    %c0_i32 = arith.constant 0 : i32
    %c0_i32_0 = arith.constant 0 : i32
    %c0_i32_1 = arith.constant 0 : i32
    return %c0_i32, %c0_i32_0 : i32, i32
  }
  func.func @transform_33(%arg0: i32) -> (i32, i32) {
    %c0_i32 = arith.constant 0 : i32
    %c0_i32_0 = arith.constant 0 : i32
    %c0_i32_1 = arith.constant 0 : i32
    return %c0_i32, %c0_i32_0 : i32, i32
  }
  func.func @transform_34(%arg0: i32) -> (i32, i32) {
    %c0_i32 = arith.constant 0 : i32
    %c0_i32_0 = arith.constant 0 : i32
    %c0_i32_1 = arith.constant 0 : i32
    return %c0_i32, %c0_i32_0 : i32, i32
  }
  func.func @transform_35(%arg0: i32) -> (i32, i32, i32) {
    %c0_i32 = arith.constant 0 : i32
    %c0_i32_0 = arith.constant 0 : i32
    %c0_i32_1 = arith.constant 0 : i32
    return %arg0, %c0_i32, %c0_i32_0 : i32, i32, i32
  }
  func.func @transform_36(%arg0: i32) -> (i32, i32, i32, i32) {
    %c0_i32 = arith.constant 0 : i32
    %c0_i32_0 = arith.constant 0 : i32
    %c0_i32_1 = arith.constant 0 : i32
    %c0_i32_2 = arith.constant 0 : i32
    return %arg0, %c0_i32, %c0_i32_0, %c0_i32_1 : i32, i32, i32, i32
  }
}

module attributes {stable_mosaic.version = 11 : i64} {
  func.func @kernel(%arg0: i32, %arg1: memref<1x28x131xf32, #tpu.memory_space<vmem>>, %arg2: memref<131x32xf32, #tpu.memory_space<vmem>>, %arg3: memref<1x32xf32, #tpu.memory_space<vmem>>, %arg4: memref<32x16xf32, #tpu.memory_space<vmem>>, %arg5: memref<1x16xf32, #tpu.memory_space<vmem>>, %arg6: memref<131x3xf32, #tpu.memory_space<vmem>>, %arg7: memref<32x3xf32, #tpu.memory_space<vmem>>, %arg8: memref<16x3xf32, #tpu.memory_space<vmem>>, %arg9: memref<1x3xf32, #tpu.memory_space<vmem>>, %arg10: memref<1x28x3xf32, #tpu.memory_space<vmem>>) attributes {dimension_semantics = [#tpu.dimension_semantics<parallel>], iteration_bounds = array<i64: 2>, scalar_prefetch = 0 : i64, scratch_operands = 0 : i64, tpu.core_type = #tpu.core_type<tc>, window_params = [{transform_indices = @transform_0, window_bounds = array<i64: 1, 28, 131>}, {pipeline_mode = #tpu.pipeline_mode<synchronous>, transform_indices = @transform_1, window_bounds = array<i64: 131, 32>}, {pipeline_mode = #tpu.pipeline_mode<synchronous>, transform_indices = @transform_2, window_bounds = array<i64: 1, 32>}, {pipeline_mode = #tpu.pipeline_mode<synchronous>, transform_indices = @transform_3, window_bounds = array<i64: 32, 16>}, {pipeline_mode = #tpu.pipeline_mode<synchronous>, transform_indices = @transform_4, window_bounds = array<i64: 1, 16>}, {pipeline_mode = #tpu.pipeline_mode<synchronous>, transform_indices = @transform_5, window_bounds = array<i64: 131, 3>}, {pipeline_mode = #tpu.pipeline_mode<synchronous>, transform_indices = @transform_6, window_bounds = array<i64: 32, 3>}, {pipeline_mode = #tpu.pipeline_mode<synchronous>, transform_indices = @transform_7, window_bounds = array<i64: 16, 3>}, {pipeline_mode = #tpu.pipeline_mode<synchronous>, transform_indices = @transform_8, window_bounds = array<i64: 1, 3>}, {transform_indices = @transform_9, window_bounds = array<i64: 1, 28, 3>}]} {
    %c0 = arith.constant 0 : index
    %c0_0 = arith.constant 0 : index
    %c0_1 = arith.constant 0 : index
    %0 = vector.load %arg1[%c0, %c0_0, %c0_1] : memref<1x28x131xf32, #tpu.memory_space<vmem>>, vector<1x28x131xf32>
    %1 = vector.shape_cast %0 : vector<1x28x131xf32> to vector<28x131xf32>
    %c0_2 = arith.constant 0 : index
    %c0_3 = arith.constant 0 : index
    %2 = vector.load %arg6[%c0_2, %c0_3] : memref<131x3xf32, #tpu.memory_space<vmem>>, vector<131x3xf32>
    %cst = arith.constant dense<0.000000e+00> : vector<28x3xf32>
    %3 = tpu.matmul %1, %2, %cst {dimension_numbers = #tpu.dot_dimension_numbers<[1], [0], [0], [1], [0, 0, 1, 1], [], []>} : vector<28x131xf32>, vector<131x3xf32>, vector<28x3xf32> -> vector<28x3xf32>
    %c0_4 = arith.constant 0 : index
    %c0_5 = arith.constant 0 : index
    %4 = vector.load %arg2[%c0_4, %c0_5] : memref<131x32xf32, #tpu.memory_space<vmem>>, vector<131x32xf32>
    %cst_6 = arith.constant dense<0.000000e+00> : vector<28x32xf32>
    %5 = tpu.matmul %1, %4, %cst_6 {dimension_numbers = #tpu.dot_dimension_numbers<[1], [0], [0], [1], [0, 0, 1, 1], [], []>} : vector<28x131xf32>, vector<131x32xf32>, vector<28x32xf32> -> vector<28x32xf32>
    %c0_7 = arith.constant 0 : index
    %c0_8 = arith.constant 0 : index
    %6 = vector.load %arg3[%c0_7, %c0_8] : memref<1x32xf32, #tpu.memory_space<vmem>>, vector<1x32xf32>
    %7 = vector.broadcast %6 : vector<1x32xf32> to vector<28x32xf32>
    %8 = arith.addf %5, %7 : vector<28x32xf32>
    %cst_9 = arith.constant 0.000000e+00 : f32
    %9 = vector.broadcast %cst_9 : f32 to vector<28x32xf32>
    %10 = arith.cmpf oge, %8, %9 : vector<28x32xf32>
    %cst_10 = arith.constant 0.00999999977 : f32
    %11 = vector.broadcast %cst_10 : f32 to vector<28x32xf32>
    %12 = arith.mulf %11, %8 : vector<28x32xf32>
    %13 = arith.select %10, %8, %12 : vector<28x32xi1>, vector<28x32xf32>
    %c0_11 = arith.constant 0 : index
    %c0_12 = arith.constant 0 : index
    %14 = vector.load %arg7[%c0_11, %c0_12] : memref<32x3xf32, #tpu.memory_space<vmem>>, vector<32x3xf32>
    %cst_13 = arith.constant dense<0.000000e+00> : vector<28x3xf32>
    %15 = tpu.matmul %13, %14, %cst_13 {dimension_numbers = #tpu.dot_dimension_numbers<[1], [0], [0], [1], [0, 0, 1, 1], [], []>} : vector<28x32xf32>, vector<32x3xf32>, vector<28x3xf32> -> vector<28x3xf32>
    %16 = arith.addf %3, %15 : vector<28x3xf32>
    %c0_14 = arith.constant 0 : index
    %c0_15 = arith.constant 0 : index
    %17 = vector.load %arg4[%c0_14, %c0_15] : memref<32x16xf32, #tpu.memory_space<vmem>>, vector<32x16xf32>
    %cst_16 = arith.constant dense<0.000000e+00> : vector<28x16xf32>
    %18 = tpu.matmul %13, %17, %cst_16 {dimension_numbers = #tpu.dot_dimension_numbers<[1], [0], [0], [1], [0, 0, 1, 1], [], []>} : vector<28x32xf32>, vector<32x16xf32>, vector<28x16xf32> -> vector<28x16xf32>
    %c0_17 = arith.constant 0 : index
    %c0_18 = arith.constant 0 : index
    %19 = vector.load %arg5[%c0_17, %c0_18] : memref<1x16xf32, #tpu.memory_space<vmem>>, vector<1x16xf32>
    %20 = vector.broadcast %19 : vector<1x16xf32> to vector<28x16xf32>
    %21 = arith.addf %18, %20 : vector<28x16xf32>
    %cst_19 = arith.constant 0.000000e+00 : f32
    %22 = vector.broadcast %cst_19 : f32 to vector<28x16xf32>
    %23 = arith.cmpf oge, %21, %22 : vector<28x16xf32>
    %cst_20 = arith.constant 0.00999999977 : f32
    %24 = vector.broadcast %cst_20 : f32 to vector<28x16xf32>
    %25 = arith.mulf %24, %21 : vector<28x16xf32>
    %26 = arith.select %23, %21, %25 : vector<28x16xi1>, vector<28x16xf32>
    %c0_21 = arith.constant 0 : index
    %c0_22 = arith.constant 0 : index
    %27 = vector.load %arg8[%c0_21, %c0_22] : memref<16x3xf32, #tpu.memory_space<vmem>>, vector<16x3xf32>
    %cst_23 = arith.constant dense<0.000000e+00> : vector<28x3xf32>
    %28 = tpu.matmul %26, %27, %cst_23 {dimension_numbers = #tpu.dot_dimension_numbers<[1], [0], [0], [1], [0, 0, 1, 1], [], []>} : vector<28x16xf32>, vector<16x3xf32>, vector<28x3xf32> -> vector<28x3xf32>
    %29 = arith.addf %16, %28 : vector<28x3xf32>
    %c0_24 = arith.constant 0 : index
    %c0_25 = arith.constant 0 : index
    %30 = vector.load %arg9[%c0_24, %c0_25] : memref<1x3xf32, #tpu.memory_space<vmem>>, vector<1x3xf32>
    %31 = vector.broadcast %30 : vector<1x3xf32> to vector<28x3xf32>
    %32 = arith.addf %29, %31 : vector<28x3xf32>
    %c0_26 = arith.constant 0 : index
    %c0_27 = arith.constant 0 : index
    %c0_28 = arith.constant 0 : index
    %33 = vector.load %arg10[%c0_26, %c0_27, %c0_28] : memref<1x28x3xf32, #tpu.memory_space<vmem>>, vector<1x28x3xf32>
    %34 = vector.shape_cast %33 : vector<1x28x3xf32> to vector<28x3xf32>
    %35 = vector.shape_cast %32 : vector<28x3xf32> to vector<1x28x3xf32>
    tpu.vector_store %arg10[%c0_26, %c0_27, %c0_28], %35 {strides = array<i32>} : memref<1x28x3xf32, #tpu.memory_space<vmem>>, vector<1x28x3xf32>,
    return
  }
  func.func @transform_0(%arg0: i32) -> (i32, i32, i32) {
    %c0_i32 = arith.constant 0 : i32
    %c0_i32_0 = arith.constant 0 : i32
    %c0_i32_1 = arith.constant 0 : i32
    return %arg0, %c0_i32, %c0_i32_0 : i32, i32, i32
  }
  func.func @transform_1(%arg0: i32) -> (i32, i32) {
    %c0_i32 = arith.constant 0 : i32
    %c0_i32_0 = arith.constant 0 : i32
    %c0_i32_1 = arith.constant 0 : i32
    return %c0_i32, %c0_i32_0 : i32, i32
  }
  func.func @transform_2(%arg0: i32) -> (i32, i32) {
    %c0_i32 = arith.constant 0 : i32
    %c0_i32_0 = arith.constant 0 : i32
    %c0_i32_1 = arith.constant 0 : i32
    return %c0_i32, %c0_i32_0 : i32, i32
  }
  func.func @transform_3(%arg0: i32) -> (i32, i32) {
    %c0_i32 = arith.constant 0 : i32
    %c0_i32_0 = arith.constant 0 : i32
    %c0_i32_1 = arith.constant 0 : i32
    return %c0_i32, %c0_i32_0 : i32, i32
  }
  func.func @transform_4(%arg0: i32) -> (i32, i32) {
    %c0_i32 = arith.constant 0 : i32
    %c0_i32_0 = arith.constant 0 : i32
    %c0_i32_1 = arith.constant 0 : i32
    return %c0_i32, %c0_i32_0 : i32, i32
  }
  func.func @transform_5(%arg0: i32) -> (i32, i32) {
    %c0_i32 = arith.constant 0 : i32
    %c0_i32_0 = arith.constant 0 : i32
    %c0_i32_1 = arith.constant 0 : i32
    return %c0_i32, %c0_i32_0 : i32, i32
  }
  func.func @transform_6(%arg0: i32) -> (i32, i32) {
    %c0_i32 = arith.constant 0 : i32
    %c0_i32_0 = arith.constant 0 : i32
    %c0_i32_1 = arith.constant 0 : i32
    return %c0_i32, %c0_i32_0 : i32, i32
  }
  func.func @transform_7(%arg0: i32) -> (i32, i32) {
    %c0_i32 = arith.constant 0 : i32
    %c0_i32_0 = arith.constant 0 : i32
    %c0_i32_1 = arith.constant 0 : i32
    return %c0_i32, %c0_i32_0 : i32, i32
  }
  func.func @transform_8(%arg0: i32) -> (i32, i32) {
    %c0_i32 = arith.constant 0 : i32
    %c0_i32_0 = arith.constant 0 : i32
    %c0_i32_1 = arith.constant 0 : i32
    return %c0_i32, %c0_i32_0 : i32, i32
  }
  func.func @transform_9(%arg0: i32) -> (i32, i32, i32) {
    %c0_i32 = arith.constant 0 : i32
    %c0_i32_0 = arith.constant 0 : i32
    %c0_i32_1 = arith.constant 0 : i32
    return %arg0, %c0_i32, %c0_i32_0 : i32, i32, i32
  }
}

module attributes {stable_mosaic.version = 11 : i64} {
  func.func @kernel(%arg0: i32, %arg1: memref<1x28x138xf32, #tpu.memory_space<vmem>>, %arg2: memref<138x32xf32, #tpu.memory_space<vmem>>, %arg3: memref<1x32xf32, #tpu.memory_space<vmem>>, %arg4: memref<32x16xf32, #tpu.memory_space<vmem>>, %arg5: memref<1x16xf32, #tpu.memory_space<vmem>>, %arg6: memref<138x10xf32, #tpu.memory_space<vmem>>, %arg7: memref<32x10xf32, #tpu.memory_space<vmem>>, %arg8: memref<16x10xf32, #tpu.memory_space<vmem>>, %arg9: memref<1x10xf32, #tpu.memory_space<vmem>>, %arg10: memref<1x28x10xf32, #tpu.memory_space<vmem>>) attributes {dimension_semantics = [#tpu.dimension_semantics<parallel>], iteration_bounds = array<i64: 2>, scalar_prefetch = 0 : i64, scratch_operands = 0 : i64, tpu.core_type = #tpu.core_type<tc>, window_params = [{transform_indices = @transform_0, window_bounds = array<i64: 1, 28, 138>}, {pipeline_mode = #tpu.pipeline_mode<synchronous>, transform_indices = @transform_1, window_bounds = array<i64: 138, 32>}, {pipeline_mode = #tpu.pipeline_mode<synchronous>, transform_indices = @transform_2, window_bounds = array<i64: 1, 32>}, {pipeline_mode = #tpu.pipeline_mode<synchronous>, transform_indices = @transform_3, window_bounds = array<i64: 32, 16>}, {pipeline_mode = #tpu.pipeline_mode<synchronous>, transform_indices = @transform_4, window_bounds = array<i64: 1, 16>}, {pipeline_mode = #tpu.pipeline_mode<synchronous>, transform_indices = @transform_5, window_bounds = array<i64: 138, 10>}, {pipeline_mode = #tpu.pipeline_mode<synchronous>, transform_indices = @transform_6, window_bounds = array<i64: 32, 10>}, {pipeline_mode = #tpu.pipeline_mode<synchronous>, transform_indices = @transform_7, window_bounds = array<i64: 16, 10>}, {pipeline_mode = #tpu.pipeline_mode<synchronous>, transform_indices = @transform_8, window_bounds = array<i64: 1, 10>}, {transform_indices = @transform_9, window_bounds = array<i64: 1, 28, 10>}]} {
    %c0 = arith.constant 0 : index
    %c0_0 = arith.constant 0 : index
    %c0_1 = arith.constant 0 : index
    %0 = vector.load %arg1[%c0, %c0_0, %c0_1] : memref<1x28x138xf32, #tpu.memory_space<vmem>>, vector<1x28x138xf32>
    %1 = vector.shape_cast %0 : vector<1x28x138xf32> to vector<28x138xf32>
    %c0_2 = arith.constant 0 : index
    %c0_3 = arith.constant 0 : index
    %2 = vector.load %arg6[%c0_2, %c0_3] : memref<138x10xf32, #tpu.memory_space<vmem>>, vector<138x10xf32>
    %cst = arith.constant dense<0.000000e+00> : vector<28x10xf32>
    %3 = tpu.matmul %1, %2, %cst {dimension_numbers = #tpu.dot_dimension_numbers<[1], [0], [0], [1], [0, 0, 1, 1], [], []>} : vector<28x138xf32>, vector<138x10xf32>, vector<28x10xf32> -> vector<28x10xf32>
    %c0_4 = arith.constant 0 : index
    %c0_5 = arith.constant 0 : index
    %4 = vector.load %arg2[%c0_4, %c0_5] : memref<138x32xf32, #tpu.memory_space<vmem>>, vector<138x32xf32>
    %cst_6 = arith.constant dense<0.000000e+00> : vector<28x32xf32>
    %5 = tpu.matmul %1, %4, %cst_6 {dimension_numbers = #tpu.dot_dimension_numbers<[1], [0], [0], [1], [0, 0, 1, 1], [], []>} : vector<28x138xf32>, vector<138x32xf32>, vector<28x32xf32> -> vector<28x32xf32>
    %c0_7 = arith.constant 0 : index
    %c0_8 = arith.constant 0 : index
    %6 = vector.load %arg3[%c0_7, %c0_8] : memref<1x32xf32, #tpu.memory_space<vmem>>, vector<1x32xf32>
    %7 = vector.broadcast %6 : vector<1x32xf32> to vector<28x32xf32>
    %8 = arith.addf %5, %7 : vector<28x32xf32>
    %cst_9 = arith.constant 0.000000e+00 : f32
    %9 = vector.broadcast %cst_9 : f32 to vector<28x32xf32>
    %10 = arith.cmpf oge, %8, %9 : vector<28x32xf32>
    %cst_10 = arith.constant 0.00999999977 : f32
    %11 = vector.broadcast %cst_10 : f32 to vector<28x32xf32>
    %12 = arith.mulf %11, %8 : vector<28x32xf32>
    %13 = arith.select %10, %8, %12 : vector<28x32xi1>, vector<28x32xf32>
    %c0_11 = arith.constant 0 : index
    %c0_12 = arith.constant 0 : index
    %14 = vector.load %arg7[%c0_11, %c0_12] : memref<32x10xf32, #tpu.memory_space<vmem>>, vector<32x10xf32>
    %cst_13 = arith.constant dense<0.000000e+00> : vector<28x10xf32>
    %15 = tpu.matmul %13, %14, %cst_13 {dimension_numbers = #tpu.dot_dimension_numbers<[1], [0], [0], [1], [0, 0, 1, 1], [], []>} : vector<28x32xf32>, vector<32x10xf32>, vector<28x10xf32> -> vector<28x10xf32>
    %16 = arith.addf %3, %15 : vector<28x10xf32>
    %c0_14 = arith.constant 0 : index
    %c0_15 = arith.constant 0 : index
    %17 = vector.load %arg4[%c0_14, %c0_15] : memref<32x16xf32, #tpu.memory_space<vmem>>, vector<32x16xf32>
    %cst_16 = arith.constant dense<0.000000e+00> : vector<28x16xf32>
    %18 = tpu.matmul %13, %17, %cst_16 {dimension_numbers = #tpu.dot_dimension_numbers<[1], [0], [0], [1], [0, 0, 1, 1], [], []>} : vector<28x32xf32>, vector<32x16xf32>, vector<28x16xf32> -> vector<28x16xf32>
    %c0_17 = arith.constant 0 : index
    %c0_18 = arith.constant 0 : index
    %19 = vector.load %arg5[%c0_17, %c0_18] : memref<1x16xf32, #tpu.memory_space<vmem>>, vector<1x16xf32>
    %20 = vector.broadcast %19 : vector<1x16xf32> to vector<28x16xf32>
    %21 = arith.addf %18, %20 : vector<28x16xf32>
    %cst_19 = arith.constant 0.000000e+00 : f32
    %22 = vector.broadcast %cst_19 : f32 to vector<28x16xf32>
    %23 = arith.cmpf oge, %21, %22 : vector<28x16xf32>
    %cst_20 = arith.constant 0.00999999977 : f32
    %24 = vector.broadcast %cst_20 : f32 to vector<28x16xf32>
    %25 = arith.mulf %24, %21 : vector<28x16xf32>
    %26 = arith.select %23, %21, %25 : vector<28x16xi1>, vector<28x16xf32>
    %c0_21 = arith.constant 0 : index
    %c0_22 = arith.constant 0 : index
    %27 = vector.load %arg8[%c0_21, %c0_22] : memref<16x10xf32, #tpu.memory_space<vmem>>, vector<16x10xf32>
    %cst_23 = arith.constant dense<0.000000e+00> : vector<28x10xf32>
    %28 = tpu.matmul %26, %27, %cst_23 {dimension_numbers = #tpu.dot_dimension_numbers<[1], [0], [0], [1], [0, 0, 1, 1], [], []>} : vector<28x16xf32>, vector<16x10xf32>, vector<28x10xf32> -> vector<28x10xf32>
    %29 = arith.addf %16, %28 : vector<28x10xf32>
    %c0_24 = arith.constant 0 : index
    %c0_25 = arith.constant 0 : index
    %30 = vector.load %arg9[%c0_24, %c0_25] : memref<1x10xf32, #tpu.memory_space<vmem>>, vector<1x10xf32>
    %31 = vector.broadcast %30 : vector<1x10xf32> to vector<28x10xf32>
    %32 = arith.addf %29, %31 : vector<28x10xf32>
    %c0_26 = arith.constant 0 : index
    %c0_27 = arith.constant 0 : index
    %c0_28 = arith.constant 0 : index
    %33 = vector.load %arg10[%c0_26, %c0_27, %c0_28] : memref<1x28x10xf32, #tpu.memory_space<vmem>>, vector<1x28x10xf32>
    %34 = vector.shape_cast %33 : vector<1x28x10xf32> to vector<28x10xf32>
    %35 = vector.shape_cast %32 : vector<28x10xf32> to vector<1x28x10xf32>
    tpu.vector_store %arg10[%c0_26, %c0_27, %c0_28], %35 {strides = array<i32>} : memref<1x28x10xf32, #tpu.memory_space<vmem>>, vector<1x28x10xf32>,
    return
  }
  func.func @transform_0(%arg0: i32) -> (i32, i32, i32) {
    %c0_i32 = arith.constant 0 : i32
    %c0_i32_0 = arith.constant 0 : i32
    %c0_i32_1 = arith.constant 0 : i32
    return %arg0, %c0_i32, %c0_i32_0 : i32, i32, i32
  }
  func.func @transform_1(%arg0: i32) -> (i32, i32) {
    %c0_i32 = arith.constant 0 : i32
    %c0_i32_0 = arith.constant 0 : i32
    %c0_i32_1 = arith.constant 0 : i32
    return %c0_i32, %c0_i32_0 : i32, i32
  }
  func.func @transform_2(%arg0: i32) -> (i32, i32) {
    %c0_i32 = arith.constant 0 : i32
    %c0_i32_0 = arith.constant 0 : i32
    %c0_i32_1 = arith.constant 0 : i32
    return %c0_i32, %c0_i32_0 : i32, i32
  }
  func.func @transform_3(%arg0: i32) -> (i32, i32) {
    %c0_i32 = arith.constant 0 : i32
    %c0_i32_0 = arith.constant 0 : i32
    %c0_i32_1 = arith.constant 0 : i32
    return %c0_i32, %c0_i32_0 : i32, i32
  }
  func.func @transform_4(%arg0: i32) -> (i32, i32) {
    %c0_i32 = arith.constant 0 : i32
    %c0_i32_0 = arith.constant 0 : i32
    %c0_i32_1 = arith.constant 0 : i32
    return %c0_i32, %c0_i32_0 : i32, i32
  }
  func.func @transform_5(%arg0: i32) -> (i32, i32) {
    %c0_i32 = arith.constant 0 : i32
    %c0_i32_0 = arith.constant 0 : i32
    %c0_i32_1 = arith.constant 0 : i32
    return %c0_i32, %c0_i32_0 : i32, i32
  }
  func.func @transform_6(%arg0: i32) -> (i32, i32) {
    %c0_i32 = arith.constant 0 : i32
    %c0_i32_0 = arith.constant 0 : i32
    %c0_i32_1 = arith.constant 0 : i32
    return %c0_i32, %c0_i32_0 : i32, i32
  }
  func.func @transform_7(%arg0: i32) -> (i32, i32) {
    %c0_i32 = arith.constant 0 : i32
    %c0_i32_0 = arith.constant 0 : i32
    %c0_i32_1 = arith.constant 0 : i32
    return %c0_i32, %c0_i32_0 : i32, i32
  }
  func.func @transform_8(%arg0: i32) -> (i32, i32) {
    %c0_i32 = arith.constant 0 : i32
    %c0_i32_0 = arith.constant 0 : i32
    %c0_i32_1 = arith.constant 0 : i32
    return %c0_i32, %c0_i32_0 : i32, i32
  }
  func.func @transform_9(%arg0: i32) -> (i32, i32, i32) {
    %c0_i32 = arith.constant 0 : i32
    %c0_i32_0 = arith.constant 0 : i32
    %c0_i32_1 = arith.constant 0 : i32
    return %arg0, %c0_i32, %c0_i32_0 : i32, i32, i32
  }
}

module attributes {stable_mosaic.version = 11 : i64} {
  func.func @kernel(%arg0: i32, %arg1: memref<1x8x32xf32, #tpu.memory_space<vmem>>, %arg2: memref<32x32xf32, #tpu.memory_space<vmem>>, %arg3: memref<1x32xf32, #tpu.memory_space<vmem>>, %arg4: memref<32x16xf32, #tpu.memory_space<vmem>>, %arg5: memref<1x16xf32, #tpu.memory_space<vmem>>, %arg6: memref<32x16xf32, #tpu.memory_space<vmem>>, %arg7: memref<32x16xf32, #tpu.memory_space<vmem>>, %arg8: memref<16x16xf32, #tpu.memory_space<vmem>>, %arg9: memref<1x16xf32, #tpu.memory_space<vmem>>, %arg10: memref<1x8x16xf32, #tpu.memory_space<vmem>>) attributes {dimension_semantics = [#tpu.dimension_semantics<parallel>], iteration_bounds = array<i64: 2>, scalar_prefetch = 0 : i64, scratch_operands = 0 : i64, tpu.core_type = #tpu.core_type<tc>, window_params = [{transform_indices = @transform_0, window_bounds = array<i64: 1, 8, 32>}, {pipeline_mode = #tpu.pipeline_mode<synchronous>, transform_indices = @transform_1, window_bounds = array<i64: 32, 32>}, {pipeline_mode = #tpu.pipeline_mode<synchronous>, transform_indices = @transform_2, window_bounds = array<i64: 1, 32>}, {pipeline_mode = #tpu.pipeline_mode<synchronous>, transform_indices = @transform_3, window_bounds = array<i64: 32, 16>}, {pipeline_mode = #tpu.pipeline_mode<synchronous>, transform_indices = @transform_4, window_bounds = array<i64: 1, 16>}, {pipeline_mode = #tpu.pipeline_mode<synchronous>, transform_indices = @transform_5, window_bounds = array<i64: 32, 16>}, {pipeline_mode = #tpu.pipeline_mode<synchronous>, transform_indices = @transform_6, window_bounds = array<i64: 32, 16>}, {pipeline_mode = #tpu.pipeline_mode<synchronous>, transform_indices = @transform_7, window_bounds = array<i64: 16, 16>}, {pipeline_mode = #tpu.pipeline_mode<synchronous>, transform_indices = @transform_8, window_bounds = array<i64: 1, 16>}, {transform_indices = @transform_9, window_bounds = array<i64: 1, 8, 16>}]} {
    %c0 = arith.constant 0 : index
    %c0_0 = arith.constant 0 : index
    %c0_1 = arith.constant 0 : index
    %0 = vector.load %arg1[%c0, %c0_0, %c0_1] : memref<1x8x32xf32, #tpu.memory_space<vmem>>, vector<1x8x32xf32>
    %1 = vector.shape_cast %0 : vector<1x8x32xf32> to vector<8x32xf32>
    %c0_2 = arith.constant 0 : index
    %c0_3 = arith.constant 0 : index
    %2 = vector.load %arg6[%c0_2, %c0_3] : memref<32x16xf32, #tpu.memory_space<vmem>>, vector<32x16xf32>
    %cst = arith.constant dense<0.000000e+00> : vector<8x16xf32>
    %3 = tpu.matmul %1, %2, %cst {dimension_numbers = #tpu.dot_dimension_numbers<[1], [0], [0], [1], [0, 0, 1, 1], [], []>} : vector<8x32xf32>, vector<32x16xf32>, vector<8x16xf32> -> vector<8x16xf32>
    %c0_4 = arith.constant 0 : index
    %c0_5 = arith.constant 0 : index
    %4 = vector.load %arg2[%c0_4, %c0_5] : memref<32x32xf32, #tpu.memory_space<vmem>>, vector<32x32xf32>
    %cst_6 = arith.constant dense<0.000000e+00> : vector<8x32xf32>
    %5 = tpu.matmul %1, %4, %cst_6 {dimension_numbers = #tpu.dot_dimension_numbers<[1], [0], [0], [1], [0, 0, 1, 1], [], []>} : vector<8x32xf32>, vector<32x32xf32>, vector<8x32xf32> -> vector<8x32xf32>
    %c0_7 = arith.constant 0 : index
    %c0_8 = arith.constant 0 : index
    %6 = vector.load %arg3[%c0_7, %c0_8] : memref<1x32xf32, #tpu.memory_space<vmem>>, vector<1x32xf32>
    %7 = vector.broadcast %6 : vector<1x32xf32> to vector<8x32xf32>
    %8 = arith.addf %5, %7 : vector<8x32xf32>
    %cst_9 = arith.constant 0.000000e+00 : f32
    %9 = vector.broadcast %cst_9 : f32 to vector<8x32xf32>
    %10 = arith.cmpf oge, %8, %9 : vector<8x32xf32>
    %cst_10 = arith.constant 0.00999999977 : f32
    %11 = vector.broadcast %cst_10 : f32 to vector<8x32xf32>
    %12 = arith.mulf %11, %8 : vector<8x32xf32>
    %13 = arith.select %10, %8, %12 : vector<8x32xi1>, vector<8x32xf32>
    %c0_11 = arith.constant 0 : index
    %c0_12 = arith.constant 0 : index
    %14 = vector.load %arg7[%c0_11, %c0_12] : memref<32x16xf32, #tpu.memory_space<vmem>>, vector<32x16xf32>
    %cst_13 = arith.constant dense<0.000000e+00> : vector<8x16xf32>
    %15 = tpu.matmul %13, %14, %cst_13 {dimension_numbers = #tpu.dot_dimension_numbers<[1], [0], [0], [1], [0, 0, 1, 1], [], []>} : vector<8x32xf32>, vector<32x16xf32>, vector<8x16xf32> -> vector<8x16xf32>
    %16 = arith.addf %3, %15 : vector<8x16xf32>
    %c0_14 = arith.constant 0 : index
    %c0_15 = arith.constant 0 : index
    %17 = vector.load %arg4[%c0_14, %c0_15] : memref<32x16xf32, #tpu.memory_space<vmem>>, vector<32x16xf32>
    %cst_16 = arith.constant dense<0.000000e+00> : vector<8x16xf32>
    %18 = tpu.matmul %13, %17, %cst_16 {dimension_numbers = #tpu.dot_dimension_numbers<[1], [0], [0], [1], [0, 0, 1, 1], [], []>} : vector<8x32xf32>, vector<32x16xf32>, vector<8x16xf32> -> vector<8x16xf32>
    %c0_17 = arith.constant 0 : index
    %c0_18 = arith.constant 0 : index
    %19 = vector.load %arg5[%c0_17, %c0_18] : memref<1x16xf32, #tpu.memory_space<vmem>>, vector<1x16xf32>
    %20 = vector.broadcast %19 : vector<1x16xf32> to vector<8x16xf32>
    %21 = arith.addf %18, %20 : vector<8x16xf32>
    %cst_19 = arith.constant 0.000000e+00 : f32
    %22 = vector.broadcast %cst_19 : f32 to vector<8x16xf32>
    %23 = arith.cmpf oge, %21, %22 : vector<8x16xf32>
    %cst_20 = arith.constant 0.00999999977 : f32
    %24 = vector.broadcast %cst_20 : f32 to vector<8x16xf32>
    %25 = arith.mulf %24, %21 : vector<8x16xf32>
    %26 = arith.select %23, %21, %25 : vector<8x16xi1>, vector<8x16xf32>
    %c0_21 = arith.constant 0 : index
    %c0_22 = arith.constant 0 : index
    %27 = vector.load %arg8[%c0_21, %c0_22] : memref<16x16xf32, #tpu.memory_space<vmem>>, vector<16x16xf32>
    %cst_23 = arith.constant dense<0.000000e+00> : vector<8x16xf32>
    %28 = tpu.matmul %26, %27, %cst_23 {dimension_numbers = #tpu.dot_dimension_numbers<[1], [0], [0], [1], [0, 0, 1, 1], [], []>} : vector<8x16xf32>, vector<16x16xf32>, vector<8x16xf32> -> vector<8x16xf32>
    %29 = arith.addf %16, %28 : vector<8x16xf32>
    %c0_24 = arith.constant 0 : index
    %c0_25 = arith.constant 0 : index
    %30 = vector.load %arg9[%c0_24, %c0_25] : memref<1x16xf32, #tpu.memory_space<vmem>>, vector<1x16xf32>
    %31 = vector.broadcast %30 : vector<1x16xf32> to vector<8x16xf32>
    %32 = arith.addf %29, %31 : vector<8x16xf32>
    %c0_26 = arith.constant 0 : index
    %c0_27 = arith.constant 0 : index
    %c0_28 = arith.constant 0 : index
    %33 = vector.load %arg10[%c0_26, %c0_27, %c0_28] : memref<1x8x16xf32, #tpu.memory_space<vmem>>, vector<1x8x16xf32>
    %34 = vector.shape_cast %33 : vector<1x8x16xf32> to vector<8x16xf32>
    %35 = vector.shape_cast %32 : vector<8x16xf32> to vector<1x8x16xf32>
    tpu.vector_store %arg10[%c0_26, %c0_27, %c0_28], %35 {strides = array<i32>} : memref<1x8x16xf32, #tpu.memory_space<vmem>>, vector<1x8x16xf32>,
    return
  }
  func.func @transform_0(%arg0: i32) -> (i32, i32, i32) {
    %c0_i32 = arith.constant 0 : i32
    %c0_i32_0 = arith.constant 0 : i32
    %c0_i32_1 = arith.constant 0 : i32
    return %arg0, %c0_i32, %c0_i32_0 : i32, i32, i32
  }
  func.func @transform_1(%arg0: i32) -> (i32, i32) {
    %c0_i32 = arith.constant 0 : i32
    %c0_i32_0 = arith.constant 0 : i32
    %c0_i32_1 = arith.constant 0 : i32
    return %c0_i32, %c0_i32_0 : i32, i32
  }
  func.func @transform_2(%arg0: i32) -> (i32, i32) {
    %c0_i32 = arith.constant 0 : i32
    %c0_i32_0 = arith.constant 0 : i32
    %c0_i32_1 = arith.constant 0 : i32
    return %c0_i32, %c0_i32_0 : i32, i32
  }
  func.func @transform_3(%arg0: i32) -> (i32, i32) {
    %c0_i32 = arith.constant 0 : i32
    %c0_i32_0 = arith.constant 0 : i32
    %c0_i32_1 = arith.constant 0 : i32
    return %c0_i32, %c0_i32_0 : i32, i32
  }
  func.func @transform_4(%arg0: i32) -> (i32, i32) {
    %c0_i32 = arith.constant 0 : i32
    %c0_i32_0 = arith.constant 0 : i32
    %c0_i32_1 = arith.constant 0 : i32
    return %c0_i32, %c0_i32_0 : i32, i32
  }
  func.func @transform_5(%arg0: i32) -> (i32, i32) {
    %c0_i32 = arith.constant 0 : i32
    %c0_i32_0 = arith.constant 0 : i32
    %c0_i32_1 = arith.constant 0 : i32
    return %c0_i32, %c0_i32_0 : i32, i32
  }
  func.func @transform_6(%arg0: i32) -> (i32, i32) {
    %c0_i32 = arith.constant 0 : i32
    %c0_i32_0 = arith.constant 0 : i32
    %c0_i32_1 = arith.constant 0 : i32
    return %c0_i32, %c0_i32_0 : i32, i32
  }
  func.func @transform_7(%arg0: i32) -> (i32, i32) {
    %c0_i32 = arith.constant 0 : i32
    %c0_i32_0 = arith.constant 0 : i32
    %c0_i32_1 = arith.constant 0 : i32
    return %c0_i32, %c0_i32_0 : i32, i32
  }
  func.func @transform_8(%arg0: i32) -> (i32, i32) {
    %c0_i32 = arith.constant 0 : i32
    %c0_i32_0 = arith.constant 0 : i32
    %c0_i32_1 = arith.constant 0 : i32
    return %c0_i32, %c0_i32_0 : i32, i32
  }
  func.func @transform_9(%arg0: i32) -> (i32, i32, i32) {
    %c0_i32 = arith.constant 0 : i32
    %c0_i32_0 = arith.constant 0 : i32
    %c0_i32_1 = arith.constant 0 : i32
    return %arg0, %c0_i32, %c0_i32_0 : i32, i32, i32
  }
}

</mosaic_0001>

<bundles_post_ra>
// kernel: _lambda_.9
= control target key start
LH: loop header
LB: loop body
LE: loop exit
PB: predicated region body
PF: predicated region fallthrough
CT: control target
= control target key end

     0   :  { %s1143_s30 = smov 0   ;;  %s1434_s0 = inlined_call_operand.vmem [shape: f32[2,28,131], index: 0, kind: input, shape index: {}]   ;;  %s1435_s1 = inlined_call_operand.vmem [shape: f32[131,32], index: 1, kind: input, shape index: {}]   ;;  %s1436_s2 = inlined_call_operand.vmem [shape: f32[1,32], index: 2, kind: input, shape index: {}]   ;;  %s1437_s3 = inlined_call_operand.vmem [shape: f32[32,16], index: 3, kind: input, shape index: {}]   ;;  %s1438_s4 = inlined_call_operand.vmem [shape: f32[1,16], index: 4, kind: input, shape index: {}]   ;;  %s1439_s5 = inlined_call_operand.vmem [shape: f32[131,3], index: 5, kind: input, shape index: {}]   ;;  %s1440_s6 = inlined_call_operand.vmem [shape: f32[32,3], index: 6, kind: input, shape index: {}]   ;;  %s1441_s7 = inlined_call_operand.vmem [shape: f32[16,3], index: 7, kind: input, shape index: {}]   ;;  %s1442_s8 = inlined_call_operand.vmem [shape: f32[1,3], index: 8, kind: input, shape index: {}]   ;;  %s1443_s9 = inlined_call_operand.vmem [shape: f32[2,28,3], index: 9, kind: output, shape index: {}]  }
   0x1 LB: > { %s969_s10 = sadd.s32 4294967295, %s1090_s30   ;;  %p973_p0 = scmp.ge.s32.totalorder %s1090_s30, 1  ;;  %s1090_s30 = sphi %s1143_s30, %s19_s30  }
   0x2   : > { %p287_p1 = scmp.lt.s32.totalorder %s1090_s30, 3 }
   0x4   : > { %p288_p2 = pnand %p973_p0, %p287_p1 }
   0x5   : > { %p323_p3 = scmp.lt.s32.totalorder (!%p288_p2), %s969_s10, 1 }
   0x6   : > { %291 = sbr.rel (%p288_p2) target bundleno = 699 (0x2bb), region = 56 }
   0xb   : > { %v373_v0 = vld [vmem:[%s1435_s1 + $0x78] sm:$0xff]  ;;  %v1092_v1 = vmov 0.0   ;;  %v372_v2 = vld [vmem:[%s1435_s1 + $0x70] sm:$0xff]  ;;  %s1445_s10 = smov (!%p323_p3, %s969_s10), 1  ;;  %v371_v3 = vld [vmem:[%s1435_s1 + $0x68] sm:$0xff]  ;;  %vm382_vm0 = vcmask 23552  }
   0xc   : > { %399 = vmatprep.subr.mxu0 %v1092_v1  ;;  %s1005_s17 = sshll.u32 %s1445_s10, 6  ;;  %v370_v4 = vld [vmem:[%s1435_s1 + $0x60] sm:$0xff]  ;;  %v369_v6 = vld [vmem:[%s1435_s1 + $0x58] sm:$0xff]  ;;  %v368_v7 = vld [vmem:[%s1435_s1 + $0x50] sm:$0xff]  ;;  %vm395_vm1 = vcmask 1042432   ;;  %vm500_vm3 = vcmask 261120  }
   0xd   : > { %400 = vmatpush1.msra.mxu0 %v373_v0  ;;  %s1172_s22 = scalar_lea.vmem %s1434_s0, %s1005_s17  ;;  %v367_v8 = vld [vmem:[%s1435_s1 + $0x48] sm:$0xff]  ;;  %v366_v9 = vld [vmem:[%s1435_s1 + $0x40] sm:$0xff]  ;;  %v365_v10 = vld [vmem:[%s1435_s1 + $0x38] sm:$0xff]  ;;  %vm796_vm9 = vcmask 130048   ;;  %s1006_s13 = sshll.u32 %s1445_s10, 5  ;;  %vm912_vm12 = vcmask 19456  }
   0xe   : > { %401 = vmatprep.subr.mxu0 %v1092_v1  ;;  %v1175_v5 = vld [vmem:[%s1172_s22 + $0x8] sm:$0xff]  ;;  %v364_v11 = vld [vmem:[%s1435_s1 + $0x30] sm:$0xff]  ;;  %v362_v13 = vld [vmem:[%s1435_s1 + $0x20] sm:$0xff] }
   0xf   : > { %402 = vmatpush1.msra.mxu0 %v372_v2  ;;  %980 = vmatprep.mubr.msk.f32.mxu0 %vm382_vm0, %v1175_v5  ;;  %v363_v12 = vld [vmem:[%s1435_s1 + $0x28] sm:$0xff]  ;;  %v361_v14 = vld [vmem:[%s1435_s1 + $0x18] sm:$0xff]  ;;  %v360_v15 = vld [vmem:[%s1435_s1 + $0x10] sm:$0xff] }
  0x10   : > { %403 = vmatprep.subr.mxu0 %v1092_v1  ;;  %v359_v16 = vld [vmem:[%s1435_s1 + $0x8] sm:$0xff]  ;;  %v358_v17 = vld [vmem:[%s1435_s1] sm:$0xff]  ;;  %v1236_v20 = vld [vmem:[%s1172_s22 + $0x18] sm:$0xff] }
  0x11   : > { %404 = vmatpush1.msra.mxu0 %v371_v3  ;;  %v374_v18 = vld [vmem:[%s1435_s1 + $0x80] sm:$0x7]  ;;  %v1243_v21 = vld [vmem:[%s1172_s22 + $0x10] sm:$0xff]  ;;  %v1246_v22 = vld [vmem:[%s1172_s22 + $0x28] sm:$0xff] }
  0x12   : > { %405 = vmatprep.subr.mxu0 %v1092_v1  ;;  %v1232_v19 = vld [vmem:[%s1172_s22] sm:$0xff]  ;;  %v1255_v24 = vld [vmem:[%s1172_s22 + $0x38] sm:$0xf]  ;;  %v1261_v25 = vld [vmem:[%s1172_s22 + $0x30] sm:$0xf] }
  0x13   : > { %406 = vmatpush1.msra.mxu0 %v370_v4  ;;  %v1252_v23 = vld [vmem:[%s1172_s22 + $0x20] sm:$0xff]  ;;  %v499_v26 = vld [vmem:[%s1440_s6 + $0x18] sm:$0xff]  ;;  %v498_v28 = vld [vmem:[%s1440_s6 + $0x10] sm:$0xff]  ;;  %s332_s22 = scalar_lea.vmem %s1443_s9, %s1006_s13 }
  0x14   : > { %407 = vmatprep.subr.mxu0 %v1092_v1  ;;  %1029 = vmatprep.subr.mxu1 %v499_v26  ;;  %v1270_v27 = vld [vmem:[%s1437_s3 + $0x18] sm:$0xff]  ;;  %v1280_v29 = vld [vmem:[%s1437_s3 + $0x10] sm:$0xff]  ;;  %v497_v30 = vld [vmem:[%s1440_s6 + $0x8] sm:$0xff] }
  0x15   : > { %408 = vmatpush1.msra.mxu0 %v369_v6  ;;  %1030 = vmatpush3.msra.mxu1 %v499_v26  ;;  %v1290_v31 = vld [vmem:[%s1437_s3 + $0x8] sm:$0xff]  ;;  %v496_v32 = vld [vmem:[%s1440_s6] sm:$0xff]  ;;  %v356_v44 = vld [vmem:[%s1439_s5 + $0x78] sm:$0xff] }
  0x16   : > { %409 = vmatprep.subr.mxu0 %v1092_v1  ;;  %1031 = vmatprep.subr.mxu1 %v498_v28  ;;  %v1300_v33 = vld [vmem:[%s1437_s3] sm:$0xff]  ;;  %v355_v48 = vld [vmem:[%s1439_s5 + $0x70] sm:$0xff]  ;;  %v354_v51 = vld [vmem:[%s1439_s5 + $0x68] sm:$0xff] }
  0x17   : > { %410 = vmatpush1.msra.mxu0 %v368_v7  ;;  %1032 = vmatpush3.msra.mxu1 %v498_v28  ;;  %v978_v34 = vld [vmem:[%s1436_s2] ss:$0 sm:$0xff]  ;;  %v352_v58 = vld [vmem:[%s1439_s5 + $0x58] sm:$0xff]  ;;  %v351_v60 = vld [vmem:[%s1439_s5 + $0x50] sm:$0xff] }
  0x18   : > { %411 = vmatprep.subr.mxu0 %v1092_v1  ;;  %1033 = vmatprep.subr.mxu1 %v497_v30  ;;  %v353_v55 = vld [vmem:[%s1439_s5 + $0x60] sm:$0xff]  ;;  %v350_v61 = vld [vmem:[%s1439_s5 + $0x48] sm:$0xff]  ;;  %v348_v63 = vld [vmem:[%s1439_s5 + $0x38] sm:$0xff] }
  0x19   : > { %412 = vmatpush1.msra.mxu0 %v367_v8  ;;  %1034 = vmatpush3.msra.mxu1 %v497_v30  ;;  %v349_v62 = vld [vmem:[%s1439_s5 + $0x40] sm:$0xff]  ;;  %v347_v0 = vld [vmem:[%s1439_s5 + $0x30] sm:$0xff]  ;;  %v346_v2 = vld [vmem:[%s1439_s5 + $0x28] sm:$0xff] }
  0x1a   : > { %413 = vmatprep.subr.mxu0 %v1092_v1  ;;  %1035 = vmatprep.subr.mxu1 %v496_v32  ;;  %v345_v3 = vld [vmem:[%s1439_s5 + $0x20] sm:$0xff]  ;;  %v344_v4 = vld [vmem:[%s1439_s5 + $0x18] sm:$0xff]  ;;  %v342_v6 = vld [vmem:[%s1439_s5 + $0x8] sm:$0xff] }
  0x1b   : > { %414 = vmatpush1.msra.mxu0 %v366_v9  ;;  %1036 = vmatpush3.msra.mxu1 %v496_v32  ;;  %v341_v7 = vld [vmem:[%s1439_s5] sm:$0xff] }
  0x1c   : > { %415 = vmatprep.subr.mxu0 %v1092_v1  ;;  %601 = vmatprep.subr.mxu1 %v1092_v1  ;;  %v357_v8 = vld [vmem:[%s1439_s5 + $0x80] sm:$0x7] }
  0x1d   : > { %416 = vmatpush1.msra.mxu0 %v365_v10  ;;  %v794_v9 = vld [vmem:[%s1441_s7] sm:$0xff] }
  0x1e   : > { %417 = vmatprep.subr.mxu0 %v1092_v1  ;;  %v993_v10 = vld [vmem:[%s1438_s4] ss:$0 sm:$0xff] }
  0x1f   : > { %418 = vmatpush1.msra.mxu0 %v364_v11 }
  0x20   : > { %419 = vmatprep.subr.mxu0 %v1092_v1 }
  0x21   : > { %420 = vmatpush1.msra.mxu0 %v363_v12 }
  0x22   : > { %421 = vmatprep.subr.mxu0 %v1092_v1 }
  0x23   : > { %422 = vmatpush1.msra.mxu0 %v362_v13 }
  0x24   : > { %423 = vmatprep.subr.mxu0 %v1092_v1 }
  0x25   : > { %424 = vmatpush1.msra.mxu0 %v361_v14 }
  0x26   : > { %425 = vmatprep.subr.mxu0 %v1092_v1 }
  0x27   : > { %426 = vmatpush1.msra.mxu0 %v360_v15 }
  0x28   : > { %427 = vmatprep.subr.mxu0 %v1092_v1 }
  0x29   : > { %428 = vmatpush1.msra.mxu0 %v359_v16 }
  0x2a   : > { %429 = vmatprep.subr.mxu0 %v1092_v1 }
  0x2b   : > { %430 = vmatpush1.msra.mxu0 %v358_v17 }
  0x2c   : > { %461 = vmatprep.subr.mxu0 %v1092_v1 }
  0x2d   : > { %979 = vmatpush2.msk.msra.mxu0 %vm395_vm1, %v374_v18 }
  0x2e   : > { %464 = vmatmul.mubr.f32.vlgmr.msra.gmra.mxu0 %v1232_v19  ;;  %1043 = vmatprep.subr.mxu0 %v1270_v27 }
  0x2f   : > { %981 = vmatprep.mubr.msk.f32.mxu0 %vm382_vm0, %v1236_v20  ;;  %1044 = vmatpush3.msra.mxu0 %v1270_v27 }
  0x30   : > { %1045 = vmatprep.subr.mxu0 %v1280_v29 }
  0x31   : > { %1046 = vmatpush3.msra.mxu0 %v1280_v29 }
  0x32   : > { %469 = vmatmul.mubr.f32.gmra.mxu0 %v1243_v21  ;;  %1047 = vmatprep.subr.mxu0 %v1290_v31 }
  0x33   : > { %982 = vmatprep.mubr.msk.f32.mxu0 %vm382_vm0, %v1246_v22  ;;  %1048 = vmatpush3.msra.mxu0 %v1290_v31 }
  0x34   : > { %1049 = vmatprep.subr.mxu0 %v1300_v33 }
  0x35   : > { %1050 = vmatpush3.msra.mxu0 %v1300_v33 }
  0x36   : > { %474 = vmatmul.mubr.f32.gmra.mxu0 %v1252_v23 }
  0x37   : > { %983 = vmatprep.mubr.msk.f32.mxu0 %vm382_vm0, %v1255_v24 }
  0x3a   : > { %479 = vmatmul.mubr.f32.gmra.mxu0 %v1261_v25 }
  0xee   : > { %v465_v35 = vpop.f32.mrf.mxu0 }
  0xef   : > { %v466_v36 = vadd.f32 %v978_v34, %v465_v35 }
  0xf0   : > { %v467_v37 = vpop.f32.mrf.mxu0 }
  0xf1   : > { %vm484_vm2 = vcmp.ge.f32.partialorder %v466_v36, 0.0  ;;  %v488_v38 = vmul.f32 0.01, %v466_v36 }
  0xf2   : > { %v470_v39 = vpop.f32.mrf.mxu0 }
  0xf3   : > { %v471_v40 = vadd.f32 %v978_v34, %v470_v39  ;;  %v492_v41 = vsel %vm484_vm2, %v466_v36, %v488_v38 }
  0xf4   : > { %v472_v42 = vpop.f32.mrf.mxu0  ;;  %1037 = vmatprep.mubr.msk.f32.mxu1 %vm500_vm3, %v492_v41  ;;  %1051 = vmatprep.mubr.msk.f32.mxu0 %vm500_vm3, %v492_v41 }
  0xf5   : > { %vm485_vm4 = vcmp.ge.f32.partialorder %v471_v40, 0.0  ;;  %v489_v43 = vmul.f32 0.01, %v471_v40 }
  0xf6   : > { %v475_v45 = vpop.f32.mrf.mxu0 }
  0xf7   : > { %v493_v46 = vsel %vm485_vm4, %v471_v40, %v489_v43  ;;  %v476_v47 = vadd.f32 %v978_v34, %v475_v45 }
  0xf8   : > { %1038 = vmatmul.mubr.msk.f32.vlgmr.msra.gmra.mxu1 %vm500_vm3, %v493_v46  ;;  %1052 = vmatmul.mubr.msk.f32.vlgmr.msra.gmra.mxu0 %vm500_vm3, %v493_v46  ;;  %v477_v49 = vpop.f32.mrf.mxu0 }
  0xf9   : > { %602 = vmatpush1.msra.mxu1 %v356_v44  ;;  %vm486_vm5 = vcmp.ge.f32.partialorder %v476_v47, 0.0  ;;  %v490_v50 = vmul.f32 0.01, %v476_v47  ;;  %v1002_v44 = vld [vmem:[%s1442_s8] ss:$0 sm:$0xff] }
  0xfa   : > { %603 = vmatprep.subr.mxu1 %v1092_v1  ;;  %v480_v52 = vpop.f32.mrf.mxu0 }
  0xfb   : > { %604 = vmatpush1.msra.mxu1 %v355_v48  ;;  %v481_v53 = vadd.f32 %v978_v34, %v480_v52  ;;  %v1322_v54 = vsel %vm486_vm5, %v476_v47, %v490_v50 }
  0xfc   : > { %605 = vmatprep.subr.mxu1 %v1092_v1  ;;  %v482_v56 = vpop.f32.mrf.mxu0  ;;  %1040 = vmatprep.mubr.msk.f32.mxu1 %vm500_vm3, %v1322_v54 }
  0xfd   : > { %606 = vmatpush1.msra.mxu1 %v354_v51  ;;  %vm487_vm6 = vcmp.ge.f32.partialorder %v481_v53, 0.0  ;;  %v491_v57 = vmul.f32 0.01, %v481_v53 }
  0xfe   : > { %607 = vmatprep.subr.mxu1 %v1092_v1 }
  0xff   : > { %608 = vmatpush1.msra.mxu1 %v353_v55  ;;  %v495_v59 = vsel %vm487_vm6, %v481_v53, %v491_v57 }
 0x100   : > { %609 = vmatprep.subr.mxu1 %v1092_v1  ;;  %1041 = vmatmul.mubr.msk.f32.gmra.mxu1 %vm500_vm3, %v495_v59 }
 0x101   : > { %610 = vmatpush1.msra.mxu1 %v352_v58  ;;  %989 = vmatprep.mubr.msk.f32.mxu1 %vm382_vm0, %v1175_v5  ;;  %v343_v5 = vld [vmem:[%s1439_s5 + $0x10] sm:$0xff] }
 0x102   : > { %611 = vmatprep.subr.mxu1 %v1092_v1 }
 0x103   : > { %612 = vmatpush1.msra.mxu1 %v351_v60 }
 0x104   : > { %613 = vmatprep.subr.mxu1 %v1092_v1 }
 0x105   : > { %614 = vmatpush1.msra.mxu1 %v350_v61 }
 0x106   : > { %615 = vmatprep.subr.mxu1 %v1092_v1 }
 0x107   : > { %616 = vmatpush1.msra.mxu1 %v349_v62 }
 0x108   : > { %617 = vmatprep.subr.mxu1 %v1092_v1 }
 0x109   : > { %618 = vmatpush1.msra.mxu1 %v348_v63 }
 0x10a   : > { %619 = vmatprep.subr.mxu1 %v1092_v1 }
 0x10b   : > { %620 = vmatpush1.msra.mxu1 %v347_v0 }
 0x10c   : > { %621 = vmatprep.subr.mxu1 %v1092_v1 }
 0x10d   : > { %622 = vmatpush1.msra.mxu1 %v346_v2 }
 0x10e   : > { %623 = vmatprep.subr.mxu1 %v1092_v1 }
 0x10f   : > { %624 = vmatpush1.msra.mxu1 %v345_v3 }
 0x110   : > { %625 = vmatprep.subr.mxu1 %v1092_v1 }
 0x111   : > { %626 = vmatpush1.msra.mxu1 %v344_v4 }
 0x112   : > { %627 = vmatprep.subr.mxu1 %v1092_v1 }
 0x113   : > { %628 = vmatpush1.msra.mxu1 %v343_v5 }
 0x114   : > { %629 = vmatprep.subr.mxu1 %v1092_v1 }
 0x115   : > { %630 = vmatpush1.msra.mxu1 %v342_v6 }
 0x116   : > { %631 = vmatprep.subr.mxu1 %v1092_v1 }
 0x117   : > { %632 = vmatpush1.msra.mxu1 %v341_v7 }
 0x118   : > { %663 = vmatprep.subr.mxu1 %v1092_v1  ;;  %v795_v1 = vld [vmem:[%s1441_s7 + $0x8] sm:$0xff] }
 0x119   : > { %988 = vmatpush2.msk.msra.mxu1 %vm395_vm1, %v357_v8  ;;  %1057 = vmatprep.subr.mxu0 %v795_v1 }
 0x11a   : > { %666 = vmatmul.mubr.f32.vlgmr.msra.gmra.mxu1 %v1232_v19  ;;  %1067 = vmatprep.subr.mxu1 %v1270_v27 }
 0x11b   : > { %1071 = vmatpush3.msra.mxu1 %v1270_v27  ;;  %990 = vmatprep.mubr.msk.f32.mxu1 %vm382_vm0, %v1236_v20 }
 0x11c   : > { %1068 = vmatprep.subr.mxu1 %v1280_v29  ;;  %1058 = vmatpush3.msra.mxu0 %v795_v1 }
 0x11d   : > { %1072 = vmatpush3.msra.mxu1 %v1280_v29  ;;  %1059 = vmatprep.subr.mxu0 %v794_v9 }
 0x11e   : > { %671 = vmatmul.mubr.f32.gmra.mxu1 %v1243_v21  ;;  %1069 = vmatprep.subr.mxu1 %v1290_v31 }
 0x11f   : > { %991 = vmatprep.mubr.msk.f32.mxu1 %vm382_vm0, %v1246_v22  ;;  %1073 = vmatpush3.msra.mxu1 %v1290_v31 }
 0x120   : > { %1070 = vmatprep.subr.mxu1 %v1300_v33  ;;  %1060 = vmatpush3.msra.mxu0 %v794_v9 }
 0x121   : > { %1074 = vmatpush3.msra.mxu1 %v1300_v33 }
 0x122   : > { %676 = vmatmul.mubr.f32.gmra.mxu1 %v1252_v23 }
 0x123   : > { %992 = vmatprep.mubr.msk.f32.mxu1 %vm382_vm0, %v1255_v24 }
 0x126   : > { %681 = vmatmul.mubr.f32.gmra.mxu1 %v1261_v25 }
 0x127   : > { %1054 = vmatprep.mubr.msk.f32.mxu1 %vm500_vm3, %v1322_v54 }
 0x12a   : > { %1055 = vmatmul.mubr.msk.f32.vlgmr.msra.gmra.mxu1 %vm500_vm3, %v495_v59 }
 0x1b8   : > { %v1053_v11 = vpop.f32.mrf.mxu0  ;;  %v1039_v19 = vpop.f32.mrf.mxu1 }
 0x1b9   : > { %v769_v12 = vadd.f32 %v1053_v11, %v993_v10 }
 0x1ba   : > { %v763_v13 = vpop.f32.mrf.mxu0  ;;  %v579_v20 = vpop.f32.mrf.mxu1 }
 0x1bb   : > { %v764_v14 = vadd.f32 %v993_v10, %v763_v13  ;;  %v787_v15 = vmul.f32 0.01, %v769_v12  ;;  %vm783_vm7 = vcmp.ge.f32.partialorder %v769_v12, 0.0 }
 0x1bd   : > { %vm782_vm8 = vcmp.ge.f32.partialorder %v764_v14, 0.0  ;;  %v786_v16 = vmul.f32 0.01, %v764_v14  ;;  %v791_v18 = vsel %vm783_vm7, %v769_v12, %v787_v15 }
 0x1bf   : > { %v790_v17 = vsel %vm782_vm8, %v764_v14, %v786_v16 }
 0x1c0   : > { %1061 = vmatprep.mubr.msk.f32.mxu0 %vm796_vm9, %v790_v17  ;;  %v1042_v21 = vpop.f32.mrf.mxu1 }
 0x1c1   : > { %1062 = vmatmul.mubr.msk.f32.vlgmr.msra.gmra.mxu0 %vm796_vm9, %v791_v18 }
 0x1c2   : > { %v589_v22 = vpop.f32.mrf.mxu1 }
 0x1da   : > { %v667_v23 = vpop.f32.mrf.mxu1 }
 0x1db   : > { %v668_v24 = vadd.f32 %v667_v23, %v579_v20 }
 0x1dc   : > { %v669_v25 = vpop.f32.mrf.mxu1 }
 0x1de   : > { %v672_v26 = vpop.f32.mrf.mxu1 }
 0x1df   : > { %v673_v27 = vadd.f32 %v1039_v19, %v672_v26 }
 0x1e0   : > { %v674_v28 = vpop.f32.mrf.mxu1 }
 0x1e2   : > { %v677_v29 = vpop.f32.mrf.mxu1 }
 0x1e3   : > { %v678_v30 = vadd.f32 %v677_v29, %v589_v22 }
 0x1e4   : > { %v679_v31 = vpop.f32.mrf.mxu1 }
 0x1e6   : > { %v682_v32 = vpop.f32.mrf.mxu1 }
 0x1e7   : > { %v683_v33 = vadd.f32 %v1042_v21, %v682_v32 }
 0x1e8   : > { %v684_v34 = vpop.f32.mrf.mxu1 }
 0x1ea   : > { %v1056_v35 = vpop.f32.mrf.mxu1 }
 0x1eb   : > { %v779_v36 = vadd.f32 %v1056_v35, %v993_v10 }
 0x1ec   : > { %v773_v37 = vpop.f32.mrf.mxu1 }
 0x1ed   : > { %v774_v38 = vadd.f32 %v993_v10, %v773_v37  ;;  %v789_v39 = vmul.f32 0.01, %v779_v36  ;;  %vm785_vm10 = vcmp.ge.f32.partialorder %v779_v36, 0.0 }
 0x1ef   : > { %vm784_vm11 = vcmp.ge.f32.partialorder %v774_v38, 0.0  ;;  %v788_v40 = vmul.f32 0.01, %v774_v38  ;;  %v793_v42 = vsel %vm785_vm10, %v779_v36, %v789_v39 }
 0x1f1   : > { %v792_v41 = vsel %vm784_vm11, %v774_v38, %v788_v40 }
 0x1f2   : > { %1064 = vmatprep.mubr.msk.f32.mxu0 %vm796_vm9, %v792_v41 }
 0x1f3   : > { %1065 = vmatmul.mubr.msk.f32.gmra.mxu0 %vm796_vm9, %v793_v42 }
 0x281   : > { %v1063_v43 = vpop.f32.mrf.mxu0 }
 0x282   : > { %v895_v45 = vadd.f32 %v1063_v43, %v673_v27 }
 0x283   : > { %v875_v46 = vpop.f32.mrf.mxu0 }
 0x284   : > { %v906_v47 = vadd.f32 %v1002_v44, %v895_v45  ;;  %v894_v48 = vadd.f32 %v875_v46, %v668_v24 }
 0x286   : > { %910 = vst.msk [vmem:[%s332_s22 + $0x8] sm:$0xff] %vm382_vm0, %v906_v47  ;;  %v905_v49 = vadd.f32 %v1002_v44, %v894_v48 }
 0x288   : > { %909 = vst.msk [vmem:[%s332_s22] sm:$0xff] %vm382_vm0, %v905_v49 }
 0x2b3   : > { %v1066_v50 = vpop.f32.mrf.mxu0 }
 0x2b4   : > { %v897_v51 = vadd.f32 %v1066_v50, %v683_v33 }
 0x2b5   : > { %v885_v52 = vpop.f32.mrf.mxu0 }
 0x2b6   : > { %v908_v53 = vadd.f32 %v1002_v44, %v897_v51  ;;  %v896_v54 = vadd.f32 %v885_v52, %v678_v30 }
 0x2b8   : > { %913 = vst.msk [vmem:[%s332_s22 + $0x18] sm:$0xf] %vm912_vm12, %v908_v53  ;;  %v907_v55 = vadd.f32 %v1002_v44, %v896_v54 }
 0x2ba   : > { %911 = vst.msk [vmem:[%s332_s22 + $0x10] sm:$0xff] %vm382_vm0, %v907_v55 }
 0x2bb PF: > { %s19_s30 = sadd.s32 1, %s1090_s30  }
 0x2bc   : > { %p16_p4 = scmp.ge.s32.totalorder %s19_s30, 4  }
 0x2be   :  { %18 = sbr.rel (!%p16_p4) target bundleno = 1 (0x1), region = 86 }

// kernel: _lambda_.6
= control target key start
LH: loop header
LB: loop body
LE: loop exit
PB: predicated region body
PF: predicated region fallthrough
CT: control target
= control target key end

     0   :  { %s4293_s6 = smov 1   ;;  %s4294_s10 = smov 2   ;;  %s4918_s0 = inlined_call_operand.smem [shape: u32[37], index: -1, kind: input, shape index: {}] }
   0x1   :  { %s4348_s5 = sld [smem:[%s4918_s0]]   ;;  %s4295_s14 = smov 3  }
   0x2   :  { %s4353_s9 = sld [smem:[%s4918_s0 + %s4293_s6]]   ;;  %s4296_s18 = smov 4  }
   0x3   :  { %s4358_s13 = sld [smem:[%s4918_s0 + %s4294_s10]]   ;;  %s4297_s22 = smov 5  }
   0x4   :  { %s4363_s17 = sld [smem:[%s4918_s0 + %s4295_s14]]   ;;  %s4298_s26 = smov 6  }
   0x5   :  { %s4368_s21 = sld [smem:[%s4918_s0 + %s4296_s18]]   ;;  %s4299_s30 = smov 7  }
   0x6   :  { %s4373_s25 = sld [smem:[%s4918_s0 + %s4297_s22]]   ;;  %s4300_s4 = smov 8  }
   0x7   :  { %4936 = sst [smem:[#allocation17_spill]] %s4348_s5  ;;  %s4301_s10 = smov 9  }
   0x8   :  { %s4378_s29 = sld [smem:[%s4918_s0 + %s4298_s26]]   ;;  %s4302_s15 = smov 10  }
   0x9   :  { %s4383_s3 = sld [smem:[%s4918_s0 + %s4299_s30]]   ;;  %s4303_s20 = smov 11  }
   0xa   :  { %4937 = sst [smem:[#allocation18_spill]] %s4363_s17  ;;  %s4304_s26 = smov 12  }
   0xb   :  { %4938 = sst [smem:[#allocation19_spill]] %s4368_s21  ;;  %s4305_s1 = smov 13  }
   0xc   :  { %4939 = sst [smem:[#allocation20_spill]] %s4373_s25  ;;  %s4306_s7 = smov 14  }
   0xd   :  { %s4388_s8 = sld [smem:[%s4918_s0 + %s4300_s4]]   ;;  %s4308_s22 = smov 16  }
   0xe   :  { %4940 = sst [smem:[#allocation21_spill]] %s4378_s29  ;;  %s4309_s28 = smov 17  }
   0xf   :  { %s4393_s14 = sld [smem:[%s4918_s0 + %s4301_s10]]  }
  0x10   :  { %s4398_s19 = sld [smem:[%s4918_s0 + %s4302_s15]]   ;;  %s4307_s15 = smov 15  }
  0x11   :  { %s4403_s24 = sld [smem:[%s4918_s0 + %s4303_s20]]  }
  0x12   :  { %s4408_s30 = sld [smem:[%s4918_s0 + %s4304_s26]]  }
  0x13   :  { %s4413_s6 = sld [smem:[%s4918_s0 + %s4305_s1]]  }
  0x14   :  { %s4418_s12 = sld [smem:[%s4918_s0 + %s4306_s7]]   ;;  %s4310_s7 = smov 18  }
  0x15   :  { %s4423_s20 = sld [smem:[%s4918_s0 + %s4307_s15]]   ;;  %s4311_s15 = smov 19  }
  0x16   :  { %4941 = sst [smem:[#allocation22_spill]] %s4398_s19 }
  0x17   :  { %s4428_s27 = sld [smem:[%s4918_s0 + %s4308_s22]]   ;;  %s4312_s22 = smov 20  }
  0x18   :  { %s4433_s4 = sld [smem:[%s4918_s0 + %s4309_s28]]   ;;  %s4313_s28 = smov 21  }
  0x19   :  { %s4438_s29 = sld [smem:[%s4918_s0 + %s4310_s7]]   ;;  %s4314_s7 = smov 22  }
  0x1a   :  { %4942 = sst [smem:[#allocation23_spill]] %s4418_s12 }
  0x1b   :  { %4943 = sst [smem:[#allocation24_spill]] %s4423_s20 }
  0x1c   :  { %s4443_s25 = sld [smem:[%s4918_s0 + %s4311_s15]]   ;;  %s4315_s15 = smov 23  }
  0x1d   :  { %4944 = sst [smem:[#allocation25_spill]] %s4428_s27 }
  0x1e   :  { %s4448_s21 = sld [smem:[%s4918_s0 + %s4312_s22]]   ;;  %s4316_s22 = smov 24  }
  0x1f   :  { %4945 = sst [smem:[#allocation26_spill]] %s4438_s29 }
  0x20   :  { %s4453_s19 = sld [smem:[%s4918_s0 + %s4313_s28]]   ;;  %s4317_s28 = smov 25  }
  0x21   :  { %s4458_s29 = sld [smem:[%s4918_s0 + %s4314_s7]]   ;;  %s4318_s7 = smov 26  }
  0x22   :  { %4946 = sst [smem:[#allocation27_spill]] %s4443_s25 }
  0x23   :  { %s4463_s25 = sld [smem:[%s4918_s0 + %s4315_s15]]   ;;  %s4319_s15 = smov 27  }
  0x24   :  { %s4468_s12 = sld [smem:[%s4918_s0 + %s4316_s22]]   ;;  %s4320_s22 = smov 28  }
  0x25   :  { %s4478_s17 = sld [smem:[%s4918_s0 + %s4318_s7]]   ;;  %s4322_s7 = smov 30  }
  0x26   :  { %4947 = sst [smem:[#allocation28_spill]] %s4453_s19 }
  0x27   :  { %s4473_s19 = sld [smem:[%s4918_s0 + %s4317_s28]]   ;;  %s4321_s28 = smov 29  }
  0x28   :  { %s4488_s5 = sld [smem:[%s4918_s0 + %s4320_s22]]   ;;  %s4324_s22 = smov 32  }
  0x29   :  { %4948 = sst [smem:[#allocation29_spill]] %s4463_s25 }
  0x2a   :  { %s4483_s25 = sld [smem:[%s4918_s0 + %s4319_s15]]   ;;  %s4323_s15 = smov 31  }
  0x2b   :  { %4950 = sst [smem:[#allocation31_spill]] %s4478_s17 }
  0x2c   :  { %s4498_s17 = sld [smem:[%s4918_s0 + %s4322_s7]]   ;;  %s4326_s7 = smov 34  }
  0x2d   :  { %4949 = sst [smem:[#allocation30_spill]] %s4473_s19 }
  0x2e   :  { %4952 = sst [smem:[#allocation33_spill]] %s4488_s5 }
  0x2f   :  { %s4493_s19 = sld [smem:[%s4918_s0 + %s4321_s28]]   ;;  %s4325_s28 = smov 33  }
  0x30   :  { %4951 = sst [smem:[#allocation32_spill]] %s4483_s25 }
  0x31   :  { %s4503_s25 = sld [smem:[%s4918_s0 + %s4323_s15]]   ;;  %s4327_s15 = smov 35  }
  0x32   :  { %4953 = sst [smem:[#allocation34_spill]] %s4498_s17 }
  0x33   :  { %s4508_s5 = sld [smem:[%s4918_s0 + %s4324_s22]]   ;;  %s4328_s22 = smov 36  }
  0x34   :  { %s4513_s27 = sld [smem:[%s4918_s0 + %s4325_s28]]  }
  0x35   :  { %s4518_s17 = sld [smem:[%s4918_s0 + %s4326_s7]]  }
  0x36   :  { %s4523_s20 = sld [smem:[%s4918_s0 + %s4327_s15]]  }
  0x39   :  { %4954 = sst [smem:[#allocation35_spill]] %s4508_s5 }
  0x3a   :  { %s4528_s5 = sld [smem:[%s4918_s0 + %s4328_s22]]  }
  0x3b   :  { %79 = vsyncpa [#allocation3], 0 }
  0x3c   :  { %80 = vsyncpa [#allocation5], 0 }
  0x3d   :  { %81 = vsyncpa [#allocation8], 0 }
  0x3e   :  { %82 = vsyncpa [#allocation11], 0  ;;  %s4530_s28 = smov 0  }
  0x3f LB: > { %s4329_s1 = smov [#allocation4]   ;;  %s4536_s7 = sadd.s32 4294967295, %s4291_s28   ;;  %s4291_s28 = sphi %s4530_s28, %s88_s28  }
  0x40   : > { %s973_s2 = sshll.u32 %s4329_s1, 4  ;;  %p3597_p0 = scmp.ge.s32.totalorder %s4291_s28, 1  ;;  %s974_s2 = int_to_ptr.vmem [resolvable:$true] %s973_s2 }
  0x41   : > { %p910_p1 = scmp.lt.s32.totalorder %s4291_s28, 3  ;;  %p4930_p2 = scmp.eq.s32.totalorder %s4536_s7, 0 }
  0x42   : > { %s4330_s10 = smov [#allocation7]   ;;  %s4331_s15 = smov [#allocation10]  }
  0x43   : > { %p4541_p3 = pnand %p3597_p0, %p910_p1  ;;  %s1001_s11 = sshll.u32 %s4330_s10, 4  ;;  %s4547_s11 = int_to_ptr.vmem [resolvable:$true] %s1001_s11 }
  0x44   : > { %s1038_s16 = sshll.u32 %s4331_s15, 4  ;;  %s4332_s22 = smov [#allocation2]   ;;  %s4555_s16 = int_to_ptr.vmem [resolvable:$true] %s1038_s16 }
  0x45   : > { %s4955_s0 = scalar_select %p4541_p3, 1, 0 }
  0x46   : > { %p3993_p4 = pneg %p4541_p3  ;;  %s956_s23 = sshll.u32 %s4332_s22, 4  ;;  %s4557_s23 = int_to_ptr.vmem [resolvable:$true] %s956_s23 }
  0x47   : > { %s4098_s1 = scalar_lea.vmem %s974_s2, 16  ;;  %s4105_s10 = scalar_lea.vmem %s974_s2, 32 }
  0x48   : > { %p4551_p5 = pnand %p4930_p2, %p3993_p4  ;;  %p4099_p7 = scmp.ne.s32.totalorder %s974_s2, %s4098_s1 }
  0x49   : > { %p4106_p10 = scmp.lt.s32.totalorder %s974_s2, %s974_s2  ;;  %p4107_p11 = scmp.lt.s32.totalorder %s4105_s10, %s4098_s1 }
  0x4a   : > { %p4561_p6 = pneg %p4551_p5 }
  0x4b   : > { %p4108_p12 = por %p4107_p11, %p4106_p10 }
  0x4c   : > { %p4101_p8 = pnand %p4099_p7, %p4561_p6 }
  0x4e   : > { %p4102_p9 = pneg %p4101_p8 }
  0x50   : > { %p4109_p13 = pnand %p4108_p12, %p4102_p9 }
  0x52   : > { %4112 = shalt.err (!%p4109_p13)
}
  0x53   : > { %3999 = dma.hbm_to_vmem [thread:$0]  (!%p4551_p5), %s4448_s21, 16, %s974_s2, [#allocation5]  }
  0x54   : > { %s4124_s15 = scalar_lea.vmem %s4547_s11, 16  ;;  %s4131_s22 = scalar_lea.vmem %s4547_s11, 32 }
  0x55   : > { %p4125_p0 = scmp.ne.s32.totalorder %s4547_s11, %s4124_s15  ;;  %p4132_p7 = scmp.lt.s32.totalorder %s4547_s11, %s4547_s11 }
  0x56   : > { %p4133_p8 = scmp.lt.s32.totalorder %s4131_s22, %s4124_s15 }
  0x57   : > { %p4127_p1 = pnand %p4125_p0, %p4561_p6 }
  0x58   : > { %p4134_p9 = por %p4133_p8, %p4132_p7 }
  0x59   : > { %p4128_p4 = pneg %p4127_p1 }
  0x5b   : > { %p4135_p10 = pnand %p4134_p9, %p4128_p4 }
  0x5d   : > { %4138 = shalt.err (!%p4135_p10)
}
  0x5e   : > { %4005 = dma.hbm_to_vmem [thread:$0]  (!%p4551_p5), %s4468_s12, 16, %s4547_s11, [#allocation8]  }
  0x5f   : > { %s4150_s2 = scalar_lea.vmem %s4555_s16, 16  ;;  %s4157_s1 = scalar_lea.vmem %s4555_s16, 32 }
  0x60   : > { %p4151_p11 = scmp.ne.s32.totalorder %s4555_s16, %s4150_s2  ;;  %p4158_p0 = scmp.lt.s32.totalorder %s4555_s16, %s4555_s16 }
  0x61   : > { %p4159_p1 = scmp.lt.s32.totalorder %s4157_s1, %s4150_s2 }
  0x62   : > { %p4153_p12 = pnand %p4151_p11, %p4561_p6 }
  0x63   : > { %p4160_p4 = por %p4159_p1, %p4158_p0 }
  0x64   : > { %p4154_p13 = pneg %p4153_p12 }
  0x66   : > { %p4161_p7 = pnand %p4160_p4, %p4154_p13 }
  0x68   : > { %4164 = shalt.err (!%p4161_p7)
}
  0x69   : > { %4011 = dma.hbm_to_vmem [thread:$0]  (!%p4551_p5), %s4503_s25, 16, %s4555_s16, [#allocation11]  }
  0x6a   : > { %s4176_s11 = scalar_lea.vmem %s4557_s23, 16  ;;  %s4183_s10 = scalar_lea.vmem %s4557_s23, 32 }
  0x6b   : > { %p4177_p8 = scmp.ne.s32.totalorder %s4557_s23, %s4176_s11  ;;  %p4184_p11 = scmp.lt.s32.totalorder %s4557_s23, %s4557_s23 }
  0x6c   : > { %p4185_p12 = scmp.lt.s32.totalorder %s4183_s10, %s4176_s11 }
  0x6d   : > { %p4179_p9 = pnand %p4177_p8, %p4561_p6 }
  0x6e   : > { %p4186_p13 = por %p4185_p12, %p4184_p11 }
  0x6f   : > { %p4180_p10 = pneg %p4179_p9 }
  0x71   : > { %p4187_p0 = pnand %p4186_p13, %p4180_p10 }
  0x73   : > { %4190 = shalt.err (!%p4187_p0)
}
  0x74   : > { %3996 = dma.hbm_to_vmem [thread:$0]  (!%p4551_p5), %s4433_s4, 16, %s4557_s23, [#allocation3]  }
  0x75   : > { %s4333_s15 = smov [#allocation6]   ;;  %s4334_s22 = smov [#allocation9]  }
  0x76   : > { %s987_s16 = sshll.u32 %s4333_s15, 4  ;;  %s1024_s2 = sshll.u32 %s4334_s22, 4  ;;  %s988_s16 = int_to_ptr.vmem [resolvable:$true] %s987_s16  ;;  %s1025_s2 = int_to_ptr.vmem [resolvable:$true] %s1024_s2 }
  0x77   : > { %s4202_s1 = scalar_lea.vmem %s988_s16, 16  ;;  %s4209_s11 = scalar_lea.vmem %s988_s16, 32 }
  0x78   : > { %p4203_p1 = scmp.ne.s32.totalorder %s988_s16, %s4202_s1  ;;  %p4210_p8 = scmp.lt.s32.totalorder %s988_s16, %s988_s16 }
  0x79   : > { %p4211_p9 = scmp.lt.s32.totalorder %s4209_s11, %s4202_s1 }
  0x7a   : > { %p4205_p4 = pnand %p4203_p1, %p4561_p6 }
  0x7b   : > { %p4212_p10 = por %p4211_p9, %p4210_p8 }
  0x7c   : > { %p4206_p7 = pneg %p4205_p4 }
  0x7e   : > { %p4213_p11 = pnand %p4212_p10, %p4206_p7 }
  0x80   : > { %4216 = shalt.err (!%p4213_p11)
}
  0x81   : > { %4002 = dma.hbm_to_vmem [thread:$0]  (!%p4551_p5), %s4458_s29, 16, %s988_s16, [#allocation5]  }
  0x82   : > { %s4228_s23 = scalar_lea.vmem %s1025_s2, 16  ;;  %s4235_s10 = scalar_lea.vmem %s1025_s2, 32 }
  0x83   : > { %p4229_p12 = scmp.ne.s32.totalorder %s1025_s2, %s4228_s23  ;;  %p4236_p1 = scmp.lt.s32.totalorder %s1025_s2, %s1025_s2 }
  0x84   : > { %p4237_p4 = scmp.lt.s32.totalorder %s4235_s10, %s4228_s23 }
  0x85   : > { %p4231_p13 = pnand %p4229_p12, %p4561_p6 }
  0x86   : > { %p4238_p2 = por %p4237_p4, %p4236_p1 }
  0x87   : > { %p4232_p0 = pneg %p4231_p13 }
  0x89   : > { %p4239_p3 = pnand %p4238_p2, %p4232_p0 }
  0x8b   : > { %4242 = shalt.err (!%p4239_p3)
}
  0x8c   : > { %4008 = dma.hbm_to_vmem [thread:$0]  (!%p4551_p5), %s4493_s19, 16, %s1025_s2, [#allocation8]  }
  0x8d   : > { %s4335_s15 = smov [#allocation12]  }
  0x8e   : > { %s1055_s22 = sshll.u32 %s4335_s15, 4  ;;  %s1056_s22 = int_to_ptr.vmem [resolvable:$true] %s1055_s22 }
  0x8f   : > { %s4254_s16 = scalar_lea.vmem %s1056_s22, 16  ;;  %s4261_s1 = scalar_lea.vmem %s1056_s22, 32 }
  0x90   : > { %p4255_p7 = scmp.ne.s32.totalorder %s1056_s22, %s4254_s16  ;;  %p4262_p10 = scmp.lt.s32.totalorder %s1056_s22, %s1056_s22 }
  0x91   : > { %p4263_p11 = scmp.lt.s32.totalorder %s4261_s1, %s4254_s16 }
  0x92   : > { %p4257_p8 = pnand %p4255_p7, %p4561_p6 }
  0x93   : > { %p4264_p12 = por %p4263_p11, %p4262_p10 }
  0x94   : > { %p4258_p9 = pneg %p4257_p8 }
  0x96   : > { %p4265_p13 = pnand %p4264_p12, %p4258_p9 }
  0x98   : > { %4268 = shalt.err (!%p4265_p13)
}
  0x99   : > { %4014 = dma.hbm_to_vmem [thread:$0]  (!%p4551_p5), %s4518_s17, 16, %s1056_s22, [#allocation11]  }
  0x9a   : > { %p4958_p2 = scmp.ne.s32.totalorder %s4955_s0, 0 }
  0x9b   : > { %p4959_p3 = scmp.eq.s32.totalorder (!%p4958_p2), %s4536_s7, 0 }
  0x9c   : > { %1112 = sbr.rel (%p4958_p2) target bundleno = 1653 (0x675), region = 160 }
  0xa1   : > { %4274 = dma.done.wait (%p4959_p3), [#allocation3], 16   ;;  %p4960_p0 = pmov %p4959_p3 }
  0xa3   : > { %4276 = vsyncadd (%p4960_p0), [#allocation3], 4294967280  ;;  %p4961_p6 = pmov %p4960_p0 }
  0xa4   : > { %p4962_p1 = pmov %p4960_p0 }
  0xa5   : > { %4278 = dma.done.wait (%p4961_p6), [#allocation5], 32  }
  0xa6   : > { %4280 = vsyncadd (%p4962_p1), [#allocation5], 4294967264  ;;  %p4963_p4 = pmov %p4960_p0 }
  0xa7   : > { %p4964_p5 = pmov %p4960_p0 }
  0xa8   : > { %4282 = dma.done.wait (%p4963_p4), [#allocation8], 32  }
  0xa9   : > { %4284 = vsyncadd (%p4964_p5), [#allocation8], 4294967264  ;;  %p4965_p7 = pmov %p4960_p0 }
  0xaa   : > { %p4966_p8 = pmov %p4960_p0 }
  0xab   : > { %4286 = dma.done.wait (%p4965_p7), [#allocation11], 32  }
  0xac   : > { %4288 = vsyncadd (%p4966_p8), [#allocation11], 4294967264  ;;  %p1251_p9 = scmp.lt.s32.totalorder %s4536_s7, 1  ;;  %v4336_v0 = vmov 0.0   ;;  %vm4337_vm0 = vmmov 0   ;;  %v1315_v1 = vld [vmem:[%s4383_s3 + $0x8] sm:$0xff] }
  0xad   : > { %3787 = vmatprep.subr.mxu0 %v4336_v0  ;;  %3791 = vmatprep.mubr.msk.f32.mxu0 %vm4337_vm0, %v4336_v0  ;;  %v1314_v2 = vld [vmem:[%s4383_s3] sm:$0xff]  ;;  %vm1317_vm1 = vcmask 130048   ;;  %v1471_v4 = vld [vmem:[%s4403_s24 + $0x8] sm:$0xff]  ;;  %s4967_s18 = sld [smem:[#allocation24_spill]]  ;;  %vm1716_vm4 = vcmask 261120   ;;  %vm2000_vm5 = vcmask 1041408  }
  0xae   : > { %s4987_s7 = smov (!%p1251_p9, %s4536_s7), 1  ;;  %3794 = vmatprep.subr.mxu1 %v4336_v0  ;;  %3798 = vmatprep.mubr.msk.f32.mxu1 %vm4337_vm0, %v4336_v0  ;;  %v1470_v5 = vld [vmem:[%s4403_s24] sm:$0xff]  ;;  %v1395_v7 = vld [vmem:[%s4393_s14 + $0x8] sm:$0xff]  ;;  %s4968_s26 = sld [smem:[#allocation25_spill]]  ;;  %vm1975_vm6 = vcmask 80896   ;;  %vm2166_vm7 = vcmask 1042432  }
  0xaf   : > { %s1257_s0 = scalar_lea.vmem %s4353_s9, %s4987_s7  ;;  %3788 = vmatpush3.msra.mxu0 %v1315_v1  ;;  %v1288_v6 = vld [vmem:[%s4358_s13] sm:$0xff]  ;;  %3795 = vmatpush3.msra.mxu1 %v1395_v7  ;;  %v1556_v16 = vld [vmem:[%s4413_s6 + $0x8] sm:$0xff]  ;;  %s4969_s2 = sld [smem:[#allocation17_spill]]  ;;  %vm2141_vm9 = vcmask 23552  }
  0xb0   : > { %v1287_v3 = vld [vmem:[%s1257_s0] sm:$0x1]  ;;  %3789 = vmatprep.subr.mxu0 %v4336_v0  ;;  %3796 = vmatprep.subr.mxu1 %v4336_v0  ;;  %s4970_s11 = sld [smem:[#allocation18_spill]]  ;;  %s4685_s23 = sshll.u32 %s4987_s7, 3 }
  0xb1   : > { %3790 = vmatpush3.msra.mxu0 %v1314_v2  ;;  %v1394_v8 = vld [vmem:[%s4393_s14] sm:$0xff]  ;;  %s4971_s10 = sld [smem:[#allocation28_spill]]  ;;  %s4696_s22 = sshll.u32 %s4987_s7, 6 }
  0xb2   : > { %3792 = vmatmul.mubr.msk.f32.vlgmr.msra.gmra.mxu0 %vm1317_vm1, %v1287_v3  ;;  %3801 = vmatprep.subr.mxu0 %v4336_v0  ;;  %v1316_v9 = vld [vmem:[%s4388_s8] sm:$0x1]  ;;  %s4972_s7 = sld [smem:[#allocation23_spill]] }
  0xb3   : > { %3802 = vmatpush3.msra.mxu0 %v1471_v4  ;;  %3805 = vmatprep.mubr.msk.f32.mxu0 %vm4337_vm0, %v4336_v0  ;;  %v3627_v13 = vld [vmem:[%s4408_s30] ss:$0 sm:$0xff]  ;;  %v1640_v22 = vld [vmem:[%s4967_s18 + $0x18] sm:$0xff]  ;;  %v1639_v24 = vld [vmem:[%s4967_s18 + $0x10] sm:$0xff]  ;;  %s4973_s1 = sld [smem:[#allocation27_spill]] }
  0xb4   : > { %3803 = vmatprep.subr.mxu0 %v4336_v0  ;;  %3797 = vmatpush3.msra.mxu1 %v1394_v8  ;;  %v1555_v20 = vld [vmem:[%s4413_s6] sm:$0xff]  ;;  %v1638_v25 = vld [vmem:[%s4967_s18 + $0x8] sm:$0xff]  ;;  %s4974_s0 = sld [smem:[#allocation22_spill]] }
  0xb5   : > { %3804 = vmatpush3.msra.mxu0 %v1470_v5  ;;  %3808 = vmatprep.subr.mxu1 %v4336_v0  ;;  %v1642_v26 = vld [vmem:[%s4968_s26 + $0x8] sm:$0xff]  ;;  %v1637_v27 = vld [vmem:[%s4967_s18] sm:$0xff]  ;;  %s4692_s15 = scalar_lea.vmem %s4969_s2, %s4685_s23  ;;  %s4975_s2 = sld [smem:[#allocation26_spill]] }
  0xb6   : > { %3806 = vmatmul.mubr.msk.f32.vlgmr.msra.gmra.mxu0 %vm1317_vm1, %v1288_v6  ;;  %3815 = vmatprep.subr.mxu0 %v4336_v0  ;;  %v1286_v28 = vld [vmem:[%s4692_s15] sm:$0xff]  ;;  %s4704_s16 = scalar_lea.vmem %s4970_s11, %s4696_s22  ;;  %s4976_s11 = sld [smem:[#allocation29_spill]] }
  0xb7   : > { %3819 = vmatprep.mubr.msk.f32.mxu0 %vm4337_vm0, %v4336_v0  ;;  %3816 = vmatpush3.msra.mxu0 %v1642_v26  ;;  %v1641_v29 = vld [vmem:[%s4968_s26] sm:$0xff]  ;;  %v1967_v30 = vld [vmem:[%s4971_s10 + $0x8] sm:$0x3]  ;;  %v1291_v34 = vld [vmem:[%s4704_s16 + $0x10] sm:$0xff] }
  0xb8   : > { %3817 = vmatprep.subr.mxu0 %v4336_v0  ;;  %v1966_v31 = vld [vmem:[%s4971_s10] sm:$0xff]  ;;  %v1290_v33 = vld [vmem:[%s4704_s16 + $0x8] sm:$0xff]  ;;  %v1292_v35 = vld [vmem:[%s4704_s16 + $0x18] sm:$0xff] }
  0xb9   : > { %3818 = vmatpush3.msra.mxu0 %v1641_v29  ;;  %v1289_v32 = vld [vmem:[%s4704_s16] sm:$0xff]  ;;  %v1294_v37 = vld [vmem:[%s4704_s16 + $0x28] sm:$0xff]  ;;  %v1295_v50 = vld [vmem:[%s4704_s16 + $0x30] sm:$0xff] }
  0xba   : > { %3833 = vmatprep.subr.mxu0 %v4336_v0  ;;  %v1293_v36 = vld [vmem:[%s4704_s16 + $0x20] sm:$0xff]  ;;  %v1804_v43 = vld [vmem:[%s4973_s1 + $0x8] sm:$0xff]  ;;  %v1296_v51 = vld [vmem:[%s4704_s16 + $0x38] sm:$0xff] }
  0xbb   : > { %v3629_v40 = vld [vmem:[%s4972_s7] ss:$0 sm:$0xff]  ;;  %s4977_s7 = sld [smem:[#allocation31_spill]]  ;;  %v1802_v52 = vld [vmem:[%s4975_s2 + $0x8] sm:$0xff] }
  0xbc   : > { %v1396_v44 = vld [vmem:[%s4974_s0] sm:$0x1]  ;;  %s4978_s0 = sld [smem:[#allocation19_spill]] }
  0xbd   : > { %v1803_v46 = vld [vmem:[%s4973_s1] sm:$0xff]  ;;  %s4979_s1 = sld [smem:[#allocation30_spill]] }
  0xbe   : > { %v1801_v53 = vld [vmem:[%s4975_s2] sm:$0xff]  ;;  %s4984_s2 = sld [smem:[#allocation21_spill]] }
  0xbf   : > { %v2133_v54 = vld [vmem:[%s4976_s11] sm:$0x7]  ;;  %s4980_s11 = sld [smem:[#allocation33_spill]] }
  0xc0   : > { %v3633_v58 = vld [vmem:[#allocation2] ss:$0 sm:$0xff] }
  0xc1   : > { %v2302_v55 = vld [vmem:[%s4977_s7 + $0x8] sm:$0xff] }
  0xc2   : > { %s4744_s16 = scalar_lea.vmem %s4978_s0, %s4696_s22  ;;  %s4981_s0 = sld [smem:[#allocation32_spill]] }
  0xc3   : > { %v1297_v3 = vld [vmem:[%s4744_s16] sm:$0xff]  ;;  %v2300_v6 = vld [vmem:[%s4979_s1 + $0x8] sm:$0xff]  ;;  %v1299_v8 = vld [vmem:[%s4744_s16 + $0x10] sm:$0xff] }
  0xc4   : > { %v1298_v7 = vld [vmem:[%s4744_s16 + $0x8] sm:$0xff] }
 0x172   : > { %v1387_v10 = vpop.f32.mrf.mxu0 }
 0x173   : > { %v1388_v11 = vadd.f32 %v1387_v10, %v1316_v9  ;;  %v3637_v9 = vld [vmem:[#allocation6] ss:$0 sm:$0xff] }
 0x174   : > { %v3793_v12 = vpop.f32.mrf.mxu0 }
 0x175   : > { %vm1391_vm2 = vcmp.ge.f32.partialorder %v1388_v11, 0.0  ;;  %v1392_v14 = vmul.f32 0.01, %v1388_v11  ;;  %v1300_v12 = vld [vmem:[%s4744_s16 + $0x18] sm:$0xff] }
 0x176   : > { %v1548_v15 = vpop.f32.mrf.mxu0 }
 0x177   : > { %v1549_v17 = vadd.f32 %v3627_v13, %v1548_v15  ;;  %v1393_v18 = vsel %vm1391_vm2, %v1388_v11, %v1392_v14  ;;  %v2299_v11 = vld [vmem:[%s4979_s1] sm:$0xff] }
 0x178   : > { %3799 = vmatmul.mubr.msk.f32.vlgmr.msra.gmra.mxu1 %vm1317_vm1, %v1393_v18  ;;  %v3807_v19 = vpop.f32.mrf.mxu0  ;;  %v1301_v13 = vld [vmem:[%s4744_s16 + $0x20] sm:$0xff]  ;;  %v1303_v18 = vld [vmem:[%s4744_s16 + $0x30] sm:$0xff] }
 0x179   : > { %vm1552_vm3 = vcmp.ge.f32.partialorder %v1549_v17, 0.0  ;;  %v1553_v21 = vmul.f32 0.01, %v1549_v17  ;;  %3809 = vmatpush3.msra.mxu1 %v1556_v16  ;;  %3812 = vmatprep.mubr.msk.f32.mxu1 %vm4337_vm0, %v4336_v0  ;;  %v1302_v16 = vld [vmem:[%s4744_s16 + $0x28] sm:$0xff] }
 0x17a   : > { %3810 = vmatprep.subr.mxu1 %v4336_v0 }
 0x17b   : > { %v1554_v23 = vsel %vm1552_vm3, %v1549_v17, %v1553_v21  ;;  %3811 = vmatpush3.msra.mxu1 %v1555_v20 }
 0x17c   : > { %3813 = vmatmul.mubr.msk.f32.vlgmr.msra.gmra.mxu1 %vm1317_vm1, %v1554_v23  ;;  %3822 = vmatprep.subr.mxu1 %v4336_v0 }
 0x17d   : > { %3823 = vmatpush3.msra.mxu1 %v1640_v22  ;;  %3830 = vmatprep.mubr.msk.f32.mxu1 %vm4337_vm0, %v4336_v0  ;;  %v1304_v22 = vld [vmem:[%s4744_s16 + $0x38] sm:$0xff]  ;;  %s4982_s16 = sld [smem:[#allocation34_spill]] }
 0x17e   : > { %3824 = vmatprep.subr.mxu1 %v4336_v0 }
 0x17f   : > { %3825 = vmatpush3.msra.mxu1 %v1639_v24 }
 0x180   : > { %3826 = vmatprep.subr.mxu1 %v4336_v0 }
 0x181   : > { %3827 = vmatpush3.msra.mxu1 %v1638_v25 }
 0x182   : > { %3828 = vmatprep.subr.mxu1 %v4336_v0 }
 0x183   : > { %3829 = vmatpush3.msra.mxu1 %v1637_v27 }
 0x184   : > { %3831 = vmatmul.mubr.msk.f32.vlgmr.msra.gmra.mxu1 %vm1716_vm4, %v1286_v28  ;;  %3847 = vmatprep.subr.msk.mxu1 %vm2000_vm5, %v1967_v30 }
 0x185   : > { %3851 = vmatprep.mubr.msk.f32.mxu1 %vm1975_vm6, %v1289_v32  ;;  %3848 = vmatpush3.msk.msra.mxu1 %vm2000_vm5, %v1967_v30 }
 0x186   : > { %3849 = vmatprep.subr.mxu1 %v1966_v31 }
 0x187   : > { %3850 = vmatpush3.msra.mxu1 %v1966_v31 }
 0x188   : > { %3852 = vmatmul.mubr.msk.f32.vlgmr.msra.gmra.mxu1 %vm1975_vm6, %v1290_v33  ;;  %3877 = vmatprep.subr.mxu1 %v2302_v55 }
 0x189   : > { %3854 = vmatprep.mubr.msk.f32.mxu1 %vm1975_vm6, %v1291_v34  ;;  %3878 = vmatpush3.msra.mxu1 %v2302_v55 }
 0x18c   : > { %3855 = vmatmul.mubr.msk.f32.gmra.mxu1 %vm1975_vm6, %v1292_v35 }
 0x18d   : > { %3857 = vmatprep.mubr.msk.f32.mxu1 %vm1975_vm6, %v1293_v36 }
 0x190   : > { %3858 = vmatmul.mubr.msk.f32.gmra.mxu1 %vm1975_vm6, %v1294_v37 }
 0x191   : > { %3860 = vmatprep.mubr.msk.f32.mxu1 %vm1975_vm6, %v1295_v50 }
 0x194   : > { %3861 = vmatmul.mubr.msk.f32.gmra.mxu1 %vm1975_vm6, %v1296_v51 }
 0x238   : > { %v1466_v38 = vpop.f32.mrf.mxu1 }
 0x239   : > { %v1467_v47 = vadd.f32 %v1466_v38, %v1396_v44 }
 0x23a   : > { %v3800_v39 = vpop.f32.mrf.mxu1 }
 0x23c   : > { %v1633_v41 = vpop.f32.mrf.mxu1 }
 0x23d   : > { %v1634_v42 = vadd.f32 %v3629_v40, %v1633_v41 }
 0x23e   : > { %v3814_v45 = vpop.f32.mrf.mxu1 }
 0x23f   : > { %3820 = vmatmul.mubr.msk.f32.vlgmr.msra.gmra.mxu0 %vm1317_vm1, %v1634_v42  ;;  %v2637_v45 = vld [vmem:[%s4980_s11 + $0x8] sm:$0xff] }
 0x240   : > { %3834 = vmatpush3.msra.mxu0 %v1804_v43  ;;  %3837 = vmatprep.mubr.msk.f32.mxu0 %vm4337_vm0, %v4336_v0 }
 0x241   : > { %3835 = vmatprep.subr.mxu0 %v4336_v0 }
 0x242   : > { %3836 = vmatpush3.msra.mxu0 %v1803_v46  ;;  %v2636_v46 = vld [vmem:[%s4980_s11] sm:$0xff] }
 0x243   : > { %3838 = vmatmul.mubr.msk.f32.vlgmr.msra.gmra.mxu0 %vm1317_vm1, %v1467_v47  ;;  %3840 = vmatprep.subr.mxu0 %v4336_v0  ;;  %v2301_v47 = vld [vmem:[%s4977_s7] sm:$0xff] }
 0x244   : > { %3844 = vmatprep.mubr.msk.f32.mxu0 %vm4337_vm0, %v4336_v0  ;;  %v1786_v48 = vpop.f32.mrf.mxu1  ;;  %3841 = vmatpush3.msra.mxu0 %v1802_v52 }
 0x245   : > { %3842 = vmatprep.subr.mxu0 %v4336_v0  ;;  %3879 = vmatprep.subr.mxu1 %v2301_v47 }
 0x246   : > { %v3832_v49 = vpop.f32.mrf.mxu1  ;;  %3843 = vmatpush3.msra.mxu0 %v1801_v53  ;;  %3880 = vmatpush3.msra.mxu1 %v2301_v47  ;;  %v3636_v53 = vld [vmem:[#allocation4] ss:$0 sm:$0xff] }
 0x247   : > { %3863 = vmatprep.subr.msk.mxu0 %vm2166_vm7, %v2133_v54  ;;  %3909 = vmatprep.subr.mxu1 %v4336_v0 }
 0x248   : > { %v3853_v56 = vpop.f32.mrf.mxu1 }
 0x249   : > { %v2076_v17 = vadd.f32 %v3853_v56, %v3637_v9  ;;  %v3647_v56 = vld [vmem:[#allocation7] ss:$0 sm:$0xff] }
 0x24a   : > { %v2070_v62 = vpop.f32.mrf.mxu1 }
 0x24b   : > { %v2071_v14 = vadd.f32 %v3637_v9, %v2070_v62  ;;  %v2118_v23 = vmul.f32 0.01, %v2076_v17  ;;  %vm2110_vm11 = vcmp.ge.f32.partialorder %v2076_v17, 0.0 }
 0x24c   : > { %v3856_v5 = vpop.f32.mrf.mxu1 }
 0x24d   : > { %v2117_v19 = vmul.f32 0.01, %v2071_v14  ;;  %vm2109_vm10 = vcmp.ge.f32.partialorder %v2071_v14, 0.0  ;;  %v2086_v24 = vadd.f32 %v3856_v5, %v3637_v9  ;;  %v2126_v28 = vsel %vm2110_vm11, %v2076_v17, %v2118_v23 }
 0x24e   : > { %v2080_v10 = vpop.f32.mrf.mxu1 }
 0x24f   : > { %v2081_v20 = vadd.f32 %v3637_v9, %v2080_v10  ;;  %v2125_v26 = vsel %vm2109_vm10, %v2071_v14, %v2117_v19  ;;  %v2120_v29 = vmul.f32 0.01, %v2086_v24  ;;  %vm2112_vm13 = vcmp.ge.f32.partialorder %v2086_v24, 0.0  ;;  %v2561_v14 = vld [vmem:[%s4981_s0] sm:$0xff] }
 0x250   : > { %v3859_v15 = vpop.f32.mrf.mxu1 }
 0x251   : > { %v2119_v25 = vmul.f32 0.01, %v2081_v20  ;;  %vm2111_vm12 = vcmp.ge.f32.partialorder %v2081_v20, 0.0  ;;  %v2128_v32 = vsel %vm2112_vm13, %v2086_v24, %v2120_v29  ;;  %v2096_v34 = vadd.f32 %v3859_v15, %v3637_v9 }
 0x252   : > { %v2090_v21 = vpop.f32.mrf.mxu1 }
 0x253   : > { %v2091_v27 = vadd.f32 %v3637_v9, %v2090_v21  ;;  %v2127_v31 = vsel %vm2111_vm12, %v2081_v20, %v2119_v25  ;;  %v2122_v35 = vmul.f32 0.01, %v2096_v34  ;;  %vm2114_vm15 = vcmp.ge.f32.partialorder %v2096_v34, 0.0 }
 0x254   : > { %v3862_v36 = vpop.f32.mrf.mxu1 }
 0x255   : > { %v2121_v30 = vmul.f32 0.01, %v2091_v27  ;;  %vm2113_vm14 = vcmp.ge.f32.partialorder %v2091_v27, 0.0  ;;  %v2106_v37 = vadd.f32 %v3862_v36, %v3637_v9  ;;  %v2130_v41 = vsel %vm2114_vm15, %v2096_v34, %v2122_v35  ;;  %v2853_v34 = vld [vmem:[%s4982_s16] sm:$0xff] }
 0x256   : > { %v2100_v38 = vpop.f32.mrf.mxu1  ;;  %v4338_v35 = vmov 0  }
 0x257   : > { %v2129_v33 = vsel %vm2113_vm14, %v2091_v27, %v2121_v30  ;;  %v2101_v39 = vadd.f32 %v3637_v9, %v2100_v38  ;;  %v2124_v40 = vmul.f32 0.01, %v2106_v37  ;;  %vm2116_vm2 = vcmp.ge.f32.partialorder %v2106_v37, 0.0  ;;  %4084 = vset.pattern.permute.xlu0 %v4338_v35  ;;  %4085 = vset.pattern.permute.xlu1 %v4338_v35  ;;  %v3675_v35 = vld [vmem:[#allocation9] ss:$0 sm:$0xff] }
 0x259   : > { %vm2115_vm3 = vcmp.ge.f32.partialorder %v2101_v39, 0.0  ;;  %v2123_v42 = vmul.f32 0.01, %v2101_v39  ;;  %v2132_v44 = vsel %vm2116_vm2, %v2106_v37, %v2124_v40 }
 0x25b   : > { %v2131_v43 = vsel %vm2115_vm3, %v2101_v39, %v2123_v42 }
 0x2ff   : > { %v1712_v57 = vpop.f32.mrf.mxu0 }
 0x300   : > { %v1787_v59 = vadd.f32 %v1786_v48, %v1712_v57  ;;  %v1878_v48 = vlaneseq }
 0x301   : > { %v3821_v60 = vpop.f32.mrf.mxu0 }
 0x302   : > { %v1797_v61 = vadd.f32 %v3633_v58, %v1787_v59  ;;  %v4785_v49 = vshrl.u32 %v1878_v48, 7 }
 0x303   : > { %v4746_v63 = vpop.f32.mrf.mxu0 }
 0x304   : > { %vm1798_vm8 = vcmp.ge.f32.partialorder %v1797_v61, 0.0  ;;  %v1799_v1 = vmul.f32 0.01, %v1797_v61  ;;  %v4788_v50 = vsub.s32 0, %v4785_v49 }
 0x305   : > { %v3839_v2 = vpop.f32.mrf.mxu0 }
 0x306   : > { %v1800_v4 = vsel %vm1798_vm8, %v1797_v61, %v1799_v1  ;;  %v1881_v51 = vrot.slane %v4746_v63, %v4788_v50 }
 0x307   : > { %3845 = vmatmul.mubr.msk.f32.vlgmr.msra.gmra.mxu0 %vm1317_vm1, %v1800_v4 }
 0x308   : > { %3864 = vmatpush3.msk.msra.mxu0 %vm2166_vm7, %v2133_v54  ;;  %3865 = vmatprep.mubr.msk.f32.mxu0 %vm2141_vm9, %v1297_v3 }
 0x309   : > { %3893 = vmatprep.subr.mxu0 %v2300_v6 }
 0x30b   : > { %3866 = vmatmul.mubr.msk.f32.vlgmr.msra.gmra.mxu0 %vm2141_vm9, %v1298_v7 }
 0x30c   : > { %3868 = vmatprep.mubr.msk.f32.mxu0 %vm2141_vm9, %v1299_v8  ;;  %3894 = vmatpush3.msra.mxu0 %v2300_v6  ;;  %v2562_v8 = vld [vmem:[%s4981_s0 + $0x8] sm:$0xff]  ;;  %s4983_s0 = sld [smem:[#allocation20_spill]] }
 0x30d   : > { %3895 = vmatprep.subr.mxu0 %v2299_v11 }
 0x30e   : > { %3896 = vmatpush3.msra.mxu0 %v2299_v11 }
 0x30f   : > { %3869 = vmatmul.mubr.msk.f32.gmra.mxu0 %vm2141_vm9, %v1300_v12  ;;  %3916 = vmatprep.subr.mxu0 %v4336_v0 }
 0x310   : > { %3871 = vmatprep.mubr.msk.f32.mxu0 %vm2141_vm9, %v1301_v13 }
 0x312   : > { %s1272_s1 = scalar_lea.vmem %s4983_s0, %s4696_s22  ;;  %s1276_s0 = scalar_lea.vmem %s4984_s2, %s4685_s23 }
 0x313   : > { %3872 = vmatmul.mubr.msk.f32.gmra.mxu0 %vm2141_vm9, %v1302_v16  ;;  %v1306_v36 = vld [vmem:[%s1272_s1 + $0x8] sm:$0xff]  ;;  %v1305_v37 = vld [vmem:[%s1272_s1] sm:$0xff]  ;;  %v1307_v38 = vld [vmem:[%s1272_s1 + $0x10] sm:$0xff]  ;;  %s1280_s2 = scalar_lea.vmem %s4523_s20, %s4685_s23 }
 0x314   : > { %3874 = vmatprep.mubr.msk.f32.mxu0 %vm2141_vm9, %v1303_v18  ;;  %3032 = vperm.xlu0 %4084, %v1306_v36   ;;  %v1308_v39 = vld [vmem:[%s1272_s1 + $0x18] sm:$0xff]  ;;  %v1309_v40 = vld [vmem:[%s1272_s1 + $0x20] sm:$0xff]  ;;  %v1311_v42 = vld [vmem:[%s1272_s1 + $0x30] sm:$0xff] }
 0x315   : > { %3027 = vperm.xlu1 %4085, %v1305_v37  }
 0x317   : > { %3875 = vmatmul.mubr.msk.f32.gmra.mxu0 %vm2141_vm9, %v1304_v22 }
 0x318   : > { %3897 = vmatprep.mubr.msk.f32.mxu0 %vm1317_vm1, %v2125_v26  ;;  %3037 = vperm.xlu0 %4084, %v1307_v38  }
 0x319   : > { %3042 = vperm.xlu1 %4085, %v1308_v39  }
 0x31b   : > { %3898 = vmatmul.mubr.msk.f32.vlgmr.msra.gmra.mxu0 %vm1317_vm1, %v2126_v28 }
 0x31c   : > { %3900 = vmatprep.mubr.msk.f32.mxu0 %vm1317_vm1, %v2127_v31  ;;  %3917 = vmatpush3.msra.mxu0 %v2637_v45  ;;  %v2856_v31 = vld [vmem:[%s4982_s16 + $0x18] sm:$0xff] }
 0x31d   : > { %3918 = vmatprep.subr.mxu0 %v4336_v0  ;;  %3047 = vperm.xlu0 %4084, %v1309_v40  }
 0x31e   : > { %3919 = vmatpush3.msra.mxu0 %v2636_v46 }
 0x31f   : > { %3901 = vmatmul.mubr.msk.f32.gmra.mxu0 %vm1317_vm1, %v2128_v32  ;;  %3943 = vmatprep.subr.mxu0 %v4336_v0  ;;  %v2855_v32 = vld [vmem:[%s4982_s16 + $0x10] sm:$0xff] }
 0x320   : > { %3903 = vmatprep.mubr.msk.f32.mxu0 %vm1317_vm1, %v2129_v33  ;;  %v2854_v33 = vld [vmem:[%s4982_s16 + $0x8] sm:$0xff] }
 0x321   : > { %3057 = vperm.xlu0 %4084, %v1311_v42  }
 0x323   : > { %3904 = vmatmul.mubr.msk.f32.gmra.mxu0 %vm1317_vm1, %v2130_v41  ;;  %v1310_v41 = vld [vmem:[%s1272_s1 + $0x28] sm:$0xff] }
 0x324   : > { %3906 = vmatprep.mubr.msk.f32.mxu0 %vm1317_vm1, %v2131_v43  ;;  %3052 = vperm.xlu1 %4085, %v1310_v41   ;;  %v1312_v43 = vld [vmem:[%s1272_s1 + $0x38] sm:$0xff]  ;;  %s4857_s1 = scalar_lea.vmem %s4528_s5, %s4696_s22  ;;  %s4985_s22 = sld [smem:[#allocation35_spill]] }
 0x327   : > { %3907 = vmatmul.mubr.msk.f32.gmra.mxu0 %vm1317_vm1, %v2132_v44  ;;  %v1313_v44 = vld [vmem:[%s1276_s0] sm:$0xff] }
 0x328   : > { %3920 = vmatprep.mubr.msk.f32.mxu0 %vm4337_vm0, %v4336_v0  ;;  %3062 = vperm.xlu1 %4085, %v1312_v43  }
 0x329   : > { %3131 = vperm.xlu0 %4084, %v1313_v44  }
 0x3c7   : > { %v1951_v52 = vpop.f32.mrf.mxu0 }
 0x3c8   : > { %v1952_v54 = vadd.f32 %v1951_v52, %v1881_v51 }
 0x3c9   : > { %v3846_v55 = vpop.f32.mrf.mxu0 }
 0x3ca   : > { %v1962_v57 = vadd.f32 %v3636_v53, %v1952_v54 }
 0x3cb   : > { %v3867_v58 = vpop.f32.mrf.mxu0 }
 0x3cc   : > { %vm1963_vm5 = vcmp.ge.f32.partialorder %v1962_v57, 0.0  ;;  %v1964_v59 = vmul.f32 0.01, %v1962_v57  ;;  %v2242_v60 = vadd.f32 %v3867_v58, %v3647_v56 }
 0x3cd   : > { %v2236_v61 = vpop.f32.mrf.mxu0 }
 0x3ce   : > { %v1965_v62 = vsel %vm1963_vm5, %v1962_v57, %v1964_v59  ;;  %v2237_v1 = vadd.f32 %v3647_v56, %v2236_v61  ;;  %v2284_v2 = vmul.f32 0.01, %v2242_v60  ;;  %vm2276_vm6 = vcmp.ge.f32.partialorder %v2242_v60, 0.0 }
 0x3cf   : > { %v3870_v3 = vpop.f32.mrf.mxu0  ;;  %3921 = vmatmul.mubr.msk.f32.vlgmr.msra.gmra.mxu0 %vm1317_vm1, %v1965_v62 }
 0x3d0   : > { %vm2275_vm7 = vcmp.ge.f32.partialorder %v2237_v1, 0.0  ;;  %v2283_v63 = vmul.f32 0.01, %v2237_v1  ;;  %v2252_v4 = vadd.f32 %v3870_v3, %v3647_v56  ;;  %3951 = vmatprep.mubr.msk.f32.mxu0 %vm4337_vm0, %v4336_v0  ;;  %v2292_v9 = vsel %vm2276_vm6, %v2242_v60, %v2284_v2 }
 0x3d1   : > { %v2246_v5 = vpop.f32.mrf.mxu0  ;;  %v4339_v60 = vmov 1966171168  }
 0x3d2   : > { %v2247_v6 = vadd.f32 %v3647_v56, %v2246_v5  ;;  %v2291_v7 = vsel %vm2275_vm7, %v2237_v1, %v2283_v63  ;;  %v2286_v10 = vmul.f32 0.01, %v2252_v4  ;;  %vm2278_vm8 = vcmp.ge.f32.partialorder %v2252_v4, 0.0 }
 0x3d3   : > { %v3873_v11 = vpop.f32.mrf.mxu0  ;;  %3881 = vmatprep.mubr.msk.f32.mxu1 %vm1317_vm1, %v2291_v7  ;;  %v2711_v61 = vunpack.c.l.s4 %v4339_v60 }
 0x3d4   : > { %vm2277_vm9 = vcmp.ge.f32.partialorder %v2247_v6, 0.0  ;;  %v2285_v12 = vmul.f32 0.01, %v2247_v6  ;;  %v2262_v13 = vadd.f32 %v3873_v11, %v3647_v56  ;;  %3882 = vmatmul.mubr.msk.f32.vlgmr.msra.gmra.mxu1 %vm1317_vm1, %v2292_v9  ;;  %v2294_v20 = vsel %vm2278_vm8, %v2252_v4, %v2286_v10 }
 0x3d5   : > { %v2256_v15 = vpop.f32.mrf.mxu0  ;;  %3910 = vmatpush3.msra.mxu1 %v2562_v8  ;;  %v2712_v2 = vunpack.c.0.s8 %v2711_v61 }
 0x3d6   : > { %v2257_v16 = vadd.f32 %v3647_v56, %v2256_v15  ;;  %v2293_v17 = vsel %vm2277_vm9, %v2247_v6, %v2285_v12  ;;  %3911 = vmatprep.subr.mxu1 %v4336_v0  ;;  %v2288_v18 = vmul.f32 0.01, %v2262_v13  ;;  %vm2280_vm10 = vcmp.ge.f32.partialorder %v2262_v13, 0.0 }
 0x3d7   : > { %v3876_v19 = vpop.f32.mrf.mxu0  ;;  %3884 = vmatprep.mubr.msk.f32.mxu1 %vm1317_vm1, %v2293_v17  ;;  %3912 = vmatpush3.msra.mxu1 %v2561_v14  ;;  %v2715_v4 = vsub.s32 %v2712_v2, %v4785_v49 }
 0x3d8   : > { %vm2279_vm11 = vcmp.ge.f32.partialorder %v2257_v16, 0.0  ;;  %v2287_v21 = vmul.f32 0.01, %v2257_v16  ;;  %v2272_v22 = vadd.f32 %v3876_v19, %v3647_v56  ;;  %3885 = vmatmul.mubr.msk.f32.gmra.mxu1 %vm1317_vm1, %v2294_v20  ;;  %v2296_v27 = vsel %vm2280_vm10, %v2262_v13, %v2288_v18  ;;  %3923 = vmatprep.subr.mxu1 %v2856_v31 }
 0x3d9   : > { %v2266_v23 = vpop.f32.mrf.mxu0 }
 0x3da   : > { %v2267_v24 = vadd.f32 %v3647_v56, %v2266_v23  ;;  %v2295_v25 = vsel %vm2279_vm11, %v2257_v16, %v2287_v21  ;;  %v2290_v26 = vmul.f32 0.01, %v2272_v22  ;;  %vm2282_vm12 = vcmp.ge.f32.partialorder %v2272_v22, 0.0 }
 0x3db   : > { %3887 = vmatprep.mubr.msk.f32.mxu1 %vm1317_vm1, %v2295_v25  ;;  %v3899_v45 = vpop.f32.mrf.mxu0 }
 0x3dc   : > { %vm2281_vm13 = vcmp.ge.f32.partialorder %v2267_v24, 0.0  ;;  %v2289_v28 = vmul.f32 0.01, %v2267_v24  ;;  %3888 = vmatmul.mubr.msk.f32.gmra.mxu1 %vm1317_vm1, %v2296_v27  ;;  %v2298_v30 = vsel %vm2282_vm12, %v2272_v22, %v2290_v26 }
 0x3dd   : > { %v2522_v46 = vpop.f32.mrf.mxu0 }
 0x3de   : > { %v2297_v29 = vsel %vm2281_vm13, %v2267_v24, %v2289_v28 }
 0x3df   : > { %3890 = vmatprep.mubr.msk.f32.mxu1 %vm1317_vm1, %v2297_v29  ;;  %v3902_v47 = vpop.f32.mrf.mxu0 }
 0x3e0   : > { %3891 = vmatmul.mubr.msk.f32.gmra.mxu1 %vm1317_vm1, %v2298_v30 }
 0x3e1   : > { %3913 = vmatprep.mubr.msk.f32.mxu1 %vm4337_vm0, %v4336_v0  ;;  %v2532_v48 = vpop.f32.mrf.mxu0 }
 0x3e3   : > { %v3905_v51 = vpop.f32.mrf.mxu0 }
 0x3e4   : > { %3914 = vmatmul.mubr.msk.f32.vlgmr.msra.gmra.mxu1 %vm1317_vm1, %v1965_v62 }
 0x3e5   : > { %3924 = vmatpush3.msra.mxu1 %v2856_v31  ;;  %v2542_v52 = vpop.f32.mrf.mxu0 }
 0x3e6   : > { %3925 = vmatprep.subr.mxu1 %v2855_v32 }
 0x3e7   : > { %3926 = vmatpush3.msra.mxu1 %v2855_v32  ;;  %v3908_v53 = vpop.f32.mrf.mxu0 }
 0x3e8   : > { %3927 = vmatprep.subr.mxu1 %v2854_v33 }
 0x3e9   : > { %3928 = vmatpush3.msra.mxu1 %v2854_v33  ;;  %v2552_v54 = vpop.f32.mrf.mxu0 }
 0x3ea   : > { %3929 = vmatprep.subr.mxu1 %v2853_v34 }
 0x3eb   : > { %3930 = vmatpush3.msra.mxu1 %v2853_v34 }
 0x48f   : > { %v4817_v55 = vpop.f32.mrf.mxu0 }
 0x491   : > { %v3922_v56 = vpop.f32.mrf.mxu0 }
 0x494   : > { %v3883_v57 = vpop.f32.mrf.mxu1 }
 0x495   : > { %v2528_v13 = vadd.f32 %v3899_v45, %v3883_v57 }
 0x496   : > { %v2393_v58 = vpop.f32.mrf.mxu1 }
 0x497   : > { %v2523_v14 = vadd.f32 %v2522_v46, %v2393_v58 }
 0x498   : > { %v3886_v59 = vpop.f32.mrf.mxu1 }
 0x499   : > { %v2538_v15 = vadd.f32 %v3902_v47, %v3886_v59 }
 0x49a   : > { %v2403_v62 = vpop.f32.mrf.mxu1 }
 0x49b   : > { %v2533_v20 = vadd.f32 %v2532_v48, %v2403_v62 }
 0x49c   : > { %v3889_v1 = vpop.f32.mrf.mxu1 }
 0x49d   : > { %v2548_v21 = vadd.f32 %v3905_v51, %v3889_v1 }
 0x49e   : > { %v2413_v3 = vpop.f32.mrf.mxu1 }
 0x49f   : > { %v2543_v22 = vadd.f32 %v2542_v52, %v2413_v3 }
 0x4a0   : > { %v3892_v63 = vpop.f32.mrf.mxu1 }
 0x4a1   : > { %v2558_v48 = vadd.f32 %v3908_v53, %v3892_v63 }
 0x4a2   : > { %v2423_v5 = vpop.f32.mrf.mxu1 }
 0x4a3   : > { %v2553_v27 = vadd.f32 %v2552_v54, %v2423_v5 }
 0x4a4   : > { %v2632_v6 = vpop.f32.mrf.mxu1 }
 0x4a5   : > { %v2709_v7 = vcombine.high %v2632_v6, %v2632_v6  ;;  %v2716_v8 = vrot.slane %v2632_v6, %v2715_v4 }
 0x4a6   : > { %v3915_v9 = vpop.f32.mrf.mxu1 }
 0x4a7   : > { %v2723_v10 = vrot.slane %v2709_v7, %v2715_v4  ;;  %v2724_v11 = vcombine.high %v2716_v8, %v2716_v8  ;;  %v2732_v12 = vrot.slane %v2716_v8, %v2715_v4 }
 0x4a9   : > { %v2725_v16 = vcombine.high %v2723_v10, %v2723_v10  ;;  %v2739_v17 = vrot.slane %v2723_v10, %v2715_v4  ;;  %v2746_v18 = vrot.slane %v2724_v11, %v2715_v4  ;;  %v2754_v19 = vcombine.high %v2732_v12, %v2732_v12 }
 0x4aa   : > { %v2761_v49 = vrot.slane %v2732_v12, %v4788_v50 }
 0x4ab   : > { %v2753_v23 = vrot.slane %v2725_v16, %v2715_v4  ;;  %v2755_v24 = vcombine.high %v2739_v17, %v2739_v17  ;;  %v2756_v25 = vcombine.high %v2746_v18, %v2746_v18  ;;  %v2765_v26 = vrot.slane %v2746_v18, %v4788_v50  ;;  %v3162_v16 = vld [vmem:[%s4513_s27 + $0x10] sm:$0xff]  ;;  %v3160_v18 = vld [vmem:[%s4513_s27] sm:$0xff] }
 0x4ac   : > { %v2769_v28 = vrot.slane %v2754_v19, %v4788_v50  ;;  %v2777_v29 = vrot.slane %v2739_v17, %v4788_v50  ;;  %v2798_v30 = vadd.f32 %v2761_v49, %v2523_v14  ;;  %v3161_v17 = vld [vmem:[%s4513_s27 + $0x8] sm:$0xff]  ;;  %v3033_v19 = vpop.permute.xlu0 %3032 }
 0x4ad   : > { %v2757_v31 = vcombine.high %v2753_v23, %v2753_v23  ;;  %v2773_v32 = vrot.slane %v2756_v25, %v4788_v50  ;;  %v2781_v33 = vrot.slane %v2753_v23, %v4788_v50  ;;  %v2785_v34 = vrot.slane %v2755_v24, %v4788_v50 }
 0x4ae   : > { %v2799_v36 = vadd.f32 %v2765_v26, %v2528_v13  ;;  %v2800_v37 = vadd.f32 %v2769_v28, %v2533_v20  ;;  %v2802_v38 = vadd.f32 %v2777_v29, %v2543_v22  ;;  %v2806_v39 = vadd.f32 %v2798_v30, %v4817_v55  ;;  %v4852_v20 = vld [vmem:[#allocation10] ss:$0 sm:$0xff]  ;;  %v3028_v22 = vpop.permute.xlu1 %3027 }
 0x4af   : > { %v2789_v40 = vrot.slane %v2757_v31, %v4788_v50  ;;  %v2801_v41 = vadd.f32 %v2773_v32, %v2538_v15  ;;  %v2803_v42 = vadd.f32 %v2781_v33, %v2548_v21  ;;  %v2804_v43 = vadd.f32 %v2785_v34, %v2553_v27  ;;  %v3163_v15 = vld [vmem:[%s4513_s27 + $0x18] sm:$0xff] }
 0x4b0   : > { %v2807_v44 = vadd.f32 %v2799_v36, %v4817_v55  ;;  %v2821_v45 = vadd.f32 %v3675_v35, %v2806_v39  ;;  %v2808_v46 = vadd.f32 %v2800_v37, %v4817_v55  ;;  %v2810_v47 = vadd.f32 %v2802_v38, %v4817_v55  ;;  %3944 = vmatpush3.msra.mxu0 %v3163_v15  ;;  %v3038_v26 = vpop.permute.xlu0 %3037 }
 0x4b1   : > { %v2809_v51 = vadd.f32 %v2801_v41, %v4817_v55  ;;  %v2811_v52 = vadd.f32 %v2803_v42, %v4817_v55  ;;  %v2812_v59 = vadd.f32 %v2804_v43, %v4817_v55  ;;  %v2805_v60 = vadd.f32 %v2789_v40, %v2558_v48  ;;  %3945 = vmatprep.subr.mxu0 %v4336_v0 }
 0x4b2   : > { %vm2829_vm1 = vcmp.ge.f32.partialorder %v2821_v45, 0.0  ;;  %v2837_v54 = vmul.f32 0.01, %v2821_v45  ;;  %v2822_v56 = vadd.f32 %v3675_v35, %v2807_v44  ;;  %v2823_v57 = vadd.f32 %v3675_v35, %v2808_v46  ;;  %3946 = vmatpush3.msra.mxu0 %v3162_v16  ;;  %v3043_v33 = vpop.permute.xlu1 %3042 }
 0x4b3   : > { %v2824_v50 = vadd.f32 %v3675_v35, %v2809_v51  ;;  %v2825_v58 = vadd.f32 %v3675_v35, %v2810_v47  ;;  %v2826_v3 = vadd.f32 %v3675_v35, %v2811_v52  ;;  %v2827_v5 = vadd.f32 %v3675_v35, %v2812_v59  ;;  %3947 = vmatprep.subr.mxu0 %v4336_v0 }
 0x4b4   : > { %v2845_v61 = vsel %vm2829_vm1, %v2821_v45, %v2837_v54  ;;  %vm2830_vm14 = vcmp.ge.f32.partialorder %v2822_v56, 0.0  ;;  %v2838_v62 = vmul.f32 0.01, %v2822_v56  ;;  %vm2831_vm15 = vcmp.ge.f32.partialorder %v2823_v57, 0.0  ;;  %3948 = vmatpush3.msra.mxu0 %v3161_v17  ;;  %v3048_v43 = vpop.permute.xlu0 %3047 }
 0x4b5   : > { %3931 = vmatprep.mubr.msk.f32.mxu1 %vm1716_vm4, %v2845_v61  ;;  %v2839_v53 = vmul.f32 0.01, %v2823_v57  ;;  %v2840_v2 = vmul.f32 0.01, %v2824_v50  ;;  %vm2832_vm2 = vcmp.ge.f32.partialorder %v2824_v50, 0.0  ;;  %vm2833_vm3 = vcmp.ge.f32.partialorder %v2825_v58, 0.0  ;;  %3949 = vmatprep.subr.mxu0 %v4336_v0 }
 0x4b6   : > { %v2846_v1 = vsel %vm2830_vm14, %v2822_v56, %v2838_v62  ;;  %v2841_v4 = vmul.f32 0.01, %v2825_v58  ;;  %v2813_v6 = vadd.f32 %v2805_v60, %v4817_v55  ;;  %v2842_v8 = vmul.f32 0.01, %v2826_v3  ;;  %3950 = vmatpush3.msra.mxu0 %v3160_v18  ;;  %v3053_v62 = vpop.permute.xlu1 %3052 }
 0x4b7   : > { %3932 = vmatmul.mubr.msk.f32.vlgmr.msra.gmra.mxu1 %vm1716_vm4, %v2846_v1  ;;  %v2847_v63 = vsel %vm2831_vm15, %v2823_v57, %v2839_v53  ;;  %v2848_v7 = vsel %vm2832_vm2, %v2824_v50, %v2840_v2  ;;  %vm2834_vm5 = vcmp.ge.f32.partialorder %v2826_v3, 0.0  ;;  %v2843_v11 = vmul.f32 0.01, %v2827_v5  ;;  %3954 = vmatprep.subr.mxu0 %v4336_v0 }
 0x4b8   : > { %3934 = vmatprep.mubr.msk.f32.mxu1 %vm1716_vm4, %v2847_v63  ;;  %v2828_v9 = vadd.f32 %v3675_v35, %v2813_v6  ;;  %v2849_v10 = vsel %vm2833_vm3, %v2825_v58, %v2841_v4  ;;  %vm2835_vm6 = vcmp.ge.f32.partialorder %v2827_v5, 0.0  ;;  %v2850_v12 = vsel %vm2834_vm5, %v2826_v3, %v2842_v8  ;;  %v3058_v8 = vpop.permute.xlu0 %3057 }
 0x4b9   : > { %v2851_v55 = vsel %vm2835_vm6, %v2827_v5, %v2843_v11  ;;  %vm3173_vm15 = vcmask 1041409   ;;  %vm3176_vm2 = vcmask 1042434   ;;  %vm3179_vm3 = vcmask 1043459  }
 0x4ba   : > { %v2844_v13 = vmul.f32 0.01, %v2828_v9  ;;  %vm2836_vm7 = vcmp.ge.f32.partialorder %v2828_v9, 0.0  ;;  %vm3182_vm5 = vcmask 1044484   ;;  %vm3185_vm6 = vcmask 1045509  }
 0x4bb   : > { %3935 = vmatmul.mubr.msk.f32.gmra.mxu1 %vm1716_vm4, %v2848_v7 }
 0x4bc   : > { %3937 = vmatprep.mubr.msk.f32.mxu1 %vm1716_vm4, %v2849_v10  ;;  %v2852_v14 = vsel %vm2836_vm7, %v2828_v9, %v2844_v13  ;;  %vm3188_vm7 = vcmask 1046534  }
 0x4bf   : > { %3938 = vmatmul.mubr.msk.f32.gmra.mxu1 %vm1716_vm4, %v2850_v12 }
 0x4c0   : > { %3940 = vmatprep.mubr.msk.f32.mxu1 %vm1716_vm4, %v2851_v55 }
 0x4c3   : > { %3941 = vmatmul.mubr.msk.f32.gmra.mxu1 %vm1716_vm4, %v2852_v14 }
 0x577   : > { %v3933_v21 = vpop.f32.mrf.mxu1 }
 0x578   : > { %v2960_v49 = vadd.f32 %v3933_v21, %v4852_v20  ;;  %v3063_v21 = vpop.permute.xlu1 %3062 }
 0x579   : > { %v2954_v23 = vpop.f32.mrf.mxu1 }
 0x57a   : > { %vm2994_vm8 = vcmp.ge.f32.partialorder %v2960_v49, 0.0  ;;  %v3002_v24 = vmul.f32 0.01, %v2960_v49  ;;  %v2955_v25 = vadd.f32 %v4852_v20, %v2954_v23 }
 0x57b   : > { %v3936_v27 = vpop.f32.mrf.mxu1 }
 0x57c   : > { %v3010_v28 = vsel %vm2994_vm8, %v2960_v49, %v3002_v24  ;;  %vm2993_vm9 = vcmp.ge.f32.partialorder %v2955_v25, 0.0  ;;  %v3001_v29 = vmul.f32 0.01, %v2955_v25  ;;  %v2970_v30 = vadd.f32 %v3936_v27, %v4852_v20 }
 0x57d   : > { %3018 = vst.msk [vmem:[%s4857_s1 + $0x8] sm:$0xff] %vm1716_vm4, %v3010_v28  ;;  %v3066_v31 = vmul.f32 %v3033_v19, %v3010_v28  ;;  %v2964_v32 = vpop.f32.mrf.mxu1  ;;  %vm3191_vm8 = vcmask 1047559  }
 0x57e   : > { %v3009_v34 = vsel %vm2993_vm9, %v2955_v25, %v3001_v29  ;;  %vm2996_vm10 = vcmp.ge.f32.partialorder %v2970_v30, 0.0  ;;  %v3004_v35 = vmul.f32 0.01, %v2970_v30  ;;  %v2965_v36 = vadd.f32 %v4852_v20, %v2964_v32 }
 0x57f   : > { %v3080_v37 = vsel %vm1716_vm4, %v3066_v31, 0.0  ;;  %3017 = vst.msk [vmem:[%s4857_s1] sm:$0xff] %vm1716_vm4, %v3009_v34  ;;  %v3065_v38 = vmul.f32 %v3028_v22, %v3009_v34  ;;  %v3939_v39 = vpop.f32.mrf.mxu1 }
 0x580   : > { %v3081_v40 = vrot.slane %v3080_v37, 4  ;;  %v3012_v41 = vsel %vm2996_vm10, %v2970_v30, %v3004_v35  ;;  %vm2995_vm11 = vcmp.ge.f32.partialorder %v2965_v36, 0.0  ;;  %v3003_v42 = vmul.f32 0.01, %v2965_v36 }
 0x581   : > { %v3073_v44 = vsel %vm1716_vm4, %v3065_v38, 0.0  ;;  %3020 = vst.msk [vmem:[%s4857_s1 + $0x18] sm:$0xff] %vm1716_vm4, %v3012_v41  ;;  %v3068_v45 = vmul.f32 %v3043_v33, %v3012_v41  ;;  %v2980_v46 = vadd.f32 %v3939_v39, %v4852_v20  ;;  %v2974_v47 = vpop.f32.mrf.mxu1 }
 0x582   : > { %v3082_v48 = vadd.f32 %v3081_v40, %v3080_v37  ;;  %v3074_v51 = vrot.slane %v3073_v44, 4  ;;  %v3011_v52 = vsel %vm2995_vm11, %v2965_v36, %v3003_v42  ;;  %v2975_v54 = vadd.f32 %v4852_v20, %v2974_v47 }
 0x583   : > { %v3094_v56 = vsel %vm1716_vm4, %v3068_v45, 0.0  ;;  %3019 = vst.msk [vmem:[%s4857_s1 + $0x10] sm:$0xff] %vm1716_vm4, %v3011_v52  ;;  %v3067_v57 = vmul.f32 %v3038_v26, %v3011_v52  ;;  %vm2998_vm12 = vcmp.ge.f32.partialorder %v2980_v46, 0.0  ;;  %v3006_v50 = vmul.f32 0.01, %v2980_v46  ;;  %v3942_v58 = vpop.f32.mrf.mxu1  ;;  %v4886_v26 = vpop.permute.xlu0 %3131 }
 0x584   : > { %v3083_v59 = vrot.slane %v3082_v48, 2  ;;  %v3075_v60 = vadd.f32 %v3074_v51, %v3073_v44  ;;  %v3095_v61 = vrot.slane %v3094_v56, 4  ;;  %vm2997_vm13 = vcmp.ge.f32.partialorder %v2975_v54, 0.0 }
 0x585   : > { %v3087_v53 = vsel %vm1716_vm4, %v3067_v57, 0.0  ;;  %v3014_v1 = vsel %vm2998_vm12, %v2980_v46, %v3006_v50  ;;  %v3005_v2 = vmul.f32 0.01, %v2975_v54  ;;  %v2990_v3 = vadd.f32 %v3942_v58, %v4852_v20  ;;  %v2984_v7 = vpop.f32.mrf.mxu1 }
 0x586   : > { %v3084_v63 = vadd.f32 %v3083_v59, %v3082_v48  ;;  %v3076_v4 = vrot.slane %v3075_v60, 2  ;;  %v3096_v5 = vadd.f32 %v3095_v61, %v3094_v56  ;;  %v3088_v6 = vrot.slane %v3087_v53, 4  ;;  %3022 = vst.msk [vmem:[%s4857_s1 + $0x28] sm:$0xff] %vm1716_vm4, %v3014_v1 }
 0x587   : > { %v3070_v9 = vmul.f32 %v3053_v62, %v3014_v1  ;;  %v3013_v10 = vsel %vm2997_vm13, %v2975_v54, %v3005_v2  ;;  %vm3000_vm1 = vcmp.ge.f32.partialorder %v2990_v3, 0.0  ;;  %v3008_v11 = vmul.f32 0.01, %v2990_v3 }
 0x588   : > { %v3097_v12 = vrot.slane %v3096_v5, 2  ;;  %v3089_v13 = vadd.f32 %v3088_v6, %v3087_v53  ;;  %3021 = vst.msk [vmem:[%s4857_s1 + $0x20] sm:$0xff] %vm1716_vm4, %v3013_v10  ;;  %v3069_v14 = vmul.f32 %v3048_v43, %v3013_v10  ;;  %v2985_v16 = vadd.f32 %v4852_v20, %v2984_v7 }
 0x589   : > { %v3108_v55 = vsel %vm1716_vm4, %v3070_v9, 0.0  ;;  %v3016_v15 = vsel %vm3000_vm1, %v2990_v3, %v3008_v11  ;;  %v3085_v17 = vrot.slane %v3084_v63, 1  ;;  %v3077_v18 = vadd.f32 %v3076_v4, %v3075_v60 }
 0x58a   : > { %v3090_v19 = vrot.slane %v3089_v13, 2  ;;  %3024 = vst.msk [vmem:[%s4857_s1 + $0x38] sm:$0xff] %vm1716_vm4, %v3016_v15  ;;  %v3109_v22 = vrot.slane %v3108_v55, 4  ;;  %v3101_v49 = vsel %vm1716_vm4, %v3069_v14, 0.0  ;;  %v3072_v23 = vmul.f32 %v3063_v21, %v3016_v15 }
 0x58b   : > { %v3098_v24 = vadd.f32 %v3097_v12, %v3096_v5  ;;  %vm2999_vm14 = vcmp.ge.f32.partialorder %v2985_v16, 0.0  ;;  %v3102_v28 = vrot.slane %v3101_v49, 4  ;;  %v3007_v29 = vmul.f32 0.01, %v2985_v16 }
 0x58c   : > { %v3091_v25 = vadd.f32 %v3090_v19, %v3089_v13  ;;  %v3110_v27 = vadd.f32 %v3109_v22, %v3108_v55  ;;  %v3122_v20 = vsel %vm1716_vm4, %v3072_v23, 0.0  ;;  %v3086_v30 = vadd.f32 %v3085_v17, %v3084_v63 }
 0x58d   : > { %v3078_v31 = vrot.slane %v3077_v18, 1  ;;  %v3103_v34 = vadd.f32 %v3102_v28, %v3101_v49  ;;  %v3123_v35 = vrot.slane %v3122_v20, 4  ;;  %v3015_v36 = vsel %vm2999_vm14, %v2985_v16, %v3007_v29  ;;  %v3159_v28 = vld [vmem:[%s4985_s22 + $0x18] sm:$0xff]  ;;  %v3157_v29 = vld [vmem:[%s4985_s22 + $0x8] sm:$0xff] }
 0x58e   : > { %v3092_v32 = vrot.slane %v3091_v25, 1  ;;  %v3111_v33 = vrot.slane %v3110_v27, 2  ;;  %v3099_v37 = vrot.slane %v3098_v24, 1  ;;  %v3133_v39 = vrot.slane %v4886_v26, 1  ;;  %3023 = vst.msk [vmem:[%s4857_s1 + $0x30] sm:$0xff] %vm1716_vm4, %v3015_v36 }
 0x58f   : > { %v3071_v40 = vmul.f32 %v3058_v8, %v3015_v36  ;;  %v3134_v41 = vrot.slane %v4886_v26, 2  ;;  %v3104_v43 = vrot.slane %v3103_v34, 2  ;;  %v3124_v44 = vadd.f32 %v3123_v35, %v3122_v20  ;;  %v3687_v35 = vld [vmem:[#allocation12] ss:$0 sm:$0xff] }
 0x590   : > { %v3093_v38 = vadd.f32 %v3092_v32, %v3091_v25  ;;  %v3112_v42 = vadd.f32 %v3111_v33, %v3110_v27  ;;  %v3079_v45 = vadd.f32 %v3078_v31, %v3077_v18  ;;  %v3149_v46 = vmul.f32 %v3133_v39, %v3086_v30  ;;  %v3156_v30 = vld [vmem:[%s4985_s22] sm:$0xff] }
 0x591   : > { %v3115_v47 = vsel %vm1716_vm4, %v3071_v40, 0.0  ;;  %v3105_v51 = vadd.f32 %v3104_v43, %v3103_v34  ;;  %v3125_v52 = vrot.slane %v3124_v44, 2  ;;  %v3100_v56 = vadd.f32 %v3099_v37, %v3098_v24  ;;  %v4086_v31 = vld [vmem:[%s4692_s15] sm:$0xff] }
 0x592   : > { %v3150_v48 = vmul.f32 %v3134_v41, %v3093_v38  ;;  %v3116_v54 = vrot.slane %v3115_v47, 4  ;;  %v3113_v57 = vrot.slane %v3112_v42, 1  ;;  %v3135_v50 = vrot.slane %v4886_v26, 3 }
 0x593   : > { %v3106_v58 = vrot.slane %v3105_v51, 1  ;;  %v3126_v59 = vadd.f32 %v3125_v52, %v3124_v44  ;;  %v3136_v61 = vrot.slane %v4886_v26, 4  ;;  %v3148_v62 = vmul.f32 %v4886_v26, %v3079_v45 }
 0x594   : > { %v3117_v60 = vadd.f32 %v3116_v54, %v3115_v47  ;;  %v3172_v53 = vrot.slane %v3149_v46, 7  ;;  %v3175_v1 = vrot.slane %v3150_v48, 6  ;;  %v3151_v4 = vmul.f32 %v3135_v50, %v3100_v56 }
 0x595   : > { %v3107_v2 = vadd.f32 %v3106_v58, %v3105_v51  ;;  %v3127_v3 = vrot.slane %v3126_v59, 1  ;;  %v3114_v5 = vadd.f32 %v3113_v57, %v3112_v42  ;;  %v3137_v8 = vrot.slane %v4886_v26, 5 }
 0x596   : > { %v3118_v63 = vrot.slane %v3117_v60, 2  ;;  %v3174_v10 = vsel %vm3173_vm15, %v3172_v53, %v3148_v62  ;;  %v3178_v55 = vrot.slane %v3151_v4, 5  ;;  %v3139_v15 = vrot.slane %v4886_v26, 7 }
 0x597   : > { %v3152_v6 = vmul.f32 %v3136_v61, %v3107_v2  ;;  %v3128_v9 = vadd.f32 %v3127_v3, %v3126_v59  ;;  %v3177_v13 = vsel %vm3176_vm2, %v3175_v1, %v3174_v10  ;;  %v3153_v14 = vmul.f32 %v3137_v8, %v3114_v5 }
 0x598   : > { %v3119_v7 = vadd.f32 %v3118_v63, %v3117_v60  ;;  %v3138_v17 = vrot.slane %v4886_v26, 6  ;;  %v3180_v19 = vsel %vm3179_vm3, %v3178_v55, %v3177_v13  ;;  %v3158_v26 = vld [vmem:[%s4985_s22 + $0x10] sm:$0xff] }
 0x599   : > { %v3181_v11 = vrot.slane %v3152_v6, 4  ;;  %v3155_v18 = vmul.f32 %v3139_v15, %v3128_v9  ;;  %v3184_v49 = vrot.slane %v3153_v14, 3 }
 0x59a   : > { %v3120_v12 = vrot.slane %v3119_v7, 1 }
 0x59b   : > { %v3183_v22 = vsel %vm3182_vm5, %v3181_v11, %v3180_v19  ;;  %v3190_v25 = vrot.slane %v3155_v18, 1 }
 0x59c   : > { %v3121_v16 = vadd.f32 %v3120_v12, %v3119_v7  ;;  %v3186_v24 = vsel %vm3185_vm6, %v3184_v49, %v3183_v22 }
 0x59e   : > { %v3154_v21 = vmul.f32 %v3138_v17, %v3121_v16 }
 0x5a0   : > { %v3187_v23 = vrot.slane %v3154_v21, 2 }
 0x5a2   : > { %v3189_v27 = vsel %vm3188_vm7, %v3187_v23, %v3186_v24 }
 0x5a3   : > { %v3192_v20 = vsel %vm3191_vm8, %v3190_v25, %v3189_v27 }
 0x5a4   : > { %3952 = vmatmul.mubr.msk.f32.vlgmr.msra.gmra.mxu0 %vm1716_vm4, %v3192_v20 }
 0x5a5   : > { %3955 = vmatpush3.msra.mxu0 %v3159_v28  ;;  %3962 = vmatprep.mubr.msk.f32.mxu0 %vm4337_vm0, %v4336_v0 }
 0x5a6   : > { %3956 = vmatprep.subr.mxu0 %v4336_v0 }
 0x5a7   : > { %3957 = vmatpush3.msra.mxu0 %v3158_v26 }
 0x5a8   : > { %3958 = vmatprep.subr.mxu0 %v4336_v0 }
 0x5a9   : > { %3959 = vmatpush3.msra.mxu0 %v3157_v29 }
 0x5aa   : > { %3960 = vmatprep.subr.mxu0 %v4336_v0 }
 0x5ab   : > { %3961 = vmatpush3.msra.mxu0 %v3156_v30 }
 0x5ac   : > { %3963 = vmatmul.mubr.msk.f32.vlgmr.msra.gmra.mxu0 %vm1716_vm4, %v4086_v31 }
 0x664   : > { %v3261_v32 = vpop.f32.mrf.mxu0 }
 0x666   : > { %v3953_v33 = vpop.f32.mrf.mxu0 }
 0x66c   : > { %v3331_v34 = vpop.f32.mrf.mxu0 }
 0x66d   : > { %v3332_v36 = vadd.f32 %v3331_v34, %v3261_v32 }
 0x66e   : > { %v3964_v37 = vpop.f32.mrf.mxu0 }
 0x66f   : > { %v3342_v38 = vadd.f32 %v3687_v35, %v3332_v36 }
 0x671   : > { %vm3343_vm0 = vcmp.ge.f32.partialorder %v3342_v38, 0.0  ;;  %v3344_v39 = vmul.f32 0.01, %v3342_v38 }
 0x673   : > { %v3345_v40 = vsel %vm3343_vm0, %v3342_v38, %v3344_v39 }
 0x674   : > { %3346 = vst.msk [vmem:[%s1280_s2] sm:$0xff] %vm1716_vm4, %v3345_v40 }
 0x675 PF: > { %s88_s28 = sadd.s32 1, %s4291_s28  }
 0x676   : > { %p85_p10 = scmp.ge.s32.totalorder %s88_s28, 4  }
 0x678   :  { %87 = sbr.rel (!%p85_p10) target bundleno = 63 (0x3f), region = 282 }
 0x67d   :  { %3382 = vsyncpa [#allocation3], 1 }
 0x67e   :  { %3384 = vsyncpa [#allocation3 + $0x1], 1 }
 0x67f   :  { %3385 = vsyncpa [#allocation5], 1 }
 0x680   :  { %3386 = vsyncpa [#allocation8], 1 }
 0x681   :  { %3387 = vsyncpa [#allocation11], 1 }

// kernel: _lambda_.5
= control target key start
LH: loop header
LB: loop body
LE: loop exit
PB: predicated region body
PF: predicated region fallthrough
CT: control target
= control target key end

     0   :  { %s4525_s6 = smov 1   ;;  %s4526_s10 = smov 2   ;;  %s5170_s0 = inlined_call_operand.smem [shape: u32[37], index: -1, kind: input, shape index: {}] }
   0x1   :  { %s4584_s5 = sld [smem:[%s5170_s0]]   ;;  %s4527_s14 = smov 3  }
   0x2   :  { %s4589_s9 = sld [smem:[%s5170_s0 + %s4525_s6]]   ;;  %s4528_s18 = smov 4  }
   0x3   :  { %s4594_s13 = sld [smem:[%s5170_s0 + %s4526_s10]]   ;;  %s4529_s22 = smov 5  }
   0x4   :  { %s4599_s17 = sld [smem:[%s5170_s0 + %s4527_s14]]   ;;  %s4530_s26 = smov 6  }
   0x5   :  { %s4604_s21 = sld [smem:[%s5170_s0 + %s4528_s18]]   ;;  %s4531_s30 = smov 7  }
   0x6   :  { %s4609_s25 = sld [smem:[%s5170_s0 + %s4529_s22]]   ;;  %s4532_s4 = smov 8  }
   0x7   :  { %5190 = sst [smem:[#allocation25_spill]] %s4584_s5  ;;  %s4533_s10 = smov 9  }
   0x8   :  { %s4614_s29 = sld [smem:[%s5170_s0 + %s4530_s26]]   ;;  %s4534_s15 = smov 10  }
   0x9   :  { %s4619_s3 = sld [smem:[%s5170_s0 + %s4531_s30]]   ;;  %s4535_s20 = smov 11  }
   0xa   :  { %5191 = sst [smem:[#allocation26_spill]] %s4599_s17  ;;  %s4536_s26 = smov 12  }
   0xb   :  { %5192 = sst [smem:[#allocation27_spill]] %s4604_s21  ;;  %s4537_s1 = smov 13  }
   0xc   :  { %5193 = sst [smem:[#allocation28_spill]] %s4609_s25  ;;  %s4538_s7 = smov 14  }
   0xd   :  { %s4624_s8 = sld [smem:[%s5170_s0 + %s4532_s4]]   ;;  %s4540_s22 = smov 16  }
   0xe   :  { %5194 = sst [smem:[#allocation29_spill]] %s4614_s29  ;;  %s4541_s28 = smov 17  }
   0xf   :  { %5195 = sst [smem:[#allocation30_spill]] %s4619_s3 }
  0x10   :  { %s4629_s14 = sld [smem:[%s5170_s0 + %s4533_s10]]  }
  0x11   :  { %s4634_s19 = sld [smem:[%s5170_s0 + %s4534_s15]]   ;;  %s4539_s15 = smov 15  }
  0x12   :  { %s4639_s24 = sld [smem:[%s5170_s0 + %s4535_s20]]  }
  0x13   :  { %s4644_s30 = sld [smem:[%s5170_s0 + %s4536_s26]]  }
  0x14   :  { %s4649_s6 = sld [smem:[%s5170_s0 + %s4537_s1]]  }
  0x15   :  { %s4654_s12 = sld [smem:[%s5170_s0 + %s4538_s7]]   ;;  %s4542_s7 = smov 18  }
  0x16   :  { %5196 = sst [smem:[#allocation31_spill]] %s4629_s14 }
  0x17   :  { %s4659_s20 = sld [smem:[%s5170_s0 + %s4539_s15]]   ;;  %s4543_s15 = smov 19  }
  0x18   :  { %s4664_s27 = sld [smem:[%s5170_s0 + %s4540_s22]]   ;;  %s4544_s22 = smov 20  }
  0x19   :  { %s4669_s4 = sld [smem:[%s5170_s0 + %s4541_s28]]   ;;  %s4545_s28 = smov 21  }
  0x1a   :  { %5197 = sst [smem:[#allocation32_spill]] %s4649_s6 }
  0x1b   :  { %s4674_s29 = sld [smem:[%s5170_s0 + %s4542_s7]]   ;;  %s4546_s7 = smov 22  }
  0x1c   :  { %s4679_s25 = sld [smem:[%s5170_s0 + %s4543_s15]]   ;;  %s4547_s15 = smov 23  }
  0x1d   :  { %5198 = sst [smem:[#allocation33_spill]] %s4659_s20 }
  0x1e   :  { %5199 = sst [smem:[#allocation34_spill]] %s4664_s27 }
  0x1f   :  { %5200 = sst [smem:[#allocation35_spill]] %s4669_s4 }
  0x20   :  { %s4684_s21 = sld [smem:[%s5170_s0 + %s4544_s22]]   ;;  %s4548_s22 = smov 24  }
  0x21   :  { %5201 = sst [smem:[#allocation36_spill]] %s4674_s29 }
  0x22   :  { %5202 = sst [smem:[#allocation37_spill]] %s4679_s25 }
  0x23   :  { %s4689_s17 = sld [smem:[%s5170_s0 + %s4545_s28]]   ;;  %s4549_s28 = smov 25  }
  0x24   :  { %s4694_s29 = sld [smem:[%s5170_s0 + %s4546_s7]]   ;;  %s4550_s7 = smov 26  }
  0x25   :  { %s4699_s25 = sld [smem:[%s5170_s0 + %s4547_s15]]   ;;  %s4551_s15 = smov 27  }
  0x26   :  { %s4704_s5 = sld [smem:[%s5170_s0 + %s4548_s22]]   ;;  %s4552_s22 = smov 28  }
  0x27   :  { %s4714_s27 = sld [smem:[%s5170_s0 + %s4550_s7]]   ;;  %s4554_s7 = smov 30  }
  0x28   :  { %s4724_s20 = sld [smem:[%s5170_s0 + %s4552_s22]]   ;;  %s4556_s22 = smov 32  }
  0x29   :  { %5203 = sst [smem:[#allocation38_spill]] %s4689_s17 }
  0x2a   :  { %s4709_s17 = sld [smem:[%s5170_s0 + %s4549_s28]]   ;;  %s4553_s28 = smov 29  }
  0x2b   :  { %5204 = sst [smem:[#allocation39_spill]] %s4699_s25 }
  0x2c   :  { %5205 = sst [smem:[#allocation40_spill]] %s4704_s5 }
  0x2d   :  { %5207 = sst [smem:[#allocation42_spill]] %s4714_s27 }
  0x2e   :  { %s4719_s25 = sld [smem:[%s5170_s0 + %s4551_s15]]   ;;  %s4555_s15 = smov 31  }
  0x2f   :  { %5209 = sst [smem:[#allocation44_spill]] %s4724_s20 }
  0x30   :  { %5206 = sst [smem:[#allocation41_spill]] %s4709_s17 }
  0x31   :  { %s4729_s17 = sld [smem:[%s5170_s0 + %s4553_s28]]   ;;  %s4557_s28 = smov 33  }
  0x32   :  { %s4734_s27 = sld [smem:[%s5170_s0 + %s4554_s7]]   ;;  %s4558_s7 = smov 34  }
  0x33   :  { %s4744_s20 = sld [smem:[%s5170_s0 + %s4556_s22]]   ;;  %s4560_s22 = smov 36  }
  0x34   :  { %5208 = sst [smem:[#allocation43_spill]] %s4719_s25 }
  0x35   :  { %s4739_s25 = sld [smem:[%s5170_s0 + %s4555_s15]]   ;;  %s4559_s15 = smov 35  }
  0x36   :  { %s4749_s6 = sld [smem:[%s5170_s0 + %s4557_s28]]  }
  0x37   :  { %s4759_s14 = sld [smem:[%s5170_s0 + %s4559_s15]]  }
  0x38   :  { %5210 = sst [smem:[#allocation45_spill]] %s4734_s27 }
  0x39   :  { %5211 = sst [smem:[#allocation46_spill]] %s4744_s20 }
  0x3a   :  { %s4754_s27 = sld [smem:[%s5170_s0 + %s4558_s7]]  }
  0x3b   :  { %s4764_s20 = sld [smem:[%s5170_s0 + %s4560_s22]]  }
  0x3c   :  { %79 = vsyncpa [#allocation3], 0 }
  0x3d   :  { %80 = vsyncpa [#allocation5], 0 }
  0x3e   :  { %81 = vsyncpa [#allocation8], 0 }
  0x3f   :  { %82 = vsyncpa [#allocation11], 0 }
  0x40   :  { %83 = vsyncpa [#allocation14], 0 }
  0x41   :  { %84 = vsyncpa [#allocation17], 0  ;;  %s4766_s28 = smov 0  }
  0x42 LB: > { %s5212_s3 = sld [smem:[#allocation30_spill]]  ;;  %s4561_s1 = smov [#allocation4]   ;;  %s4523_s28 = sphi %s4766_s28, %s90_s28  }
  0x43   : > { %s945_s2 = sshll.u32 %s4561_s1, 4  ;;  %s4772_s0 = sadd.s32 4294967295, %s4523_s28   ;;  %s946_s2 = int_to_ptr.vmem [resolvable:$true] %s945_s2 }
  0x44   : > { %p3681_p0 = scmp.ge.s32.totalorder %s4523_s28, 1  ;;  %p912_p1 = scmp.lt.s32.totalorder %s4523_s28, 3 }
  0x45   : > { %p5184_p2 = scmp.eq.s32.totalorder %s4772_s0, 0  ;;  %s4562_s10 = smov [#allocation7]  }
  0x46   : > { %p4777_p3 = pnand %p3681_p0, %p912_p1  ;;  %s973_s11 = sshll.u32 %s4562_s10, 4  ;;  %s4783_s11 = int_to_ptr.vmem [resolvable:$true] %s973_s11 }
  0x47   : > { %s4563_s15 = smov [#allocation10]   ;;  %s4564_s22 = smov [#allocation13]  }
  0x48   : > { %s5213_s7 = scalar_select %p4777_p3, 1, 0 }
  0x49   : > { %p4089_p4 = pneg %p4777_p3  ;;  %s1007_s16 = sshll.u32 %s4563_s15, 4  ;;  %s4791_s16 = int_to_ptr.vmem [resolvable:$true] %s1007_s16 }
  0x4a   : > { %s1035_s23 = sshll.u32 %s4564_s22, 4  ;;  %s4218_s1 = scalar_lea.vmem %s946_s2, 16  ;;  %s4793_s23 = int_to_ptr.vmem [resolvable:$true] %s1035_s23 }
  0x4b   : > { %p4787_p5 = pnand %p5184_p2, %p4089_p4  ;;  %p4219_p7 = scmp.ne.s32.totalorder %s946_s2, %s4218_s1 }
  0x4c   : > { %s4225_s10 = scalar_lea.vmem %s946_s2, 32  ;;  %p4226_p10 = scmp.lt.s32.totalorder %s946_s2, %s946_s2 }
  0x4d   : > { %p4797_p6 = pneg %p4787_p5  ;;  %p4227_p11 = scmp.lt.s32.totalorder %s4225_s10, %s4218_s1 }
  0x4f   : > { %p4221_p8 = pnand %p4219_p7, %p4797_p6  ;;  %p4228_p12 = por %p4227_p11, %p4226_p10 }
  0x51   : > { %p4222_p9 = pneg %p4221_p8 }
  0x53   : > { %p4229_p13 = pnand %p4228_p12, %p4222_p9 }
  0x55   : > { %4232 = shalt.err (!%p4229_p13)
}
  0x56   : > { %4095 = dma.hbm_to_vmem [thread:$0]  (!%p4787_p5), %s4634_s19, 16, %s946_s2, [#allocation5]  }
  0x57   : > { %s4244_s15 = scalar_lea.vmem %s4783_s11, 16  ;;  %s4251_s22 = scalar_lea.vmem %s4783_s11, 32 }
  0x58   : > { %p4245_p0 = scmp.ne.s32.totalorder %s4783_s11, %s4244_s15  ;;  %p4252_p7 = scmp.lt.s32.totalorder %s4783_s11, %s4783_s11 }
  0x59   : > { %p4253_p8 = scmp.lt.s32.totalorder %s4251_s22, %s4244_s15 }
  0x5a   : > { %p4247_p1 = pnand %p4245_p0, %p4797_p6 }
  0x5b   : > { %p4254_p9 = por %p4253_p8, %p4252_p7 }
  0x5c   : > { %p4248_p4 = pneg %p4247_p1 }
  0x5e   : > { %p4255_p10 = pnand %p4254_p9, %p4248_p4 }
  0x60   : > { %4258 = shalt.err (!%p4255_p10)
}
  0x61   : > { %4101 = dma.hbm_to_vmem [thread:$0]  (!%p4787_p5), %s4654_s12, 16, %s4783_s11, [#allocation8]  }
  0x62   : > { %s4270_s2 = scalar_lea.vmem %s4791_s16, 16  ;;  %s4277_s1 = scalar_lea.vmem %s4791_s16, 32 }
  0x63   : > { %p4271_p11 = scmp.ne.s32.totalorder %s4791_s16, %s4270_s2  ;;  %p4278_p0 = scmp.lt.s32.totalorder %s4791_s16, %s4791_s16 }
  0x64   : > { %p4279_p1 = scmp.lt.s32.totalorder %s4277_s1, %s4270_s2 }
  0x65   : > { %p4273_p12 = pnand %p4271_p11, %p4797_p6 }
  0x66   : > { %p4280_p4 = por %p4279_p1, %p4278_p0 }
  0x67   : > { %p4274_p13 = pneg %p4273_p12 }
  0x69   : > { %p4281_p7 = pnand %p4280_p4, %p4274_p13 }
  0x6b   : > { %4284 = shalt.err (!%p4281_p7)
}
  0x6c   : > { %4107 = dma.hbm_to_vmem [thread:$0]  (!%p4787_p5), %s4684_s21, 16, %s4791_s16, [#allocation11]  }
  0x6d   : > { %s4296_s11 = scalar_lea.vmem %s4793_s23, 16  ;;  %s4303_s10 = scalar_lea.vmem %s4793_s23, 32 }
  0x6e   : > { %p4297_p8 = scmp.ne.s32.totalorder %s4793_s23, %s4296_s11  ;;  %p4304_p11 = scmp.lt.s32.totalorder %s4793_s23, %s4793_s23 }
  0x6f   : > { %p4305_p12 = scmp.lt.s32.totalorder %s4303_s10, %s4296_s11 }
  0x70   : > { %p4299_p9 = pnand %p4297_p8, %p4797_p6 }
  0x71   : > { %p4306_p13 = por %p4305_p12, %p4304_p11 }
  0x72   : > { %p4300_p10 = pneg %p4299_p9 }
  0x74   : > { %p4307_p0 = pnand %p4306_p13, %p4300_p10 }
  0x76   : > { %4310 = shalt.err (!%p4307_p0)
}
  0x77   : > { %s5216_s5 = sld [smem:[#allocation40_spill]]  ;;  %s4565_s15 = smov [#allocation16]  }
  0x78   : > { %s1072_s16 = sshll.u32 %s4565_s15, 4  ;;  %s4566_s22 = smov [#allocation2]   ;;  %s1073_s16 = int_to_ptr.vmem [resolvable:$true] %s1072_s16 }
  0x79   : > { %s931_s2 = sshll.u32 %s4566_s22, 4  ;;  %s4322_s1 = scalar_lea.vmem %s1073_s16, 16  ;;  %s932_s2 = int_to_ptr.vmem [resolvable:$true] %s931_s2 }
  0x7a   : > { %p4323_p1 = scmp.ne.s32.totalorder %s1073_s16, %s4322_s1  ;;  %s4329_s11 = scalar_lea.vmem %s1073_s16, 32 }
  0x7b   : > { %p4330_p8 = scmp.lt.s32.totalorder %s1073_s16, %s1073_s16  ;;  %p4331_p9 = scmp.lt.s32.totalorder %s4329_s11, %s4322_s1 }
  0x7c   : > { %p4325_p4 = pnand %p4323_p1, %p4797_p6 }
  0x7d   : > { %4113 = dma.hbm_to_vmem [thread:$0]  (!%p4787_p5), %s5216_s5, 16, %s4793_s23, [#allocation14]  }
  0x7e   : > { %p4326_p7 = pneg %p4325_p4  ;;  %p4332_p10 = por %p4331_p9, %p4330_p8 }
  0x80   : > { %p4333_p11 = pnand %p4332_p10, %p4326_p7 }
  0x82   : > { %4336 = shalt.err (!%p4333_p11)
}
  0x83   : > { %4119 = dma.hbm_to_vmem [thread:$0]  (!%p4787_p5), %s4739_s25, 16, %s1073_s16, [#allocation17]  }
  0x84   : > { %s4348_s23 = scalar_lea.vmem %s932_s2, 16  ;;  %s4355_s10 = scalar_lea.vmem %s932_s2, 32 }
  0x85   : > { %p4349_p12 = scmp.ne.s32.totalorder %s932_s2, %s4348_s23  ;;  %p4356_p1 = scmp.lt.s32.totalorder %s932_s2, %s932_s2 }
  0x86   : > { %p4357_p4 = scmp.lt.s32.totalorder %s4355_s10, %s4348_s23 }
  0x87   : > { %p4351_p13 = pnand %p4349_p12, %p4797_p6 }
  0x88   : > { %p4358_p2 = por %p4357_p4, %p4356_p1 }
  0x89   : > { %p4352_p0 = pneg %p4351_p13 }
  0x8b   : > { %p4359_p3 = pnand %p4358_p2, %p4352_p0 }
  0x8d   : > { %4362 = shalt.err (!%p4359_p3)
}
  0x8e   : > { %4092 = dma.hbm_to_vmem [thread:$0]  (!%p4787_p5), %s4624_s8, 16, %s932_s2, [#allocation3]  }
  0x8f   : > { %s4567_s15 = smov [#allocation6]   ;;  %s4568_s16 = smov [#allocation9]  }
  0x90   : > { %s959_s22 = sshll.u32 %s4567_s15, 4  ;;  %s990_s1 = sshll.u32 %s4568_s16, 4  ;;  %s960_s22 = int_to_ptr.vmem [resolvable:$true] %s959_s22  ;;  %s991_s1 = int_to_ptr.vmem [resolvable:$true] %s990_s1 }
  0x91   : > { %s4374_s11 = scalar_lea.vmem %s960_s22, 16  ;;  %s4381_s5 = scalar_lea.vmem %s960_s22, 32 }
  0x92   : > { %p4375_p7 = scmp.ne.s32.totalorder %s960_s22, %s4374_s11  ;;  %p4382_p10 = scmp.lt.s32.totalorder %s960_s22, %s960_s22 }
  0x93   : > { %p4383_p11 = scmp.lt.s32.totalorder %s4381_s5, %s4374_s11 }
  0x94   : > { %p4377_p8 = pnand %p4375_p7, %p4797_p6 }
  0x95   : > { %p4384_p2 = por %p4383_p11, %p4382_p10 }
  0x96   : > { %p4378_p9 = pneg %p4377_p8 }
  0x98   : > { %p4385_p3 = pnand %p4384_p2, %p4378_p9 }
  0x9a   : > { %4388 = shalt.err (!%p4385_p3)
}
  0x9b   : > { %4098 = dma.hbm_to_vmem [thread:$0]  (!%p4787_p5), %s4644_s30, 16, %s960_s22, [#allocation5]  }
  0x9c   : > { %s4400_s2 = scalar_lea.vmem %s991_s1, 16  ;;  %s4407_s23 = scalar_lea.vmem %s991_s1, 32 }
  0x9d   : > { %p4401_p12 = scmp.ne.s32.totalorder %s991_s1, %s4400_s2  ;;  %p4408_p1 = scmp.lt.s32.totalorder %s991_s1, %s991_s1 }
  0x9e   : > { %p4409_p4 = scmp.lt.s32.totalorder %s4407_s23, %s4400_s2 }
  0x9f   : > { %p4403_p13 = pnand %p4401_p12, %p4797_p6 }
  0xa0   : > { %p4410_p7 = por %p4409_p4, %p4408_p1 }
  0xa1   : > { %p4404_p0 = pneg %p4403_p13 }
  0xa3   : > { %p4411_p8 = pnand %p4410_p7, %p4404_p0 }
  0xa5   : > { %4414 = shalt.err (!%p4411_p8)
}
  0xa6   : > { %s5217_s4 = sld [smem:[#allocation35_spill]]  ;;  %s4569_s5 = smov [#allocation12]  }
  0xa7   : > { %s1021_s10 = sshll.u32 %s4569_s5, 4  ;;  %s4570_s15 = smov [#allocation15]   ;;  %s1022_s10 = int_to_ptr.vmem [resolvable:$true] %s1021_s10 }
  0xa8   : > { %s1058_s22 = sshll.u32 %s4570_s15, 4  ;;  %s4426_s16 = scalar_lea.vmem %s1022_s10, 16  ;;  %s1059_s22 = int_to_ptr.vmem [resolvable:$true] %s1058_s22 }
  0xa9   : > { %p4427_p9 = scmp.ne.s32.totalorder %s1022_s10, %s4426_s16  ;;  %s4433_s11 = scalar_lea.vmem %s1022_s10, 32 }
  0xaa   : > { %p4434_p2 = scmp.lt.s32.totalorder %s1022_s10, %s1022_s10  ;;  %p4435_p3 = scmp.lt.s32.totalorder %s4433_s11, %s4426_s16 }
  0xab   : > { %p4429_p10 = pnand %p4427_p9, %p4797_p6 }
  0xac   : > { %4104 = dma.hbm_to_vmem [thread:$0]  (!%p4787_p5), %s5217_s4, 16, %s991_s1, [#allocation8]  }
  0xad   : > { %p4430_p11 = pneg %p4429_p10  ;;  %p4436_p12 = por %p4435_p3, %p4434_p2 }
  0xaf   : > { %p4437_p13 = pnand %p4436_p12, %p4430_p11 }
  0xb1   : > { %4440 = shalt.err (!%p4437_p13)
}
  0xb2   : > { %4110 = dma.hbm_to_vmem [thread:$0]  (!%p4787_p5), %s4694_s29, 16, %s1022_s10, [#allocation11]  }
  0xb3   : > { %s4452_s1 = scalar_lea.vmem %s1059_s22, 16  ;;  %s4459_s2 = scalar_lea.vmem %s1059_s22, 32 }
  0xb4   : > { %p4453_p0 = scmp.ne.s32.totalorder %s1059_s22, %s4452_s1  ;;  %p4460_p7 = scmp.lt.s32.totalorder %s1059_s22, %s1059_s22 }
  0xb5   : > { %p4461_p8 = scmp.lt.s32.totalorder %s4459_s2, %s4452_s1 }
  0xb6   : > { %p4455_p1 = pnand %p4453_p0, %p4797_p6 }
  0xb7   : > { %p4462_p9 = por %p4461_p8, %p4460_p7 }
  0xb8   : > { %p4456_p4 = pneg %p4455_p1 }
  0xba   : > { %p4463_p10 = pnand %p4462_p9, %p4456_p4 }
  0xbc   : > { %4466 = shalt.err (!%p4463_p10)
}
  0xbd   : > { %4116 = dma.hbm_to_vmem [thread:$0]  (!%p4787_p5), %s4729_s17, 16, %s1059_s22, [#allocation14]  }
  0xbe   : > { %s4571_s23 = smov [#allocation18]  }
  0xbf   : > { %s1089_s5 = sshll.u32 %s4571_s23, 4  ;;  %s1090_s5 = int_to_ptr.vmem [resolvable:$true] %s1089_s5 }
  0xc0   : > { %s4478_s10 = scalar_lea.vmem %s1090_s5, 16  ;;  %s4485_s15 = scalar_lea.vmem %s1090_s5, 32 }
  0xc1   : > { %p4479_p11 = scmp.ne.s32.totalorder %s1090_s5, %s4478_s10  ;;  %p4486_p12 = scmp.lt.s32.totalorder %s1090_s5, %s1090_s5 }
  0xc2   : > { %p4487_p13 = scmp.lt.s32.totalorder %s4485_s15, %s4478_s10 }
  0xc3   : > { %p4481_p2 = pnand %p4479_p11, %p4797_p6 }
  0xc4   : > { %p4488_p0 = por %p4487_p13, %p4486_p12 }
  0xc5   : > { %p4482_p3 = pneg %p4481_p2 }
  0xc7   : > { %p4489_p1 = pnand %p4488_p0, %p4482_p3 }
  0xc9   : > { %4492 = shalt.err (!%p4489_p1)
}
  0xca   : > { %4122 = dma.hbm_to_vmem [thread:$0]  (!%p4787_p5), %s4754_s27, 16, %s1090_s5, [#allocation17]  }
  0xcb   : > { %p5218_p4 = scmp.ne.s32.totalorder %s5213_s7, 0 }
  0xcc   : > { %p5219_p7 = scmp.eq.s32.totalorder (!%p5218_p4), %s4772_s0, 0 }
  0xcd   : > { %1146 = sbr.rel (%p5218_p4) target bundleno = 1704 (0x6a8), region = 160 }
  0xd2   : > { %4498 = dma.done.wait (%p5219_p7), [#allocation3], 16   ;;  %p5220_p8 = pmov %p5219_p7 }
  0xd3   : > { %p5221_p6 = pmov %p5219_p7 }
  0xd4   : > { %4500 = vsyncadd (%p5220_p8), [#allocation3], 4294967280 }
  0xd5   : > { %4502 = dma.done.wait (%p5221_p6), [#allocation5], 32   ;;  %p5222_p9 = pmov %p5221_p6 }
  0xd6   : > { %p5223_p10 = pmov %p5221_p6 }
  0xd7   : > { %4504 = vsyncadd (%p5222_p9), [#allocation5], 4294967264 }
  0xd8   : > { %4506 = dma.done.wait (%p5223_p10), [#allocation8], 32   ;;  %p5224_p5 = pmov %p5221_p6 }
  0xda   : > { %4508 = vsyncadd (%p5224_p5), [#allocation8], 4294967264  ;;  %p5225_p11 = pmov %p5224_p5 }
  0xdb   : > { %p5226_p2 = pmov %p5224_p5 }
  0xdc   : > { %4510 = dma.done.wait (%p5225_p11), [#allocation11], 32  }
  0xdd   : > { %4512 = vsyncadd (%p5226_p2), [#allocation11], 4294967264  ;;  %p5227_p3 = pmov %p5226_p2 }
  0xde   : > { %p5228_p12 = pmov %p5226_p2 }
  0xdf   : > { %4514 = dma.done.wait (%p5227_p3), [#allocation14], 32  }
  0xe0   : > { %4516 = vsyncadd (%p5228_p12), [#allocation14], 4294967264  ;;  %p5229_p13 = pmov %p5226_p2 }
  0xe1   : > { %p5230_p0 = pmov %p5226_p2 }
  0xe2   : > { %4518 = dma.done.wait (%p5229_p13), [#allocation17], 32  }
  0xe3   : > { %4520 = vsyncadd (%p5230_p0), [#allocation17], 4294967264  ;;  %p1301_p1 = scmp.lt.s32.totalorder %s4772_s0, 1  ;;  %v4572_v0 = vmov 0.0   ;;  %vm4573_vm0 = vmmov 0   ;;  %v1365_v1 = vld [vmem:[%s5212_s3 + $0x8] sm:$0xff] }
  0xe4   : > { %3875 = vmatprep.subr.mxu1 %v4572_v0  ;;  %3889 = vmatprep.subr.mxu0 %v4572_v0  ;;  %v1364_v2 = vld [vmem:[%s5212_s3] sm:$0xff]  ;;  %v1521_v3 = vld [vmem:[%s4639_s24 + $0x8] sm:$0xff]  ;;  %s5231_s18 = sld [smem:[#allocation31_spill]]  ;;  %vm1367_vm1 = vcmask 130048   ;;  %vm2047_vm4 = vcmask 1041408   ;;  %vm2022_vm5 = vcmask 80896  }
  0xe5   : > { %3879 = vmatprep.mubr.msk.f32.mxu1 %vm4573_vm0, %v4572_v0  ;;  %s5251_s0 = smov (!%p1301_p1, %s4772_s0), 1  ;;  %3893 = vmatprep.mubr.msk.f32.mxu0 %vm4573_vm0, %v4572_v0  ;;  %v1520_v5 = vld [vmem:[%s4639_s24] sm:$0xff]  ;;  %s5232_s26 = sld [smem:[#allocation32_spill]]  ;;  %vm2213_vm6 = vcmask 1042432   ;;  %v3725_v55 = vld [vmem:[#allocation9] ss:$0 sm:$0xff] }
  0xe6   : > { %s1307_s7 = scalar_lea.vmem %s4589_s9, %s5251_s0  ;;  %3876 = vmatpush3.msra.mxu1 %v1365_v1  ;;  %3890 = vmatpush3.msra.mxu0 %v1521_v3  ;;  %v1338_v6 = vld [vmem:[%s4594_s13] sm:$0xff]  ;;  %s5233_s22 = sld [smem:[#allocation33_spill]]  ;;  %vm2188_vm8 = vcmask 23552  }
  0xe7   : > { %v1337_v4 = vld [vmem:[%s1307_s7] sm:$0x1]  ;;  %3877 = vmatprep.subr.mxu1 %v4572_v0  ;;  %3891 = vmatprep.subr.mxu0 %v4572_v0  ;;  %v3719_v10 = vld [vmem:[#allocation6] ss:$0 sm:$0xff]  ;;  %s5234_s16 = sld [smem:[#allocation34_spill]]  ;;  %s4944_s1 = sshll.u32 %s5251_s0, 3 }
  0xe8   : > { %3878 = vmatpush3.msra.mxu1 %v1364_v2  ;;  %3892 = vmatpush3.msra.mxu0 %v1520_v5  ;;  %v1366_v9 = vld [vmem:[#allocation2] sm:$0x1]  ;;  %s5235_s11 = sld [smem:[#allocation25_spill]]  ;;  %v3721_v30 = vld [vmem:[#allocation7] ss:$0 sm:$0xff]  ;;  %s4961_s15 = sshll.u32 %s5251_s0, 6 }
  0xe9   : > { %3880 = vmatmul.mubr.msk.f32.vlgmr.msra.gmra.mxu1 %vm1367_vm1, %v1337_v4  ;;  %3894 = vmatmul.mubr.msk.f32.vlgmr.msra.gmra.mxu0 %vm1367_vm1, %v1338_v6  ;;  %s5236_s23 = sld [smem:[#allocation37_spill]]  ;;  %v1446_v34 = vld [vmem:[#allocation4] sm:$0x1]  ;;  %v3729_v6 = vld [vmem:[#allocation12] ss:$0 sm:$0xff] }
  0xea   : > { %3882 = vmatprep.subr.mxu1 %v4572_v0  ;;  %3886 = vmatprep.mubr.msk.f32.mxu1 %vm4573_vm0, %v4572_v0  ;;  %v1445_v7 = vld [vmem:[%s5231_s18 + $0x8] sm:$0xff]  ;;  %v1444_v8 = vld [vmem:[%s5231_s18] sm:$0xff]  ;;  %s5237_s5 = sld [smem:[#allocation26_spill]] }
  0xeb   : > { %3903 = vmatprep.subr.mxu0 %v4572_v0  ;;  %3907 = vmatprep.mubr.msk.f32.mxu0 %vm4573_vm0, %v4572_v0  ;;  %v1606_v18 = vld [vmem:[%s5232_s26 + $0x8] sm:$0xff]  ;;  %v1605_v21 = vld [vmem:[%s5232_s26] sm:$0xff]  ;;  %s5238_s10 = sld [smem:[#allocation38_spill]] }
  0xec   : > { %3883 = vmatpush3.msra.mxu1 %v1445_v7  ;;  %v1688_v23 = vld [vmem:[%s5233_s22 + $0x8] sm:$0xff]  ;;  %v1687_v25 = vld [vmem:[%s5233_s22] sm:$0xff]  ;;  %s5239_s0 = sld [smem:[#allocation36_spill]] }
  0xed   : > { %3884 = vmatprep.subr.mxu1 %v4572_v0  ;;  %v1690_v24 = vld [vmem:[%s5234_s16 + $0x8] sm:$0xff]  ;;  %v1689_v27 = vld [vmem:[%s5234_s16] sm:$0xff]  ;;  %s5242_s3 = sld [smem:[#allocation27_spill]] }
  0xee   : > { %3885 = vmatpush3.msra.mxu1 %v1444_v8  ;;  %3904 = vmatpush3.msra.mxu0 %v1690_v24  ;;  %s4950_s2 = scalar_lea.vmem %s5235_s11, %s4944_s1  ;;  %s5240_s11 = sld [smem:[#allocation39_spill]] }
  0xef   : > { %3896 = vmatprep.subr.mxu1 %v4572_v0  ;;  %3905 = vmatprep.subr.mxu0 %v4572_v0  ;;  %v1336_v26 = vld [vmem:[%s4950_s2] sm:$0xff]  ;;  %v1851_v33 = vld [vmem:[%s5236_s23 + $0x8] sm:$0xff]  ;;  %s5243_s4 = sld [smem:[#allocation41_spill]] }
  0xf0   : > { %3906 = vmatpush3.msra.mxu0 %v1689_v27  ;;  %s4966_s7 = scalar_lea.vmem %s5237_s5, %s4961_s15  ;;  %v1850_v36 = vld [vmem:[%s5236_s23] sm:$0xff]  ;;  %s5241_s5 = sld [smem:[#allocation42_spill]] }
  0xf1   : > { %3917 = vmatprep.subr.mxu0 %v4572_v0  ;;  %v2014_v37 = vld [vmem:[%s5238_s10 + $0x8] sm:$0x3]  ;;  %v1339_v39 = vld [vmem:[%s4966_s7] sm:$0xff]  ;;  %v1341_v42 = vld [vmem:[%s4966_s7 + $0x10] sm:$0xff] }
  0xf2   : > { %v2013_v40 = vld [vmem:[%s5238_s10] sm:$0xff]  ;;  %v1340_v41 = vld [vmem:[%s4966_s7 + $0x8] sm:$0xff]  ;;  %v1342_v43 = vld [vmem:[%s4966_s7 + $0x18] sm:$0xff] }
  0xf3   : > { %v1343_v44 = vld [vmem:[%s4966_s7 + $0x20] sm:$0xff]  ;;  %v1344_v45 = vld [vmem:[%s4966_s7 + $0x28] sm:$0xff]  ;;  %v1345_v48 = vld [vmem:[%s4966_s7 + $0x30] sm:$0xff] }
  0xf4   : > { %v1346_v49 = vld [vmem:[%s4966_s7 + $0x38] sm:$0xff]  ;;  %v1849_v50 = vld [vmem:[%s5239_s0 + $0x8] sm:$0xff]  ;;  %v1848_v51 = vld [vmem:[%s5239_s0] sm:$0xff]  ;;  %s5000_s7 = scalar_lea.vmem %s5242_s3, %s4961_s15  ;;  %s5244_s3 = sld [smem:[#allocation44_spill]] }
  0xf5   : > { %v2180_v52 = vld [vmem:[%s5240_s11] sm:$0x7]  ;;  %v2347_v1 = vld [vmem:[%s5243_s4 + $0x8] sm:$0xff]  ;;  %v1349_v4 = vld [vmem:[%s5000_s7 + $0x10] sm:$0xff]  ;;  %s5245_s11 = sld [smem:[#allocation43_spill]] }
  0xf6   : > { %v2349_v53 = vld [vmem:[%s5241_s5 + $0x8] sm:$0xff]  ;;  %v1347_v62 = vld [vmem:[%s5000_s7] sm:$0xff]  ;;  %s5247_s0 = sld [smem:[#allocation28_spill]] }
  0xf7   : > { %v1348_v3 = vld [vmem:[%s5000_s7 + $0x8] sm:$0xff]  ;;  %v2346_v7 = vld [vmem:[%s5243_s4] sm:$0xff]  ;;  %s5248_s4 = sld [smem:[#allocation29_spill]] }
 0x1a9   : > { %v1437_v11 = vpop.f32.mrf.mxu1  ;;  %v1598_v12 = vpop.f32.mrf.mxu0 }
 0x1aa   : > { %v1438_v13 = vadd.f32 %v1437_v11, %v1366_v9  ;;  %v1599_v14 = vadd.f32 %v3719_v10, %v1598_v12  ;;  %v1350_v9 = vld [vmem:[%s5000_s7 + $0x18] sm:$0xff]  ;;  %v1351_v10 = vld [vmem:[%s5000_s7 + $0x20] sm:$0xff] }
 0x1ab   : > { %v3881_v15 = vpop.f32.mrf.mxu1  ;;  %v3895_v16 = vpop.f32.mrf.mxu0 }
 0x1ac   : > { %vm1441_vm2 = vcmp.ge.f32.partialorder %v1438_v13, 0.0  ;;  %v1442_v17 = vmul.f32 0.01, %v1438_v13  ;;  %v1603_v20 = vmul.f32 0.01, %v1599_v14  ;;  %vm1602_vm3 = vcmp.ge.f32.partialorder %v1599_v14, 0.0 }
 0x1ad   : > { %v1353_v16 = vld [vmem:[%s5000_s7 + $0x30] sm:$0xff] }
 0x1ae   : > { %v1443_v19 = vsel %vm1441_vm2, %v1438_v13, %v1442_v17  ;;  %v1604_v22 = vsel %vm1602_vm3, %v1599_v14, %v1603_v20  ;;  %v1352_v14 = vld [vmem:[%s5000_s7 + $0x28] sm:$0xff]  ;;  %v1354_v20 = vld [vmem:[%s5000_s7 + $0x38] sm:$0xff]  ;;  %s5246_s7 = sld [smem:[#allocation45_spill]] }
 0x1af   : > { %3887 = vmatmul.mubr.msk.f32.vlgmr.msra.gmra.mxu1 %vm1367_vm1, %v1443_v19 }
 0x1b0   : > { %3897 = vmatpush3.msra.mxu1 %v1606_v18  ;;  %3900 = vmatprep.mubr.msk.f32.mxu1 %vm4573_vm0, %v4572_v0 }
 0x1b1   : > { %3898 = vmatprep.subr.mxu1 %v4572_v0 }
 0x1b2   : > { %3899 = vmatpush3.msra.mxu1 %v1605_v21 }
 0x1b3   : > { %3901 = vmatmul.mubr.msk.f32.vlgmr.msra.gmra.mxu1 %vm1367_vm1, %v1604_v22  ;;  %3910 = vmatprep.subr.mxu1 %v4572_v0 }
 0x1b4   : > { %3914 = vmatprep.mubr.msk.f32.mxu1 %vm4573_vm0, %v4572_v0  ;;  %3911 = vmatpush3.msra.mxu1 %v1688_v23 }
 0x1b5   : > { %3912 = vmatprep.subr.mxu1 %v4572_v0 }
 0x1b6   : > { %3913 = vmatpush3.msra.mxu1 %v1687_v25 }
 0x1b7   : > { %3915 = vmatmul.mubr.msk.f32.vlgmr.msra.gmra.mxu1 %vm1367_vm1, %v1336_v26  ;;  %3924 = vmatprep.subr.mxu1 %v4572_v0 }
 0x1b8   : > { %3928 = vmatprep.mubr.msk.f32.mxu1 %vm4573_vm0, %v4572_v0  ;;  %3925 = vmatpush3.msra.mxu1 %v1849_v50 }
 0x1b9   : > { %3926 = vmatprep.subr.mxu1 %v4572_v0 }
 0x1ba   : > { %3927 = vmatpush3.msra.mxu1 %v1848_v51  ;;  %v3728_v51 = vld [vmem:[#allocation10] ss:$0 sm:$0xff] }
 0x1bb   : > { %3947 = vmatprep.subr.msk.mxu1 %vm2213_vm6, %v2180_v52 }
 0x26f   : > { %v1516_v28 = vpop.f32.mrf.mxu1 }
 0x270   : > { %v1517_v38 = vadd.f32 %v1516_v28, %v1446_v34 }
 0x271   : > { %v3888_v29 = vpop.f32.mrf.mxu1 }
 0x273   : > { %v1683_v31 = vpop.f32.mrf.mxu1 }
 0x274   : > { %v1684_v32 = vadd.f32 %v3721_v30, %v1683_v31 }
 0x275   : > { %v3902_v35 = vpop.f32.mrf.mxu1 }
 0x276   : > { %3908 = vmatmul.mubr.msk.f32.vlgmr.msra.gmra.mxu0 %vm1367_vm1, %v1684_v32 }
 0x277   : > { %3918 = vmatpush3.msra.mxu0 %v1851_v33  ;;  %3921 = vmatprep.mubr.msk.f32.mxu0 %vm4573_vm0, %v4572_v0  ;;  %v1833_v46 = vpop.f32.mrf.mxu1 }
 0x278   : > { %3919 = vmatprep.subr.mxu0 %v4572_v0 }
 0x279   : > { %3920 = vmatpush3.msra.mxu0 %v1850_v36  ;;  %v3916_v47 = vpop.f32.mrf.mxu1 }
 0x27a   : > { %3922 = vmatmul.mubr.msk.f32.vlgmr.msra.gmra.mxu0 %vm1367_vm1, %v1517_v38  ;;  %3931 = vmatprep.subr.msk.mxu0 %vm2047_vm4, %v2014_v37 }
 0x27b   : > { %3932 = vmatpush3.msk.msra.mxu0 %vm2047_vm4, %v2014_v37  ;;  %3935 = vmatprep.mubr.msk.f32.mxu0 %vm2022_vm5, %v1339_v39 }
 0x27c   : > { %3933 = vmatprep.subr.mxu0 %v2013_v40 }
 0x27d   : > { %3934 = vmatpush3.msra.mxu0 %v2013_v40 }
 0x27e   : > { %3936 = vmatmul.mubr.msk.f32.vlgmr.msra.gmra.mxu0 %vm2022_vm5, %v1340_v41  ;;  %3961 = vmatprep.subr.mxu0 %v2349_v53 }
 0x27f   : > { %3938 = vmatprep.mubr.msk.f32.mxu0 %vm2022_vm5, %v1341_v42  ;;  %3962 = vmatpush3.msra.mxu0 %v2349_v53 }
 0x282   : > { %3939 = vmatmul.mubr.msk.f32.gmra.mxu0 %vm2022_vm5, %v1342_v43  ;;  %v2684_v43 = vld [vmem:[%s5244_s3 + $0x8] sm:$0xff] }
 0x283   : > { %3941 = vmatprep.mubr.msk.f32.mxu0 %vm2022_vm5, %v1343_v44  ;;  %v2683_v44 = vld [vmem:[%s5244_s3] sm:$0xff]  ;;  %s1322_s3 = scalar_lea.vmem %s5247_s0, %s4961_s15  ;;  %s1326_s0 = scalar_lea.vmem %s5248_s4, %s4944_s1 }
 0x284   : > { %s5113_s4 = scalar_lea.vmem %s4764_s20, %s4961_s15  ;;  %s5249_s15 = sld [smem:[#allocation46_spill]] }
 0x286   : > { %3942 = vmatmul.mubr.msk.f32.gmra.mxu0 %vm2022_vm5, %v1344_v45  ;;  %v2348_v45 = vld [vmem:[%s5241_s5] sm:$0xff] }
 0x287   : > { %3944 = vmatprep.mubr.msk.f32.mxu0 %vm2022_vm5, %v1345_v48  ;;  %3963 = vmatprep.subr.mxu0 %v2348_v45 }
 0x288   : > { %3964 = vmatpush3.msra.mxu0 %v2348_v45 }
 0x289   : > { %3993 = vmatprep.subr.mxu0 %v4572_v0 }
 0x28a   : > { %3945 = vmatmul.mubr.msk.f32.gmra.mxu0 %vm2022_vm5, %v1346_v49 }
 0x336   : > { %v1760_v54 = vpop.f32.mrf.mxu0 }
 0x337   : > { %v1834_v56 = vadd.f32 %v1833_v46, %v1760_v54  ;;  %v1925_v46 = vlaneseq  ;;  %v3739_v54 = vld [vmem:[#allocation13] ss:$0 sm:$0xff] }
 0x338   : > { %v3909_v57 = vpop.f32.mrf.mxu0 }
 0x339   : > { %v1844_v58 = vadd.f32 %v3725_v55, %v1834_v56  ;;  %v5041_v47 = vshrl.u32 %v1925_v46, 7 }
 0x33a   : > { %v5002_v59 = vpop.f32.mrf.mxu0 }
 0x33b   : > { %vm1845_vm7 = vcmp.ge.f32.partialorder %v1844_v58, 0.0  ;;  %v1846_v60 = vmul.f32 0.01, %v1844_v58  ;;  %v5044_v48 = vsub.s32 0, %v5041_v47 }
 0x33c   : > { %v3923_v61 = vpop.f32.mrf.mxu0 }
 0x33d   : > { %v1847_v63 = vsel %vm1845_vm7, %v1844_v58, %v1846_v60  ;;  %v1928_v49 = vrot.slane %v5002_v59, %v5044_v48 }
 0x33e   : > { %3929 = vmatmul.mubr.msk.f32.vlgmr.msra.gmra.mxu1 %vm1367_vm1, %v1847_v63  ;;  %v3937_v2 = vpop.f32.mrf.mxu0 }
 0x33f   : > { %3948 = vmatpush3.msk.msra.mxu1 %vm2213_vm6, %v2180_v52  ;;  %3949 = vmatprep.mubr.msk.f32.mxu1 %vm2188_vm8, %v1347_v62  ;;  %v2123_v15 = vadd.f32 %v3937_v2, %v3729_v6 }
 0x340   : > { %v2117_v5 = vpop.f32.mrf.mxu0  ;;  %3977 = vmatprep.subr.mxu1 %v2347_v1 }
 0x341   : > { %v2118_v11 = vadd.f32 %v3729_v6, %v2117_v5  ;;  %v2165_v21 = vmul.f32 0.01, %v2123_v15  ;;  %vm2157_vm10 = vcmp.ge.f32.partialorder %v2123_v15, 0.0 }
 0x342   : > { %3950 = vmatmul.mubr.msk.f32.vlgmr.msra.gmra.mxu1 %vm2188_vm8, %v1348_v3  ;;  %v3940_v8 = vpop.f32.mrf.mxu0 }
 0x343   : > { %3952 = vmatprep.mubr.msk.f32.mxu1 %vm2188_vm8, %v1349_v4  ;;  %3978 = vmatpush3.msra.mxu1 %v2347_v1  ;;  %v2164_v17 = vmul.f32 0.01, %v2118_v11  ;;  %vm2156_vm9 = vcmp.ge.f32.partialorder %v2118_v11, 0.0  ;;  %v2133_v22 = vadd.f32 %v3940_v8, %v3729_v6  ;;  %v2173_v26 = vsel %vm2157_vm10, %v2123_v15, %v2165_v21 }
 0x344   : > { %v2127_v12 = vpop.f32.mrf.mxu0  ;;  %3979 = vmatprep.subr.mxu1 %v2346_v7 }
 0x345   : > { %3980 = vmatpush3.msra.mxu1 %v2346_v7  ;;  %v2128_v18 = vadd.f32 %v3729_v6, %v2127_v12  ;;  %v2172_v24 = vsel %vm2156_vm9, %v2118_v11, %v2164_v17  ;;  %v2167_v27 = vmul.f32 0.01, %v2133_v22  ;;  %vm2159_vm12 = vcmp.ge.f32.partialorder %v2133_v22, 0.0  ;;  %v2608_v12 = vld [vmem:[%s5245_s11] sm:$0xff] }
 0x346   : > { %3953 = vmatmul.mubr.msk.f32.gmra.mxu1 %vm2188_vm8, %v1350_v9  ;;  %v3943_v13 = vpop.f32.mrf.mxu0  ;;  %4000 = vmatprep.subr.mxu1 %v4572_v0 }
 0x347   : > { %3955 = vmatprep.mubr.msk.f32.mxu1 %vm2188_vm8, %v1351_v10  ;;  %v2166_v23 = vmul.f32 0.01, %v2128_v18  ;;  %vm2158_vm11 = vcmp.ge.f32.partialorder %v2128_v18, 0.0  ;;  %v2175_v30 = vsel %vm2159_vm12, %v2133_v22, %v2167_v27  ;;  %v2143_v32 = vadd.f32 %v3943_v13, %v3729_v6 }
 0x348   : > { %v2137_v19 = vpop.f32.mrf.mxu0  ;;  %vm2911_vm12 = vcmask 261120  }
 0x349   : > { %v2138_v25 = vadd.f32 %v3729_v6, %v2137_v19  ;;  %v2174_v29 = vsel %vm2158_vm11, %v2128_v18, %v2166_v23  ;;  %v2169_v33 = vmul.f32 0.01, %v2143_v32  ;;  %vm2161_vm14 = vcmp.ge.f32.partialorder %v2143_v32, 0.0 }
 0x34a   : > { %3956 = vmatmul.mubr.msk.f32.gmra.mxu1 %vm2188_vm8, %v1352_v14  ;;  %v3946_v34 = vpop.f32.mrf.mxu0 }
 0x34b   : > { %3958 = vmatprep.mubr.msk.f32.mxu1 %vm2188_vm8, %v1353_v16  ;;  %v2168_v28 = vmul.f32 0.01, %v2138_v25  ;;  %vm2160_vm13 = vcmp.ge.f32.partialorder %v2138_v25, 0.0  ;;  %v2153_v35 = vadd.f32 %v3946_v34, %v3729_v6  ;;  %v2177_v39 = vsel %vm2161_vm14, %v2143_v32, %v2169_v33  ;;  %v2900_v32 = vld [vmem:[%s5246_s7] sm:$0xff]  ;;  %v1356_v34 = vld [vmem:[%s1322_s3 + $0x8] sm:$0xff] }
 0x34c   : > { %v2147_v36 = vpop.f32.mrf.mxu0  ;;  %v4574_v33 = vmov 0  }
 0x34d   : > { %v2176_v31 = vsel %vm2160_vm13, %v2138_v25, %v2168_v28  ;;  %v2148_v37 = vadd.f32 %v3729_v6, %v2147_v36  ;;  %v2171_v38 = vmul.f32 0.01, %v2153_v35  ;;  %vm2163_vm15 = vcmp.ge.f32.partialorder %v2153_v35, 0.0  ;;  %v2609_v6 = vld [vmem:[%s5245_s11 + $0x8] sm:$0xff]  ;;  %4204 = vset.pattern.permute.xlu0 %v4574_v33  ;;  %4205 = vset.pattern.permute.xlu1 %v4574_v33  ;;  %v1357_v36 = vld [vmem:[%s1322_s3 + $0x10] sm:$0xff] }
 0x34e   : > { %3959 = vmatmul.mubr.msk.f32.gmra.mxu1 %vm2188_vm8, %v1354_v20  ;;  %3080 = vperm.xlu0 %4204, %v1356_v34   ;;  %v3767_v33 = vld [vmem:[#allocation15] ss:$0 sm:$0xff] }
 0x34f   : > { %3981 = vmatprep.mubr.msk.f32.mxu1 %vm1367_vm1, %v2172_v24  ;;  %vm2162_vm2 = vcmp.ge.f32.partialorder %v2148_v37, 0.0  ;;  %v2170_v40 = vmul.f32 0.01, %v2148_v37  ;;  %v2179_v42 = vsel %vm2163_vm15, %v2153_v35, %v2171_v38  ;;  %v1355_v35 = vld [vmem:[%s1322_s3] sm:$0xff] }
 0x350   : > { %3075 = vperm.xlu1 %4205, %v1355_v35   ;;  %v1359_v38 = vld [vmem:[%s1322_s3 + $0x20] sm:$0xff] }
 0x351   : > { %v2178_v41 = vsel %vm2162_vm2, %v2148_v37, %v2170_v40  ;;  %v1358_v37 = vld [vmem:[%s1322_s3 + $0x18] sm:$0xff]  ;;  %v1361_v40 = vld [vmem:[%s1322_s3 + $0x30] sm:$0xff] }
 0x352   : > { %3982 = vmatmul.mubr.msk.f32.vlgmr.msra.gmra.mxu1 %vm1367_vm1, %v2173_v26  ;;  %3085 = vperm.xlu0 %4204, %v1357_v36  }
 0x353   : > { %3984 = vmatprep.mubr.msk.f32.mxu1 %vm1367_vm1, %v2174_v29  ;;  %4001 = vmatpush3.msra.mxu1 %v2684_v43  ;;  %v2903_v29 = vld [vmem:[%s5246_s7 + $0x18] sm:$0xff] }
 0x354   : > { %4002 = vmatprep.subr.mxu1 %v4572_v0  ;;  %3090 = vperm.xlu1 %4205, %v1358_v37  }
 0x355   : > { %4003 = vmatpush3.msra.mxu1 %v2683_v44 }
 0x356   : > { %3985 = vmatmul.mubr.msk.f32.gmra.mxu1 %vm1367_vm1, %v2175_v30  ;;  %4027 = vmatprep.subr.mxu1 %v4572_v0  ;;  %v2902_v30 = vld [vmem:[%s5246_s7 + $0x10] sm:$0xff] }
 0x357   : > { %3987 = vmatprep.mubr.msk.f32.mxu1 %vm1367_vm1, %v2176_v31  ;;  %v2901_v31 = vld [vmem:[%s5246_s7 + $0x8] sm:$0xff]  ;;  %3095 = vperm.xlu0 %4204, %v1359_v38  }
 0x35a   : > { %3988 = vmatmul.mubr.msk.f32.gmra.mxu1 %vm1367_vm1, %v2177_v39  ;;  %v1360_v39 = vld [vmem:[%s1322_s3 + $0x28] sm:$0xff] }
 0x35b   : > { %3990 = vmatprep.mubr.msk.f32.mxu1 %vm1367_vm1, %v2178_v41  ;;  %3100 = vperm.xlu1 %4205, %v1360_v39   ;;  %v1362_v41 = vld [vmem:[%s1322_s3 + $0x38] sm:$0xff]  ;;  %s1330_s3 = scalar_lea.vmem %s4759_s14, %s4944_s1 }
 0x35c   : > { %3105 = vperm.xlu0 %4204, %v1361_v40  }
 0x35e   : > { %3991 = vmatmul.mubr.msk.f32.gmra.mxu1 %vm1367_vm1, %v2179_v42  ;;  %v1363_v42 = vld [vmem:[%s1326_s0] sm:$0xff] }
 0x35f   : > { %4004 = vmatprep.mubr.msk.f32.mxu1 %vm4573_vm0, %v4572_v0  ;;  %3110 = vperm.xlu1 %4205, %v1362_v41  }
 0x360   : > { %3179 = vperm.xlu0 %4204, %v1363_v42  }
 0x3fe   : > { %v1998_v50 = vpop.f32.mrf.mxu1 }
 0x3ff   : > { %v1999_v52 = vadd.f32 %v1998_v50, %v1928_v49 }
 0x400   : > { %v3930_v53 = vpop.f32.mrf.mxu1 }
 0x401   : > { %v2009_v55 = vadd.f32 %v3728_v51, %v1999_v52 }
 0x402   : > { %v3951_v56 = vpop.f32.mrf.mxu1 }
 0x403   : > { %vm2010_vm3 = vcmp.ge.f32.partialorder %v2009_v55, 0.0  ;;  %v2011_v57 = vmul.f32 0.01, %v2009_v55  ;;  %v2289_v58 = vadd.f32 %v3951_v56, %v3739_v54 }
 0x404   : > { %v2283_v60 = vpop.f32.mrf.mxu1 }
 0x405   : > { %v2012_v61 = vsel %vm2010_vm3, %v2009_v55, %v2011_v57  ;;  %v2284_v62 = vadd.f32 %v3739_v54, %v2283_v60  ;;  %v2331_v63 = vmul.f32 0.01, %v2289_v58  ;;  %vm2323_vm4 = vcmp.ge.f32.partialorder %v2289_v58, 0.0 }
 0x406   : > { %v3954_v1 = vpop.f32.mrf.mxu1  ;;  %4005 = vmatmul.mubr.msk.f32.vlgmr.msra.gmra.mxu1 %vm1367_vm1, %v2012_v61 }
 0x407   : > { %vm2322_vm5 = vcmp.ge.f32.partialorder %v2284_v62, 0.0  ;;  %v2330_v59 = vmul.f32 0.01, %v2284_v62  ;;  %v2299_v2 = vadd.f32 %v3954_v1, %v3739_v54  ;;  %4035 = vmatprep.mubr.msk.f32.mxu1 %vm4573_vm0, %v4572_v0  ;;  %v2339_v7 = vsel %vm2323_vm4, %v2289_v58, %v2331_v63 }
 0x408   : > { %v2293_v3 = vpop.f32.mrf.mxu1  ;;  %v4575_v58 = vmov 1966171168  }
 0x409   : > { %v2294_v4 = vadd.f32 %v3739_v54, %v2293_v3  ;;  %v2338_v5 = vsel %vm2322_vm5, %v2284_v62, %v2330_v59  ;;  %v2333_v8 = vmul.f32 0.01, %v2299_v2  ;;  %vm2325_vm6 = vcmp.ge.f32.partialorder %v2299_v2, 0.0 }
 0x40a   : > { %v3957_v9 = vpop.f32.mrf.mxu1  ;;  %3965 = vmatprep.mubr.msk.f32.mxu0 %vm1367_vm1, %v2338_v5  ;;  %v2758_v60 = vunpack.c.l.s4 %v4575_v58 }
 0x40b   : > { %vm2324_vm7 = vcmp.ge.f32.partialorder %v2294_v4, 0.0  ;;  %v2332_v10 = vmul.f32 0.01, %v2294_v4  ;;  %v2309_v11 = vadd.f32 %v3957_v9, %v3739_v54  ;;  %3966 = vmatmul.mubr.msk.f32.vlgmr.msra.gmra.mxu0 %vm1367_vm1, %v2339_v7  ;;  %v2341_v18 = vsel %vm2325_vm6, %v2299_v2, %v2333_v8 }
 0x40c   : > { %3994 = vmatpush3.msra.mxu0 %v2609_v6  ;;  %v2303_v13 = vpop.f32.mrf.mxu1  ;;  %v2759_v63 = vunpack.c.0.s8 %v2758_v60 }
 0x40d   : > { %v2304_v14 = vadd.f32 %v3739_v54, %v2303_v13  ;;  %v2340_v15 = vsel %vm2324_vm7, %v2294_v4, %v2332_v10  ;;  %3995 = vmatprep.subr.mxu0 %v4572_v0  ;;  %v2335_v16 = vmul.f32 0.01, %v2309_v11  ;;  %vm2327_vm8 = vcmp.ge.f32.partialorder %v2309_v11, 0.0 }
 0x40e   : > { %v3960_v17 = vpop.f32.mrf.mxu1  ;;  %3968 = vmatprep.mubr.msk.f32.mxu0 %vm1367_vm1, %v2340_v15  ;;  %3996 = vmatpush3.msra.mxu0 %v2608_v12  ;;  %v2762_v2 = vsub.s32 %v2759_v63, %v5041_v47 }
 0x40f   : > { %vm2326_vm9 = vcmp.ge.f32.partialorder %v2304_v14, 0.0  ;;  %v2334_v19 = vmul.f32 0.01, %v2304_v14  ;;  %v2319_v20 = vadd.f32 %v3960_v17, %v3739_v54  ;;  %3969 = vmatmul.mubr.msk.f32.gmra.mxu0 %vm1367_vm1, %v2341_v18  ;;  %v2343_v25 = vsel %vm2327_vm8, %v2309_v11, %v2335_v16  ;;  %4007 = vmatprep.subr.mxu0 %v2903_v29 }
 0x410   : > { %v2313_v21 = vpop.f32.mrf.mxu1 }
 0x411   : > { %v2314_v22 = vadd.f32 %v3739_v54, %v2313_v21  ;;  %v2342_v23 = vsel %vm2326_vm9, %v2304_v14, %v2334_v19  ;;  %v2337_v24 = vmul.f32 0.01, %v2319_v20  ;;  %vm2329_vm10 = vcmp.ge.f32.partialorder %v2319_v20, 0.0 }
 0x412   : > { %3971 = vmatprep.mubr.msk.f32.mxu0 %vm1367_vm1, %v2342_v23  ;;  %v3983_v43 = vpop.f32.mrf.mxu1 }
 0x413   : > { %vm2328_vm11 = vcmp.ge.f32.partialorder %v2314_v22, 0.0  ;;  %v2336_v26 = vmul.f32 0.01, %v2314_v22  ;;  %3972 = vmatmul.mubr.msk.f32.gmra.mxu0 %vm1367_vm1, %v2343_v25  ;;  %v2345_v28 = vsel %vm2329_vm10, %v2319_v20, %v2337_v24 }
 0x414   : > { %v2569_v44 = vpop.f32.mrf.mxu1 }
 0x415   : > { %v2344_v27 = vsel %vm2328_vm11, %v2314_v22, %v2336_v26 }
 0x416   : > { %3974 = vmatprep.mubr.msk.f32.mxu0 %vm1367_vm1, %v2344_v27  ;;  %v3986_v45 = vpop.f32.mrf.mxu1 }
 0x417   : > { %3975 = vmatmul.mubr.msk.f32.gmra.mxu0 %vm1367_vm1, %v2345_v28 }
 0x418   : > { %3997 = vmatprep.mubr.msk.f32.mxu0 %vm4573_vm0, %v4572_v0  ;;  %v2579_v46 = vpop.f32.mrf.mxu1 }
 0x41a   : > { %v3989_v49 = vpop.f32.mrf.mxu1 }
 0x41b   : > { %3998 = vmatmul.mubr.msk.f32.vlgmr.msra.gmra.mxu0 %vm1367_vm1, %v2012_v61 }
 0x41c   : > { %4008 = vmatpush3.msra.mxu0 %v2903_v29  ;;  %v2589_v50 = vpop.f32.mrf.mxu1 }
 0x41d   : > { %4009 = vmatprep.subr.mxu0 %v2902_v30 }
 0x41e   : > { %4010 = vmatpush3.msra.mxu0 %v2902_v30  ;;  %v3992_v51 = vpop.f32.mrf.mxu1 }
 0x41f   : > { %4011 = vmatprep.subr.mxu0 %v2901_v31 }
 0x420   : > { %4012 = vmatpush3.msra.mxu0 %v2901_v31  ;;  %v2599_v52 = vpop.f32.mrf.mxu1 }
 0x421   : > { %4013 = vmatprep.subr.mxu0 %v2900_v32 }
 0x422   : > { %4014 = vmatpush3.msra.mxu0 %v2900_v32 }
 0x4c6   : > { %v5073_v53 = vpop.f32.mrf.mxu1 }
 0x4c8   : > { %v4006_v54 = vpop.f32.mrf.mxu1 }
 0x4cb   : > { %v3967_v55 = vpop.f32.mrf.mxu0 }
 0x4cc   : > { %v2575_v11 = vadd.f32 %v3983_v43, %v3967_v55 }
 0x4cd   : > { %v2440_v56 = vpop.f32.mrf.mxu0 }
 0x4ce   : > { %v2570_v12 = vadd.f32 %v2569_v44, %v2440_v56 }
 0x4cf   : > { %v3970_v57 = vpop.f32.mrf.mxu0 }
 0x4d0   : > { %v2585_v13 = vadd.f32 %v3986_v45, %v3970_v57 }
 0x4d1   : > { %v2450_v61 = vpop.f32.mrf.mxu0 }
 0x4d2   : > { %v2580_v18 = vadd.f32 %v2579_v46, %v2450_v61 }
 0x4d3   : > { %v3973_v62 = vpop.f32.mrf.mxu0 }
 0x4d4   : > { %v2595_v19 = vadd.f32 %v3989_v49, %v3973_v62 }
 0x4d5   : > { %v2460_v1 = vpop.f32.mrf.mxu0 }
 0x4d6   : > { %v2590_v20 = vadd.f32 %v2589_v50, %v2460_v1 }
 0x4d7   : > { %v3976_v59 = vpop.f32.mrf.mxu0 }
 0x4d8   : > { %v2605_v46 = vadd.f32 %v3992_v51, %v3976_v59 }
 0x4d9   : > { %v2470_v3 = vpop.f32.mrf.mxu0 }
 0x4da   : > { %v2600_v25 = vadd.f32 %v2599_v52, %v2470_v3 }
 0x4db   : > { %v2679_v4 = vpop.f32.mrf.mxu0 }
 0x4dc   : > { %v2756_v5 = vcombine.high %v2679_v4, %v2679_v4  ;;  %v2763_v6 = vrot.slane %v2679_v4, %v2762_v2 }
 0x4dd   : > { %v3999_v7 = vpop.f32.mrf.mxu0 }
 0x4de   : > { %v2770_v8 = vrot.slane %v2756_v5, %v2762_v2  ;;  %v2771_v9 = vcombine.high %v2763_v6, %v2763_v6  ;;  %v2779_v10 = vrot.slane %v2763_v6, %v2762_v2 }
 0x4e0   : > { %v2772_v14 = vcombine.high %v2770_v8, %v2770_v8  ;;  %v2786_v15 = vrot.slane %v2770_v8, %v2762_v2  ;;  %v2793_v16 = vrot.slane %v2771_v9, %v2762_v2  ;;  %v2801_v17 = vcombine.high %v2779_v10, %v2779_v10 }
 0x4e1   : > { %v2808_v47 = vrot.slane %v2779_v10, %v5044_v48 }
 0x4e2   : > { %v2800_v21 = vrot.slane %v2772_v14, %v2762_v2  ;;  %v2802_v22 = vcombine.high %v2786_v15, %v2786_v15  ;;  %v2803_v23 = vcombine.high %v2793_v16, %v2793_v16  ;;  %v2812_v24 = vrot.slane %v2793_v16, %v5044_v48  ;;  %v3208_v14 = vld [vmem:[%s4749_s6 + $0x10] sm:$0xff]  ;;  %v3206_v16 = vld [vmem:[%s4749_s6] sm:$0xff] }
 0x4e3   : > { %v2816_v26 = vrot.slane %v2801_v17, %v5044_v48  ;;  %v2824_v27 = vrot.slane %v2786_v15, %v5044_v48  ;;  %v2845_v28 = vadd.f32 %v2808_v47, %v2570_v12  ;;  %v3207_v15 = vld [vmem:[%s4749_s6 + $0x8] sm:$0xff]  ;;  %v3081_v17 = vpop.permute.xlu0 %3080 }
 0x4e4   : > { %v2804_v29 = vcombine.high %v2800_v21, %v2800_v21  ;;  %v2820_v30 = vrot.slane %v2803_v23, %v5044_v48  ;;  %v2828_v31 = vrot.slane %v2800_v21, %v5044_v48  ;;  %v2832_v32 = vrot.slane %v2802_v22, %v5044_v48 }
 0x4e5   : > { %v2846_v34 = vadd.f32 %v2812_v24, %v2575_v11  ;;  %v2847_v35 = vadd.f32 %v2816_v26, %v2580_v18  ;;  %v2849_v36 = vadd.f32 %v2824_v27, %v2590_v20  ;;  %v2853_v37 = vadd.f32 %v2845_v28, %v5073_v53  ;;  %v5108_v18 = vld [vmem:[#allocation16] ss:$0 sm:$0xff]  ;;  %v3076_v20 = vpop.permute.xlu1 %3075 }
 0x4e6   : > { %v2836_v38 = vrot.slane %v2804_v29, %v5044_v48  ;;  %v2848_v39 = vadd.f32 %v2820_v30, %v2585_v13  ;;  %v2850_v40 = vadd.f32 %v2828_v31, %v2595_v19  ;;  %v2851_v41 = vadd.f32 %v2832_v32, %v2600_v25  ;;  %v3209_v13 = vld [vmem:[%s4749_s6 + $0x18] sm:$0xff] }
 0x4e7   : > { %v2854_v42 = vadd.f32 %v2846_v34, %v5073_v53  ;;  %v2868_v43 = vadd.f32 %v3767_v33, %v2853_v37  ;;  %v2855_v44 = vadd.f32 %v2847_v35, %v5073_v53  ;;  %v2857_v45 = vadd.f32 %v2849_v36, %v5073_v53  ;;  %4028 = vmatpush3.msra.mxu1 %v3209_v13  ;;  %v3086_v24 = vpop.permute.xlu0 %3085 }
 0x4e8   : > { %v2856_v49 = vadd.f32 %v2848_v39, %v5073_v53  ;;  %v2858_v50 = vadd.f32 %v2850_v40, %v5073_v53  ;;  %v2859_v57 = vadd.f32 %v2851_v41, %v5073_v53  ;;  %v2852_v58 = vadd.f32 %v2836_v38, %v2605_v46  ;;  %4029 = vmatprep.subr.mxu1 %v4572_v0 }
 0x4e9   : > { %vm2876_vm13 = vcmp.ge.f32.partialorder %v2868_v43, 0.0  ;;  %v2884_v52 = vmul.f32 0.01, %v2868_v43  ;;  %v2869_v54 = vadd.f32 %v3767_v33, %v2854_v42  ;;  %v2870_v48 = vadd.f32 %v3767_v33, %v2855_v44  ;;  %4030 = vmatpush3.msra.mxu1 %v3208_v14  ;;  %v3091_v31 = vpop.permute.xlu1 %3090 }
 0x4ea   : > { %v2871_v55 = vadd.f32 %v3767_v33, %v2856_v49  ;;  %v2872_v56 = vadd.f32 %v3767_v33, %v2857_v45  ;;  %v2873_v1 = vadd.f32 %v3767_v33, %v2858_v50  ;;  %v2874_v3 = vadd.f32 %v3767_v33, %v2859_v57  ;;  %4031 = vmatprep.subr.mxu1 %v4572_v0 }
 0x4eb   : > { %v2892_v60 = vsel %vm2876_vm13, %v2868_v43, %v2884_v52  ;;  %vm2877_vm14 = vcmp.ge.f32.partialorder %v2869_v54, 0.0  ;;  %v2885_v61 = vmul.f32 0.01, %v2869_v54  ;;  %vm2878_vm15 = vcmp.ge.f32.partialorder %v2870_v48, 0.0  ;;  %4032 = vmatpush3.msra.mxu1 %v3207_v15  ;;  %v3096_v41 = vpop.permute.xlu0 %3095 }
 0x4ec   : > { %4015 = vmatprep.mubr.msk.f32.mxu0 %vm2911_vm12, %v2892_v60  ;;  %v2886_v51 = vmul.f32 0.01, %v2870_v48  ;;  %v2887_v63 = vmul.f32 0.01, %v2871_v55  ;;  %vm2879_vm2 = vcmp.ge.f32.partialorder %v2871_v55, 0.0  ;;  %vm2880_vm3 = vcmp.ge.f32.partialorder %v2872_v56, 0.0  ;;  %4033 = vmatprep.subr.mxu1 %v4572_v0 }
 0x4ed   : > { %v2893_v62 = vsel %vm2877_vm14, %v2869_v54, %v2885_v61  ;;  %v2888_v2 = vmul.f32 0.01, %v2872_v56  ;;  %v2860_v4 = vadd.f32 %v2852_v58, %v5073_v53  ;;  %v2889_v6 = vmul.f32 0.01, %v2873_v1  ;;  %4034 = vmatpush3.msra.mxu1 %v3206_v16  ;;  %v3101_v60 = vpop.permute.xlu1 %3100 }
 0x4ee   : > { %4016 = vmatmul.mubr.msk.f32.vlgmr.msra.gmra.mxu0 %vm2911_vm12, %v2893_v62  ;;  %v2894_v59 = vsel %vm2878_vm15, %v2870_v48, %v2886_v51  ;;  %v2895_v5 = vsel %vm2879_vm2, %v2871_v55, %v2887_v63  ;;  %vm2881_vm4 = vcmp.ge.f32.partialorder %v2873_v1, 0.0  ;;  %v2890_v9 = vmul.f32 0.01, %v2874_v3  ;;  %4038 = vmatprep.subr.mxu1 %v4572_v0 }
 0x4ef   : > { %4018 = vmatprep.mubr.msk.f32.mxu0 %vm2911_vm12, %v2894_v59  ;;  %v2875_v7 = vadd.f32 %v3767_v33, %v2860_v4  ;;  %v2896_v8 = vsel %vm2880_vm3, %v2872_v56, %v2888_v2  ;;  %vm2882_vm5 = vcmp.ge.f32.partialorder %v2874_v3, 0.0  ;;  %v2897_v10 = vsel %vm2881_vm4, %v2873_v1, %v2889_v6  ;;  %v3106_v6 = vpop.permute.xlu0 %3105 }
 0x4f0   : > { %v2898_v53 = vsel %vm2882_vm5, %v2874_v3, %v2890_v9  ;;  %vm3219_vm2 = vcmask 1041409   ;;  %vm3222_vm3 = vcmask 1042434   ;;  %vm3225_vm4 = vcmask 1043459  }
 0x4f1   : > { %v2891_v11 = vmul.f32 0.01, %v2875_v7  ;;  %vm2883_vm6 = vcmp.ge.f32.partialorder %v2875_v7, 0.0  ;;  %vm3228_vm5 = vcmask 1044484  }
 0x4f2   : > { %4019 = vmatmul.mubr.msk.f32.gmra.mxu0 %vm2911_vm12, %v2895_v5 }
 0x4f3   : > { %4021 = vmatprep.mubr.msk.f32.mxu0 %vm2911_vm12, %v2896_v8  ;;  %v2899_v12 = vsel %vm2883_vm6, %v2875_v7, %v2891_v11  ;;  %vm3231_vm6 = vcmask 1045509  }
 0x4f6   : > { %4022 = vmatmul.mubr.msk.f32.gmra.mxu0 %vm2911_vm12, %v2897_v10 }
 0x4f7   : > { %4024 = vmatprep.mubr.msk.f32.mxu0 %vm2911_vm12, %v2898_v53 }
 0x4fa   : > { %4025 = vmatmul.mubr.msk.f32.gmra.mxu0 %vm2911_vm12, %v2899_v12 }
 0x5ae   : > { %v4017_v19 = vpop.f32.mrf.mxu0 }
 0x5af   : > { %v3008_v47 = vadd.f32 %v4017_v19, %v5108_v18  ;;  %v3111_v19 = vpop.permute.xlu1 %3110 }
 0x5b0   : > { %v3002_v21 = vpop.f32.mrf.mxu0 }
 0x5b1   : > { %vm3042_vm7 = vcmp.ge.f32.partialorder %v3008_v47, 0.0  ;;  %v3050_v22 = vmul.f32 0.01, %v3008_v47  ;;  %v3003_v23 = vadd.f32 %v5108_v18, %v3002_v21 }
 0x5b2   : > { %v4020_v25 = vpop.f32.mrf.mxu0 }
 0x5b3   : > { %v3058_v26 = vsel %vm3042_vm7, %v3008_v47, %v3050_v22  ;;  %vm3041_vm8 = vcmp.ge.f32.partialorder %v3003_v23, 0.0  ;;  %v3049_v27 = vmul.f32 0.01, %v3003_v23  ;;  %v3018_v28 = vadd.f32 %v4020_v25, %v5108_v18 }
 0x5b4   : > { %3066 = vst.msk [vmem:[%s5113_s4 + $0x8] sm:$0xff] %vm2911_vm12, %v3058_v26  ;;  %v3114_v29 = vmul.f32 %v3081_v17, %v3058_v26  ;;  %v3012_v30 = vpop.f32.mrf.mxu0  ;;  %vm3234_vm7 = vcmask 1046534  }
 0x5b5   : > { %v3057_v32 = vsel %vm3041_vm8, %v3003_v23, %v3049_v27  ;;  %vm3044_vm9 = vcmp.ge.f32.partialorder %v3018_v28, 0.0  ;;  %v3052_v33 = vmul.f32 0.01, %v3018_v28  ;;  %v3013_v34 = vadd.f32 %v5108_v18, %v3012_v30 }
 0x5b6   : > { %v3128_v35 = vsel %vm2911_vm12, %v3114_v29, 0.0  ;;  %3065 = vst.msk [vmem:[%s5113_s4] sm:$0xff] %vm2911_vm12, %v3057_v32  ;;  %v3113_v36 = vmul.f32 %v3076_v20, %v3057_v32  ;;  %v4023_v37 = vpop.f32.mrf.mxu0  ;;  %vm3237_vm8 = vcmask 1047559  }
 0x5b7   : > { %v3129_v38 = vrot.slane %v3128_v35, 4  ;;  %v3060_v39 = vsel %vm3044_vm9, %v3018_v28, %v3052_v33  ;;  %vm3043_vm10 = vcmp.ge.f32.partialorder %v3013_v34, 0.0  ;;  %v3051_v40 = vmul.f32 0.01, %v3013_v34 }
 0x5b8   : > { %v3121_v42 = vsel %vm2911_vm12, %v3113_v36, 0.0  ;;  %3068 = vst.msk [vmem:[%s5113_s4 + $0x18] sm:$0xff] %vm2911_vm12, %v3060_v39  ;;  %v3116_v43 = vmul.f32 %v3091_v31, %v3060_v39  ;;  %v3028_v44 = vadd.f32 %v4023_v37, %v5108_v18  ;;  %v3022_v45 = vpop.f32.mrf.mxu0 }
 0x5b9   : > { %v3130_v46 = vadd.f32 %v3129_v38, %v3128_v35  ;;  %v3122_v49 = vrot.slane %v3121_v42, 4  ;;  %v3059_v50 = vsel %vm3043_vm10, %v3013_v34, %v3051_v40  ;;  %v3023_v52 = vadd.f32 %v5108_v18, %v3022_v45 }
 0x5ba   : > { %v3142_v54 = vsel %vm2911_vm12, %v3116_v43, 0.0  ;;  %3067 = vst.msk [vmem:[%s5113_s4 + $0x10] sm:$0xff] %vm2911_vm12, %v3059_v50  ;;  %v3115_v48 = vmul.f32 %v3086_v24, %v3059_v50  ;;  %vm3046_vm11 = vcmp.ge.f32.partialorder %v3028_v44, 0.0  ;;  %v3054_v55 = vmul.f32 0.01, %v3028_v44  ;;  %v4026_v56 = vpop.f32.mrf.mxu0  ;;  %v5142_v24 = vpop.permute.xlu0 %3179 }
 0x5bb   : > { %v3131_v57 = vrot.slane %v3130_v46, 2  ;;  %v3123_v58 = vadd.f32 %v3122_v49, %v3121_v42  ;;  %v3143_v61 = vrot.slane %v3142_v54, 4  ;;  %vm3045_vm13 = vcmp.ge.f32.partialorder %v3023_v52, 0.0 }
 0x5bc   : > { %v3135_v51 = vsel %vm2911_vm12, %v3115_v48, 0.0  ;;  %v3062_v62 = vsel %vm3046_vm11, %v3028_v44, %v3054_v55  ;;  %v3053_v63 = vmul.f32 0.01, %v3023_v52  ;;  %v3038_v1 = vadd.f32 %v4026_v56, %v5108_v18  ;;  %v3032_v5 = vpop.f32.mrf.mxu0 }
 0x5bd   : > { %v3132_v59 = vadd.f32 %v3131_v57, %v3130_v46  ;;  %v3124_v2 = vrot.slane %v3123_v58, 2  ;;  %v3144_v3 = vadd.f32 %v3143_v61, %v3142_v54  ;;  %v3136_v4 = vrot.slane %v3135_v51, 4  ;;  %3070 = vst.msk [vmem:[%s5113_s4 + $0x28] sm:$0xff] %vm2911_vm12, %v3062_v62 }
 0x5be   : > { %v3118_v7 = vmul.f32 %v3101_v60, %v3062_v62  ;;  %v3061_v8 = vsel %vm3045_vm13, %v3023_v52, %v3053_v63  ;;  %vm3048_vm14 = vcmp.ge.f32.partialorder %v3038_v1, 0.0  ;;  %v3056_v9 = vmul.f32 0.01, %v3038_v1 }
 0x5bf   : > { %v3145_v10 = vrot.slane %v3144_v3, 2  ;;  %v3137_v11 = vadd.f32 %v3136_v4, %v3135_v51  ;;  %3069 = vst.msk [vmem:[%s5113_s4 + $0x20] sm:$0xff] %vm2911_vm12, %v3061_v8  ;;  %v3117_v12 = vmul.f32 %v3096_v41, %v3061_v8  ;;  %v3033_v14 = vadd.f32 %v5108_v18, %v3032_v5 }
 0x5c0   : > { %v3156_v53 = vsel %vm2911_vm12, %v3118_v7, 0.0  ;;  %v3064_v13 = vsel %vm3048_vm14, %v3038_v1, %v3056_v9  ;;  %v3133_v15 = vrot.slane %v3132_v59, 1  ;;  %v3125_v16 = vadd.f32 %v3124_v2, %v3123_v58 }
 0x5c1   : > { %v3138_v17 = vrot.slane %v3137_v11, 2  ;;  %3072 = vst.msk [vmem:[%s5113_s4 + $0x38] sm:$0xff] %vm2911_vm12, %v3064_v13  ;;  %v3157_v20 = vrot.slane %v3156_v53, 4  ;;  %v3149_v47 = vsel %vm2911_vm12, %v3117_v12, 0.0  ;;  %v3120_v21 = vmul.f32 %v3111_v19, %v3064_v13 }
 0x5c2   : > { %v3146_v22 = vadd.f32 %v3145_v10, %v3144_v3  ;;  %vm3047_vm15 = vcmp.ge.f32.partialorder %v3033_v14, 0.0  ;;  %v3150_v26 = vrot.slane %v3149_v47, 4  ;;  %v3055_v27 = vmul.f32 0.01, %v3033_v14 }
 0x5c3   : > { %v3139_v23 = vadd.f32 %v3138_v17, %v3137_v11  ;;  %v3158_v25 = vadd.f32 %v3157_v20, %v3156_v53  ;;  %v3170_v18 = vsel %vm2911_vm12, %v3120_v21, 0.0  ;;  %v3134_v28 = vadd.f32 %v3133_v15, %v3132_v59 }
 0x5c4   : > { %v3126_v29 = vrot.slane %v3125_v16, 1  ;;  %v3151_v32 = vadd.f32 %v3150_v26, %v3149_v47  ;;  %v3171_v33 = vrot.slane %v3170_v18, 4  ;;  %v3063_v34 = vsel %vm3047_vm15, %v3033_v14, %v3055_v27  ;;  %v3205_v26 = vld [vmem:[%s5249_s15 + $0x8] sm:$0xff]  ;;  %v4206_v27 = vld [vmem:[%s4950_s2] sm:$0xff] }
 0x5c5   : > { %v3140_v30 = vrot.slane %v3139_v23, 1  ;;  %v3159_v31 = vrot.slane %v3158_v25, 2  ;;  %v3147_v35 = vrot.slane %v3146_v22, 1  ;;  %v3181_v37 = vrot.slane %v5142_v24, 1  ;;  %3071 = vst.msk [vmem:[%s5113_s4 + $0x30] sm:$0xff] %vm2911_vm12, %v3063_v34 }
 0x5c6   : > { %v3119_v38 = vmul.f32 %v3106_v6, %v3063_v34  ;;  %v3182_v39 = vrot.slane %v5142_v24, 2  ;;  %v3152_v41 = vrot.slane %v3151_v32, 2  ;;  %v3172_v42 = vadd.f32 %v3171_v33, %v3170_v18 }
 0x5c7   : > { %v3141_v36 = vadd.f32 %v3140_v30, %v3139_v23  ;;  %v3160_v40 = vadd.f32 %v3159_v31, %v3158_v25  ;;  %v3127_v43 = vadd.f32 %v3126_v29, %v3125_v16  ;;  %v3197_v44 = vmul.f32 %v3181_v37, %v3134_v28  ;;  %v3779_v31 = vld [vmem:[#allocation18] ss:$0 sm:$0xff] }
 0x5c8   : > { %v3163_v45 = vsel %vm2911_vm12, %v3119_v38, 0.0  ;;  %v3153_v49 = vadd.f32 %v3152_v41, %v3151_v32  ;;  %v3173_v50 = vrot.slane %v3172_v42, 2  ;;  %v3148_v54 = vadd.f32 %v3147_v35, %v3146_v22 }
 0x5c9   : > { %v3198_v46 = vmul.f32 %v3182_v39, %v3141_v36  ;;  %v3164_v52 = vrot.slane %v3163_v45, 4  ;;  %v3161_v48 = vrot.slane %v3160_v40, 1  ;;  %v3183_v55 = vrot.slane %v5142_v24, 3 }
 0x5ca   : > { %v3154_v56 = vrot.slane %v3153_v49, 1  ;;  %v3174_v57 = vadd.f32 %v3173_v50, %v3172_v42  ;;  %v3184_v60 = vrot.slane %v5142_v24, 4  ;;  %v3196_v61 = vmul.f32 %v5142_v24, %v3127_v43 }
 0x5cb   : > { %v3165_v58 = vadd.f32 %v3164_v52, %v3163_v45  ;;  %v3218_v51 = vrot.slane %v3197_v44, 7  ;;  %v3221_v62 = vrot.slane %v3198_v46, 6  ;;  %v3199_v2 = vmul.f32 %v3183_v55, %v3148_v54 }
 0x5cc   : > { %v3155_v63 = vadd.f32 %v3154_v56, %v3153_v49  ;;  %v3175_v1 = vrot.slane %v3174_v57, 1  ;;  %v3162_v3 = vadd.f32 %v3161_v48, %v3160_v40  ;;  %v3185_v6 = vrot.slane %v5142_v24, 5 }
 0x5cd   : > { %v3166_v59 = vrot.slane %v3165_v58, 2  ;;  %v3220_v8 = vsel %vm3219_vm2, %v3218_v51, %v3196_v61  ;;  %v3224_v53 = vrot.slane %v3199_v2, 5  ;;  %v3187_v13 = vrot.slane %v5142_v24, 7 }
 0x5ce   : > { %v3200_v4 = vmul.f32 %v3184_v60, %v3155_v63  ;;  %v3176_v7 = vadd.f32 %v3175_v1, %v3174_v57  ;;  %v3223_v11 = vsel %vm3222_vm3, %v3221_v62, %v3220_v8  ;;  %v3201_v12 = vmul.f32 %v3185_v6, %v3162_v3 }
 0x5cf   : > { %v3167_v5 = vadd.f32 %v3166_v59, %v3165_v58  ;;  %v3186_v15 = vrot.slane %v5142_v24, 6  ;;  %v3226_v17 = vsel %vm3225_vm4, %v3224_v53, %v3223_v11  ;;  %v3204_v24 = vld [vmem:[%s5249_s15] sm:$0xff] }
 0x5d0   : > { %v3227_v9 = vrot.slane %v3200_v4, 4  ;;  %v3203_v16 = vmul.f32 %v3187_v13, %v3176_v7  ;;  %v3230_v47 = vrot.slane %v3201_v12, 3 }
 0x5d1   : > { %v3168_v10 = vrot.slane %v3167_v5, 1 }
 0x5d2   : > { %v3229_v20 = vsel %vm3228_vm5, %v3227_v9, %v3226_v17  ;;  %v3236_v23 = vrot.slane %v3203_v16, 1 }
 0x5d3   : > { %v3169_v14 = vadd.f32 %v3168_v10, %v3167_v5  ;;  %v3232_v22 = vsel %vm3231_vm6, %v3230_v47, %v3229_v20 }
 0x5d5   : > { %v3202_v19 = vmul.f32 %v3186_v15, %v3169_v14 }
 0x5d7   : > { %v3233_v21 = vrot.slane %v3202_v19, 2 }
 0x5d9   : > { %v3235_v25 = vsel %vm3234_vm7, %v3233_v21, %v3232_v22 }
 0x5da   : > { %v3238_v18 = vsel %vm3237_vm8, %v3236_v23, %v3235_v25 }
 0x5db   : > { %4036 = vmatmul.mubr.msk.f32.vlgmr.msra.gmra.mxu1 %vm2911_vm12, %v3238_v18 }
 0x5dc   : > { %4039 = vmatpush3.msra.mxu1 %v3205_v26  ;;  %4042 = vmatprep.mubr.msk.f32.mxu1 %vm4573_vm0, %v4572_v0 }
 0x5dd   : > { %4040 = vmatprep.subr.mxu1 %v4572_v0 }
 0x5de   : > { %4041 = vmatpush3.msra.mxu1 %v3204_v24 }
 0x5df   : > { %4043 = vmatmul.mubr.msk.f32.vlgmr.msra.gmra.mxu1 %vm1367_vm1, %v4206_v27 }
 0x69b   : > { %v3307_v28 = vpop.f32.mrf.mxu1 }
 0x69d   : > { %v4037_v29 = vpop.f32.mrf.mxu1 }
 0x69f   : > { %v3377_v30 = vpop.f32.mrf.mxu1 }
 0x6a0   : > { %v3378_v32 = vadd.f32 %v3377_v30, %v3307_v28 }
 0x6a1   : > { %v4044_v33 = vpop.f32.mrf.mxu1 }
 0x6a2   : > { %v3388_v34 = vadd.f32 %v3779_v31, %v3378_v32 }
 0x6a4   : > { %vm3389_vm9 = vcmp.ge.f32.partialorder %v3388_v34, 0.0  ;;  %v3390_v35 = vmul.f32 0.01, %v3388_v34 }
 0x6a6   : > { %v3391_v36 = vsel %vm3389_vm9, %v3388_v34, %v3390_v35 }
 0x6a7   : > { %3392 = vst.msk [vmem:[%s1330_s3] sm:$0xff] %vm2911_vm12, %v3391_v36 }
 0x6a8 PF: > { %s90_s28 = sadd.s32 1, %s4523_s28  }
 0x6a9   : > { %p87_p4 = scmp.ge.s32.totalorder %s90_s28, 4  }
 0x6ab   :  { %89 = sbr.rel (!%p87_p4) target bundleno = 66 (0x42), region = 298 }
 0x6b0   :  { %3428 = vsyncpa [#allocation3], 1 }
 0x6b1   :  { %3430 = vsyncpa [#allocation3 + $0x1], 1 }
 0x6b2   :  { %3431 = vsyncpa [#allocation5], 1 }
 0x6b3   :  { %3432 = vsyncpa [#allocation8], 1 }
 0x6b4   :  { %3433 = vsyncpa [#allocation11], 1 }
 0x6b5   :  { %3434 = vsyncpa [#allocation14], 1 }
 0x6b6   :  { %3435 = vsyncpa [#allocation17], 1 }

// kernel: _lambda_.8
= control target key start
LH: loop header
LB: loop body
LE: loop exit
PB: predicated region body
PF: predicated region fallthrough
CT: control target
= control target key end

     0   :  { %s1145_s30 = smov 0   ;;  %s1444_s0 = inlined_call_operand.vmem [shape: f32[2,28,138], index: 0, kind: input, shape index: {}]   ;;  %s1445_s1 = inlined_call_operand.vmem [shape: f32[138,32], index: 1, kind: input, shape index: {}]   ;;  %s1446_s2 = inlined_call_operand.vmem [shape: f32[1,32], index: 2, kind: input, shape index: {}]   ;;  %s1447_s3 = inlined_call_operand.vmem [shape: f32[32,16], index: 3, kind: input, shape index: {}]   ;;  %s1448_s4 = inlined_call_operand.vmem [shape: f32[1,16], index: 4, kind: input, shape index: {}]   ;;  %s1449_s5 = inlined_call_operand.vmem [shape: f32[138,10], index: 5, kind: input, shape index: {}]   ;;  %s1450_s6 = inlined_call_operand.vmem [shape: f32[32,10], index: 6, kind: input, shape index: {}]   ;;  %s1451_s7 = inlined_call_operand.vmem [shape: f32[16,10], index: 7, kind: input, shape index: {}]   ;;  %s1452_s8 = inlined_call_operand.vmem [shape: f32[1,10], index: 8, kind: input, shape index: {}]   ;;  %s1453_s9 = inlined_call_operand.vmem [shape: f32[2,28,10], index: 9, kind: output, shape index: {}]  }
   0x1 LB: > { %s971_s10 = sadd.s32 4294967295, %s1092_s30   ;;  %p975_p0 = scmp.ge.s32.totalorder %s1092_s30, 1  ;;  %s1092_s30 = sphi %s1145_s30, %s19_s30  }
   0x2   : > { %p287_p1 = scmp.lt.s32.totalorder %s1092_s30, 3 }
   0x4   : > { %p288_p2 = pnand %p975_p0, %p287_p1 }
   0x5   : > { %p323_p3 = scmp.lt.s32.totalorder (!%p288_p2), %s971_s10, 1 }
   0x6   : > { %291 = sbr.rel (%p288_p2) target bundleno = 703 (0x2bf), region = 56 }
   0xb   : > { %v374_v0 = vld [vmem:[%s1445_s1 + $0x78] sm:$0xff]  ;;  %v1094_v1 = vmov 0.0   ;;  %v373_v2 = vld [vmem:[%s1445_s1 + $0x70] sm:$0xff]  ;;  %s1455_s10 = smov (!%p323_p3, %s971_s10), 1  ;;  %v372_v3 = vld [vmem:[%s1445_s1 + $0x68] sm:$0xff]  ;;  %vm384_vm0 = vcmask 80896  }
   0xc   : > { %401 = vmatprep.subr.mxu0 %v1094_v1  ;;  %s1007_s17 = sshll.u32 %s1455_s10, 6  ;;  %v371_v4 = vld [vmem:[%s1445_s1 + $0x60] sm:$0xff]  ;;  %v370_v6 = vld [vmem:[%s1445_s1 + $0x58] sm:$0xff]  ;;  %v369_v7 = vld [vmem:[%s1445_s1 + $0x50] sm:$0xff]  ;;  %vm397_vm1 = vcmask 1041408   ;;  %vm502_vm3 = vcmask 261120  }
   0xd   : > { %402 = vmatpush1.msra.mxu0 %v374_v0  ;;  %s1174_s22 = scalar_lea.vmem %s1444_s0, %s1007_s17  ;;  %v368_v8 = vld [vmem:[%s1445_s1 + $0x48] sm:$0xff]  ;;  %v367_v9 = vld [vmem:[%s1445_s1 + $0x40] sm:$0xff]  ;;  %v366_v10 = vld [vmem:[%s1445_s1 + $0x38] sm:$0xff]  ;;  %vm798_vm9 = vcmask 130048   ;;  %s1008_s17 = sshll.u32 %s1455_s10, 5  ;;  %vm914_vm12 = vcmask 76800  }
   0xe   : > { %403 = vmatprep.subr.mxu0 %v1094_v1  ;;  %v1177_v5 = vld [vmem:[%s1174_s22 + $0x8] sm:$0xff]  ;;  %v365_v11 = vld [vmem:[%s1445_s1 + $0x30] sm:$0xff]  ;;  %v363_v13 = vld [vmem:[%s1445_s1 + $0x20] sm:$0xff]  ;;  %s332_s21 = scalar_lea.vmem %s1453_s9, %s1008_s17 }
   0xf   : > { %404 = vmatpush1.msra.mxu0 %v373_v2  ;;  %982 = vmatprep.mubr.msk.f32.mxu0 %vm384_vm0, %v1177_v5  ;;  %v364_v12 = vld [vmem:[%s1445_s1 + $0x28] sm:$0xff]  ;;  %v362_v14 = vld [vmem:[%s1445_s1 + $0x18] sm:$0xff]  ;;  %v361_v15 = vld [vmem:[%s1445_s1 + $0x10] sm:$0xff] }
  0x10   : > { %405 = vmatprep.subr.mxu0 %v1094_v1  ;;  %v360_v16 = vld [vmem:[%s1445_s1 + $0x8] sm:$0xff]  ;;  %v359_v17 = vld [vmem:[%s1445_s1] sm:$0xff]  ;;  %v1243_v21 = vld [vmem:[%s1174_s22 + $0x18] sm:$0xff] }
  0x11   : > { %406 = vmatpush1.msra.mxu0 %v372_v3  ;;  %v376_v18 = vld [vmem:[%s1445_s1 + $0x88] sm:$0x3]  ;;  %v375_v19 = vld [vmem:[%s1445_s1 + $0x80] sm:$0xff]  ;;  %v1249_v22 = vld [vmem:[%s1174_s22 + $0x10] sm:$0xff] }
  0x12   : > { %407 = vmatprep.subr.mxu0 %v1094_v1  ;;  %v1239_v20 = vld [vmem:[%s1174_s22] sm:$0xff]  ;;  %v1252_v23 = vld [vmem:[%s1174_s22 + $0x28] sm:$0xff]  ;;  %v1261_v25 = vld [vmem:[%s1174_s22 + $0x38] sm:$0xf] }
  0x13   : > { %408 = vmatpush1.msra.mxu0 %v371_v4  ;;  %v1258_v24 = vld [vmem:[%s1174_s22 + $0x20] sm:$0xff]  ;;  %v1267_v26 = vld [vmem:[%s1174_s22 + $0x30] sm:$0xf]  ;;  %v501_v27 = vld [vmem:[%s1450_s6 + $0x18] sm:$0xff] }
  0x14   : > { %409 = vmatprep.subr.mxu0 %v1094_v1  ;;  %1031 = vmatprep.subr.mxu1 %v501_v27  ;;  %v1276_v28 = vld [vmem:[%s1447_s3 + $0x18] sm:$0xff]  ;;  %v500_v29 = vld [vmem:[%s1450_s6 + $0x10] sm:$0xff]  ;;  %v499_v31 = vld [vmem:[%s1450_s6 + $0x8] sm:$0xff] }
  0x15   : > { %410 = vmatpush1.msra.mxu0 %v370_v6  ;;  %1032 = vmatpush3.msra.mxu1 %v501_v27  ;;  %v1286_v30 = vld [vmem:[%s1447_s3 + $0x10] sm:$0xff]  ;;  %v1296_v32 = vld [vmem:[%s1447_s3 + $0x8] sm:$0xff]  ;;  %v498_v33 = vld [vmem:[%s1450_s6] sm:$0xff] }
  0x16   : > { %411 = vmatprep.subr.mxu0 %v1094_v1  ;;  %1033 = vmatprep.subr.mxu1 %v500_v29  ;;  %v1306_v34 = vld [vmem:[%s1447_s3] sm:$0xff]  ;;  %v356_v45 = vld [vmem:[%s1449_s5 + $0x78] sm:$0xff]  ;;  %v355_v49 = vld [vmem:[%s1449_s5 + $0x70] sm:$0xff] }
  0x17   : > { %412 = vmatpush1.msra.mxu0 %v369_v7  ;;  %1034 = vmatpush3.msra.mxu1 %v500_v29  ;;  %v980_v35 = vld [vmem:[%s1446_s2] ss:$0 sm:$0xff]  ;;  %v354_v52 = vld [vmem:[%s1449_s5 + $0x68] sm:$0xff]  ;;  %v352_v59 = vld [vmem:[%s1449_s5 + $0x58] sm:$0xff] }
  0x18   : > { %413 = vmatprep.subr.mxu0 %v1094_v1  ;;  %1035 = vmatprep.subr.mxu1 %v499_v31  ;;  %v353_v56 = vld [vmem:[%s1449_s5 + $0x60] sm:$0xff]  ;;  %v351_v61 = vld [vmem:[%s1449_s5 + $0x50] sm:$0xff]  ;;  %v350_v62 = vld [vmem:[%s1449_s5 + $0x48] sm:$0xff] }
  0x19   : > { %414 = vmatpush1.msra.mxu0 %v368_v8  ;;  %1036 = vmatpush3.msra.mxu1 %v499_v31  ;;  %v349_v63 = vld [vmem:[%s1449_s5 + $0x40] sm:$0xff]  ;;  %v348_v0 = vld [vmem:[%s1449_s5 + $0x38] sm:$0xff]  ;;  %v347_v2 = vld [vmem:[%s1449_s5 + $0x30] sm:$0xff] }
  0x1a   : > { %415 = vmatprep.subr.mxu0 %v1094_v1  ;;  %1037 = vmatprep.subr.mxu1 %v498_v33  ;;  %v346_v3 = vld [vmem:[%s1449_s5 + $0x28] sm:$0xff]  ;;  %v345_v4 = vld [vmem:[%s1449_s5 + $0x20] sm:$0xff]  ;;  %v343_v6 = vld [vmem:[%s1449_s5 + $0x10] sm:$0xff] }
  0x1b   : > { %416 = vmatpush1.msra.mxu0 %v367_v9  ;;  %1038 = vmatpush3.msra.mxu1 %v498_v33  ;;  %v342_v7 = vld [vmem:[%s1449_s5 + $0x8] sm:$0xff]  ;;  %v341_v8 = vld [vmem:[%s1449_s5] sm:$0xff] }
  0x1c   : > { %417 = vmatprep.subr.mxu0 %v1094_v1  ;;  %603 = vmatprep.subr.mxu1 %v1094_v1  ;;  %v358_v9 = vld [vmem:[%s1449_s5 + $0x88] sm:$0x3] }
  0x1d   : > { %418 = vmatpush1.msra.mxu0 %v366_v10  ;;  %v357_v10 = vld [vmem:[%s1449_s5 + $0x80] sm:$0xff] }
  0x1e   : > { %419 = vmatprep.subr.mxu0 %v1094_v1 }
  0x1f   : > { %420 = vmatpush1.msra.mxu0 %v365_v11  ;;  %v796_v11 = vld [vmem:[%s1451_s7] sm:$0xff] }
  0x20   : > { %421 = vmatprep.subr.mxu0 %v1094_v1 }
  0x21   : > { %422 = vmatpush1.msra.mxu0 %v364_v12  ;;  %v995_v12 = vld [vmem:[%s1448_s4] ss:$0 sm:$0xff] }
  0x22   : > { %423 = vmatprep.subr.mxu0 %v1094_v1 }
  0x23   : > { %424 = vmatpush1.msra.mxu0 %v363_v13 }
  0x24   : > { %425 = vmatprep.subr.mxu0 %v1094_v1 }
  0x25   : > { %426 = vmatpush1.msra.mxu0 %v362_v14 }
  0x26   : > { %427 = vmatprep.subr.mxu0 %v1094_v1 }
  0x27   : > { %428 = vmatpush1.msra.mxu0 %v361_v15 }
  0x28   : > { %429 = vmatprep.subr.mxu0 %v1094_v1 }
  0x29   : > { %430 = vmatpush1.msra.mxu0 %v360_v16 }
  0x2a   : > { %431 = vmatprep.subr.mxu0 %v1094_v1 }
  0x2b   : > { %432 = vmatpush1.msra.mxu0 %v359_v17 }
  0x2c   : > { %461 = vmatprep.subr.mxu0 %v1094_v1 }
  0x2d   : > { %981 = vmatpush2.msk.msra.mxu0 %vm397_vm1, %v376_v18 }
  0x2e   : > { %463 = vmatprep.subr.mxu0 %v1094_v1 }
  0x2f   : > { %464 = vmatpush2.msra.mxu0 %v375_v19 }
  0x30   : > { %466 = vmatmul.mubr.f32.vlgmr.msra.gmra.mxu0 %v1239_v20  ;;  %1045 = vmatprep.subr.mxu0 %v1276_v28 }
  0x31   : > { %983 = vmatprep.mubr.msk.f32.mxu0 %vm384_vm0, %v1243_v21  ;;  %1046 = vmatpush3.msra.mxu0 %v1276_v28 }
  0x32   : > { %1047 = vmatprep.subr.mxu0 %v1286_v30 }
  0x33   : > { %1048 = vmatpush3.msra.mxu0 %v1286_v30 }
  0x34   : > { %471 = vmatmul.mubr.f32.gmra.mxu0 %v1249_v22  ;;  %1049 = vmatprep.subr.mxu0 %v1296_v32 }
  0x35   : > { %984 = vmatprep.mubr.msk.f32.mxu0 %vm384_vm0, %v1252_v23  ;;  %1050 = vmatpush3.msra.mxu0 %v1296_v32 }
  0x36   : > { %1051 = vmatprep.subr.mxu0 %v1306_v34 }
  0x37   : > { %1052 = vmatpush3.msra.mxu0 %v1306_v34 }
  0x38   : > { %476 = vmatmul.mubr.f32.gmra.mxu0 %v1258_v24 }
  0x39   : > { %985 = vmatprep.mubr.msk.f32.mxu0 %vm384_vm0, %v1261_v25 }
  0x3c   : > { %481 = vmatmul.mubr.f32.gmra.mxu0 %v1267_v26 }
  0xf0   : > { %v467_v36 = vpop.f32.mrf.mxu0 }
  0xf1   : > { %v468_v37 = vadd.f32 %v980_v35, %v467_v36 }
  0xf2   : > { %v469_v38 = vpop.f32.mrf.mxu0 }
  0xf3   : > { %vm486_vm2 = vcmp.ge.f32.partialorder %v468_v37, 0.0  ;;  %v490_v39 = vmul.f32 0.01, %v468_v37 }
  0xf4   : > { %v472_v40 = vpop.f32.mrf.mxu0 }
  0xf5   : > { %v473_v41 = vadd.f32 %v980_v35, %v472_v40  ;;  %v494_v42 = vsel %vm486_vm2, %v468_v37, %v490_v39 }
  0xf6   : > { %v474_v43 = vpop.f32.mrf.mxu0  ;;  %1039 = vmatprep.mubr.msk.f32.mxu1 %vm502_vm3, %v494_v42  ;;  %1053 = vmatprep.mubr.msk.f32.mxu0 %vm502_vm3, %v494_v42 }
  0xf7   : > { %vm487_vm4 = vcmp.ge.f32.partialorder %v473_v41, 0.0  ;;  %v491_v44 = vmul.f32 0.01, %v473_v41 }
  0xf8   : > { %v477_v46 = vpop.f32.mrf.mxu0 }
  0xf9   : > { %v495_v47 = vsel %vm487_vm4, %v473_v41, %v491_v44  ;;  %v478_v48 = vadd.f32 %v980_v35, %v477_v46  ;;  %v1004_v46 = vld [vmem:[%s1452_s8] ss:$0 sm:$0xff] }
  0xfa   : > { %1040 = vmatmul.mubr.msk.f32.vlgmr.msra.gmra.mxu1 %vm502_vm3, %v495_v47  ;;  %1054 = vmatmul.mubr.msk.f32.vlgmr.msra.gmra.mxu0 %vm502_vm3, %v495_v47  ;;  %v479_v50 = vpop.f32.mrf.mxu0 }
  0xfb   : > { %604 = vmatpush1.msra.mxu1 %v356_v45  ;;  %vm488_vm5 = vcmp.ge.f32.partialorder %v478_v48, 0.0  ;;  %v492_v51 = vmul.f32 0.01, %v478_v48 }
  0xfc   : > { %605 = vmatprep.subr.mxu1 %v1094_v1  ;;  %v482_v53 = vpop.f32.mrf.mxu0 }
  0xfd   : > { %606 = vmatpush1.msra.mxu1 %v355_v49  ;;  %v483_v54 = vadd.f32 %v980_v35, %v482_v53  ;;  %v1328_v55 = vsel %vm488_vm5, %v478_v48, %v492_v51 }
  0xfe   : > { %607 = vmatprep.subr.mxu1 %v1094_v1  ;;  %v484_v57 = vpop.f32.mrf.mxu0  ;;  %1042 = vmatprep.mubr.msk.f32.mxu1 %vm502_vm3, %v1328_v55 }
  0xff   : > { %608 = vmatpush1.msra.mxu1 %v354_v52  ;;  %vm489_vm6 = vcmp.ge.f32.partialorder %v483_v54, 0.0  ;;  %v493_v58 = vmul.f32 0.01, %v483_v54 }
 0x100   : > { %609 = vmatprep.subr.mxu1 %v1094_v1 }
 0x101   : > { %610 = vmatpush1.msra.mxu1 %v353_v56  ;;  %v497_v60 = vsel %vm489_vm6, %v483_v54, %v493_v58 }
 0x102   : > { %611 = vmatprep.subr.mxu1 %v1094_v1  ;;  %1043 = vmatmul.mubr.msk.f32.gmra.mxu1 %vm502_vm3, %v497_v60 }
 0x103   : > { %612 = vmatpush1.msra.mxu1 %v352_v59  ;;  %991 = vmatprep.mubr.msk.f32.mxu1 %vm384_vm0, %v1177_v5  ;;  %v344_v5 = vld [vmem:[%s1449_s5 + $0x18] sm:$0xff] }
 0x104   : > { %613 = vmatprep.subr.mxu1 %v1094_v1 }
 0x105   : > { %614 = vmatpush1.msra.mxu1 %v351_v61 }
 0x106   : > { %615 = vmatprep.subr.mxu1 %v1094_v1 }
 0x107   : > { %616 = vmatpush1.msra.mxu1 %v350_v62 }
 0x108   : > { %617 = vmatprep.subr.mxu1 %v1094_v1 }
 0x109   : > { %618 = vmatpush1.msra.mxu1 %v349_v63 }
 0x10a   : > { %619 = vmatprep.subr.mxu1 %v1094_v1 }
 0x10b   : > { %620 = vmatpush1.msra.mxu1 %v348_v0 }
 0x10c   : > { %621 = vmatprep.subr.mxu1 %v1094_v1 }
 0x10d   : > { %622 = vmatpush1.msra.mxu1 %v347_v2 }
 0x10e   : > { %623 = vmatprep.subr.mxu1 %v1094_v1 }
 0x10f   : > { %624 = vmatpush1.msra.mxu1 %v346_v3 }
 0x110   : > { %625 = vmatprep.subr.mxu1 %v1094_v1 }
 0x111   : > { %626 = vmatpush1.msra.mxu1 %v345_v4 }
 0x112   : > { %627 = vmatprep.subr.mxu1 %v1094_v1 }
 0x113   : > { %628 = vmatpush1.msra.mxu1 %v344_v5 }
 0x114   : > { %629 = vmatprep.subr.mxu1 %v1094_v1 }
 0x115   : > { %630 = vmatpush1.msra.mxu1 %v343_v6 }
 0x116   : > { %631 = vmatprep.subr.mxu1 %v1094_v1 }
 0x117   : > { %632 = vmatpush1.msra.mxu1 %v342_v7 }
 0x118   : > { %633 = vmatprep.subr.mxu1 %v1094_v1 }
 0x119   : > { %634 = vmatpush1.msra.mxu1 %v341_v8 }
 0x11a   : > { %663 = vmatprep.subr.mxu1 %v1094_v1 }
 0x11b   : > { %990 = vmatpush2.msk.msra.mxu1 %vm397_vm1, %v358_v9 }
 0x11c   : > { %665 = vmatprep.subr.mxu1 %v1094_v1  ;;  %v797_v1 = vld [vmem:[%s1451_s7 + $0x8] sm:$0xff] }
 0x11d   : > { %666 = vmatpush2.msra.mxu1 %v357_v10  ;;  %1059 = vmatprep.subr.mxu0 %v797_v1 }
 0x11e   : > { %668 = vmatmul.mubr.f32.vlgmr.msra.gmra.mxu1 %v1239_v20  ;;  %1069 = vmatprep.subr.mxu1 %v1276_v28 }
 0x11f   : > { %1073 = vmatpush3.msra.mxu1 %v1276_v28  ;;  %992 = vmatprep.mubr.msk.f32.mxu1 %vm384_vm0, %v1243_v21 }
 0x120   : > { %1070 = vmatprep.subr.mxu1 %v1286_v30  ;;  %1060 = vmatpush3.msra.mxu0 %v797_v1 }
 0x121   : > { %1074 = vmatpush3.msra.mxu1 %v1286_v30  ;;  %1061 = vmatprep.subr.mxu0 %v796_v11 }
 0x122   : > { %673 = vmatmul.mubr.f32.gmra.mxu1 %v1249_v22  ;;  %1071 = vmatprep.subr.mxu1 %v1296_v32 }
 0x123   : > { %993 = vmatprep.mubr.msk.f32.mxu1 %vm384_vm0, %v1252_v23  ;;  %1075 = vmatpush3.msra.mxu1 %v1296_v32 }
 0x124   : > { %1072 = vmatprep.subr.mxu1 %v1306_v34  ;;  %1062 = vmatpush3.msra.mxu0 %v796_v11 }
 0x125   : > { %1076 = vmatpush3.msra.mxu1 %v1306_v34 }
 0x126   : > { %678 = vmatmul.mubr.f32.gmra.mxu1 %v1258_v24 }
 0x127   : > { %994 = vmatprep.mubr.msk.f32.mxu1 %vm384_vm0, %v1261_v25 }
 0x12a   : > { %683 = vmatmul.mubr.f32.gmra.mxu1 %v1267_v26 }
 0x12b   : > { %1056 = vmatprep.mubr.msk.f32.mxu1 %vm502_vm3, %v1328_v55 }
 0x12e   : > { %1057 = vmatmul.mubr.msk.f32.vlgmr.msra.gmra.mxu1 %vm502_vm3, %v497_v60 }
 0x1ba   : > { %v1055_v13 = vpop.f32.mrf.mxu0  ;;  %v1041_v21 = vpop.f32.mrf.mxu1 }
 0x1bb   : > { %v771_v14 = vadd.f32 %v1055_v13, %v995_v12 }
 0x1bc   : > { %v765_v15 = vpop.f32.mrf.mxu0  ;;  %v581_v22 = vpop.f32.mrf.mxu1 }
 0x1bd   : > { %v766_v16 = vadd.f32 %v995_v12, %v765_v15  ;;  %v789_v17 = vmul.f32 0.01, %v771_v14  ;;  %vm785_vm7 = vcmp.ge.f32.partialorder %v771_v14, 0.0 }
 0x1bf   : > { %vm784_vm8 = vcmp.ge.f32.partialorder %v766_v16, 0.0  ;;  %v788_v18 = vmul.f32 0.01, %v766_v16  ;;  %v793_v20 = vsel %vm785_vm7, %v771_v14, %v789_v17 }
 0x1c1   : > { %v792_v19 = vsel %vm784_vm8, %v766_v16, %v788_v18 }
 0x1c2   : > { %1063 = vmatprep.mubr.msk.f32.mxu0 %vm798_vm9, %v792_v19  ;;  %v1044_v23 = vpop.f32.mrf.mxu1 }
 0x1c3   : > { %1064 = vmatmul.mubr.msk.f32.vlgmr.msra.gmra.mxu0 %vm798_vm9, %v793_v20 }
 0x1c4   : > { %v591_v24 = vpop.f32.mrf.mxu1 }
 0x1de   : > { %v669_v25 = vpop.f32.mrf.mxu1 }
 0x1df   : > { %v670_v26 = vadd.f32 %v669_v25, %v581_v22 }
 0x1e0   : > { %v671_v27 = vpop.f32.mrf.mxu1 }
 0x1e2   : > { %v674_v28 = vpop.f32.mrf.mxu1 }
 0x1e3   : > { %v675_v29 = vadd.f32 %v1041_v21, %v674_v28 }
 0x1e4   : > { %v676_v30 = vpop.f32.mrf.mxu1 }
 0x1e6   : > { %v679_v31 = vpop.f32.mrf.mxu1 }
 0x1e7   : > { %v680_v32 = vadd.f32 %v679_v31, %v591_v24 }
 0x1e8   : > { %v681_v33 = vpop.f32.mrf.mxu1 }
 0x1ea   : > { %v684_v34 = vpop.f32.mrf.mxu1 }
 0x1eb   : > { %v685_v35 = vadd.f32 %v1044_v23, %v684_v34 }
 0x1ec   : > { %v686_v36 = vpop.f32.mrf.mxu1 }
 0x1ee   : > { %v1058_v37 = vpop.f32.mrf.mxu1 }
 0x1ef   : > { %v781_v38 = vadd.f32 %v1058_v37, %v995_v12 }
 0x1f0   : > { %v775_v39 = vpop.f32.mrf.mxu1 }
 0x1f1   : > { %v776_v40 = vadd.f32 %v995_v12, %v775_v39  ;;  %v791_v41 = vmul.f32 0.01, %v781_v38  ;;  %vm787_vm10 = vcmp.ge.f32.partialorder %v781_v38, 0.0 }
 0x1f3   : > { %vm786_vm11 = vcmp.ge.f32.partialorder %v776_v40, 0.0  ;;  %v790_v42 = vmul.f32 0.01, %v776_v40  ;;  %v795_v44 = vsel %vm787_vm10, %v781_v38, %v791_v41 }
 0x1f5   : > { %v794_v43 = vsel %vm786_vm11, %v776_v40, %v790_v42 }
 0x1f6   : > { %1066 = vmatprep.mubr.msk.f32.mxu0 %vm798_vm9, %v794_v43 }
 0x1f7   : > { %1067 = vmatmul.mubr.msk.f32.gmra.mxu0 %vm798_vm9, %v795_v44 }
 0x283   : > { %v1065_v45 = vpop.f32.mrf.mxu0 }
 0x284   : > { %v897_v47 = vadd.f32 %v1065_v45, %v675_v29 }
 0x285   : > { %v877_v48 = vpop.f32.mrf.mxu0 }
 0x286   : > { %v908_v49 = vadd.f32 %v1004_v46, %v897_v47  ;;  %v896_v50 = vadd.f32 %v877_v48, %v670_v26 }
 0x288   : > { %912 = vst.msk [vmem:[%s332_s21 + $0x8] sm:$0xff] %vm384_vm0, %v908_v49  ;;  %v907_v51 = vadd.f32 %v1004_v46, %v896_v50 }
 0x28a   : > { %911 = vst.msk [vmem:[%s332_s21] sm:$0xff] %vm384_vm0, %v907_v51 }
 0x2b7   : > { %v1068_v52 = vpop.f32.mrf.mxu0 }
 0x2b8   : > { %v899_v53 = vadd.f32 %v1068_v52, %v685_v35 }
 0x2b9   : > { %v887_v54 = vpop.f32.mrf.mxu0 }
 0x2ba   : > { %v910_v55 = vadd.f32 %v1004_v46, %v899_v53  ;;  %v898_v56 = vadd.f32 %v887_v54, %v680_v32 }
 0x2bc   : > { %915 = vst.msk [vmem:[%s332_s21 + $0x18] sm:$0xf] %vm914_vm12, %v910_v55  ;;  %v909_v57 = vadd.f32 %v1004_v46, %v898_v56 }
 0x2be   : > { %913 = vst.msk [vmem:[%s332_s21 + $0x10] sm:$0xff] %vm384_vm0, %v909_v57 }
 0x2bf PF: > { %s19_s30 = sadd.s32 1, %s1092_s30  }
 0x2c0   : > { %p16_p4 = scmp.ge.s32.totalorder %s19_s30, 4  }
 0x2c2   :  { %18 = sbr.rel (!%p16_p4) target bundleno = 1 (0x1), region = 86 }

// kernel: _lambda_.7
= control target key start
LH: loop header
LB: loop body
LE: loop exit
PB: predicated region body
PF: predicated region fallthrough
CT: control target
= control target key end

     0   :  { %14 = vsyncpa [#allocation3], 0  ;;  %s1243_s0 = inlined_call_operand.vmem [shape: f32[2,8,32], index: 0, kind: input, shape index: {}]   ;;  %s1244_s1 = inlined_call_operand.vmem [shape: f32[32,32], index: 1, kind: input, shape index: {}]   ;;  %s1245_s2 = inlined_call_operand.vmem [shape: f32[1,32], index: 2, kind: input, shape index: {}]   ;;  %s1246_s3 = inlined_call_operand.vmem [shape: f32[32,16], index: 3, kind: input, shape index: {}]   ;;  %s1247_s4 = inlined_call_operand.vmem [shape: f32[1,16], index: 4, kind: input, shape index: {}]   ;;  %s1248_s5 = inlined_call_operand.vmem [shape: f32[32,16], index: 5, kind: input, shape index: {}]   ;;  %s1249_s6 = inlined_call_operand.vmem [shape: f32[32,16], index: 6, kind: input, shape index: {}]   ;;  %s1250_s7 = inlined_call_operand.vmem [shape: f32[16,16], index: 7, kind: input, shape index: {}]   ;;  %s1251_s8 = inlined_call_operand.vmem [shape: f32[1,16], index: 8, kind: input, shape index: {}]   ;;  %s1252_s9 = inlined_call_operand.hbm [shape: f32[2,8,16], index: 9, kind: output, shape index: {}]  }
   0x1   :  { %16 = vsyncpa [#allocation3 + $0x1], 0  ;;  %s1059_s30 = smov 0   ;;  %s1061_s10 = smov 0  }
   0x2   :  { %s1063_s11 = smov 0   ;;  %s1065_s12 = smov 0  }
   0x3 LB: > { %s1080_s13 = sadd.s32 4294967295, %s1004_s12   ;;  %s811_s14 = sadd.s32 4294967294, %s1004_s12   ;;  %s1004_s12 = sphi %s1065_s12, %s1258_s12   ;;  %s1000_s11 = sphi %s1063_s11, %s1257_s11   ;;  %s996_s10 = sphi %s1061_s10, %s1256_s10   ;;  %s992_s30 = sphi %s1059_s30, %s1255_s30  }
   0x4   : > { %s1084_s15 = sadd.s32 1, %s1004_s12   ;;  %s223_s16 = sadd.s32 1, %s1000_s11 }
   0x5   : > { %s220_s17 = ssub.s32 %s1004_s12, %s1084_s15  ;;  %p233_p0 = scmp.ne.s32.totalorder %s1000_s11, %s996_s10 }
   0x6   : > { %p221_p1 = scmp.eq.s32.totalorder %s220_s17, 0  ;;  %p234_p2 = scmp.eq.s32.totalorder %s1080_s13, 1 }
   0x7   : > { %p239_p3 = scmp.ne.s32.totalorder %s996_s10, %s992_s30  ;;  %p240_p4 = scmp.eq.s32.totalorder %s811_s14, 1 }
   0x8   : > { %s1095_s18 = scalar_select %p221_p1, %s1000_s11, %s223_s16  }
   0x9   : > { %p1097_p5 = por %p234_p2, %p233_p0  ;;  %p1101_p6 = por %p240_p4, %p239_p3 }
   0xa   : > { %p814_p7 = scmp.ge.s32.totalorder %s1004_s12, 1  ;;  %p289_p8 = scmp.lt.s32.totalorder %s1004_s12, 3 }
   0xc   : > { %p290_p9 = pnand %p814_p7, %p289_p8 }
   0xd   : > { %p324_p10 = scmp.lt.s32.totalorder (!%p290_p9), %s1080_s13, 1  ;;  %s826_s22 = sshll.u32 (!%p290_p9), %s1080_s13, 7 }
   0xe   : > { %293 = sbr.rel (%p290_p9) target bundleno = 642 (0x282), region = 56  ;;  %s1008_s17 = smov (!%p290_p9), [#allocation2]  }
  0x13   : > { %v336_v0 = vld [vmem:[%s1244_s1 + $0x18] sm:$0xff]  ;;  %v1006_v1 = vmov 0.0   ;;  %v335_v2 = vld [vmem:[%s1244_s1 + $0x10] sm:$0xff]  ;;  %vm1007_vm0 = vmmov 0   ;;  %s325_s27 = scalar_select %p324_p10, %s1080_s13, 1  ;;  %v334_v4 = vld [vmem:[%s1244_s1 + $0x8] sm:$0xff] }
  0x14   : > { %852 = vmatprep.subr.mxu0 %v1006_v1  ;;  %860 = vmatprep.mubr.msk.f32.mxu0 %vm1007_vm0, %v1006_v1  ;;  %v424_v3 = vld [vmem:[%s1249_s6 + $0x18] sm:$0xff]  ;;  %v333_v5 = vld [vmem:[%s1244_s1] sm:$0xff]  ;;  %vm344_vm1 = vcmask 261120   ;;  %v423_v8 = vld [vmem:[%s1249_s6 + $0x10] sm:$0xff]  ;;  %vm654_vm4 = vcmask 130048   ;;  %s948_s13 = sshll.u32 %s1008_s17, 4  ;;  %s949_s13 = int_to_ptr.vmem [resolvable:$false] %s948_s13 }
  0x15   : > { %853 = vmatpush3.msra.mxu0 %v336_v0  ;;  %863 = vmatprep.subr.mxu1 %v1006_v1  ;;  %s816_s14 = sshll.u32 %s325_s27, 3  ;;  %v332_v7 = vld [vmem:[%s1248_s5 + $0x18] sm:$0xff]  ;;  %v331_v9 = vld [vmem:[%s1248_s5 + $0x10] sm:$0xff]  ;;  %v422_v10 = vld [vmem:[%s1249_s6 + $0x8] sm:$0xff]  ;;  %s750_s27 = scalar_lea.hbm %s1252_s9, %s826_s22 }
  0x16   : > { %854 = vmatprep.subr.mxu0 %v1006_v1  ;;  %864 = vmatpush3.msra.mxu1 %v424_v3  ;;  %s327_s23 = scalar_lea.vmem %s1243_s0, %s816_s14  ;;  %v330_v11 = vld [vmem:[%s1248_s5 + $0x8] sm:$0xff]  ;;  %v421_v12 = vld [vmem:[%s1249_s6] sm:$0xff]  ;;  %v571_v19 = vld [vmem:[%s1246_s3 + $0x18] sm:$0xff]  ;;  %s321_s14 = sand.u32 1, %s996_s10  }
  0x17   : > { %855 = vmatpush3.msra.mxu0 %v335_v2  ;;  %865 = vmatprep.subr.mxu1 %v1006_v1  ;;  %v328_v6 = vld [vmem:[%s327_s23] sm:$0xff]  ;;  %v570_v21 = vld [vmem:[%s1246_s3 + $0x10] sm:$0xff]  ;;  %v569_v22 = vld [vmem:[%s1246_s3 + $0x8] sm:$0xff]  ;;  %s815_s16 = sshll.u32 %s321_s14, 3  ;;  %s739_s28 = scalar_lea.sflag [#allocation3], %s321_s14 }
  0x18   : > { %856 = vmatprep.subr.mxu0 %v1006_v1  ;;  %871 = vmatprep.mubr.msk.f32.mxu1 %vm1007_vm0, %v1006_v1  ;;  %v329_v13 = vld [vmem:[%s1248_s5] sm:$0xff]  ;;  %v653_v26 = vld [vmem:[%s1250_s7 + $0x8] sm:$0xff]  ;;  %s323_s23 = scalar_lea.vmem [#allocation2], %s815_s16  ;;  %s950_s16 = scalar_lea.vmem %s949_s13, 256 }
  0x19   : > { %857 = vmatpush3.msra.mxu0 %v334_v4  ;;  %866 = vmatpush3.msra.mxu1 %v423_v8  ;;  %v817_v14 = vld [vmem:[%s1245_s2] ss:$0 sm:$0xff]  ;;  %s752_s24 = sshll.u32 %s323_s23, 4  ;;  %s753_s24 = int_to_ptr.vmem [resolvable:$true] %s752_s24 }
  0x1a   : > { %858 = vmatprep.subr.mxu0 %v1006_v1  ;;  %867 = vmatprep.subr.mxu1 %v1006_v1  ;;  %v568_v23 = vld [vmem:[%s1246_s3] sm:$0xff]  ;;  %s944_s29 = scalar_lea.vmem %s753_s24, 128  ;;  %p951_p0 = scmp.lt.s32.totalorder %s753_s24, %s949_s13 }
  0x1b   : > { %859 = vmatpush3.msra.mxu0 %v333_v5  ;;  %868 = vmatpush3.msra.mxu1 %v422_v10  ;;  %v652_v27 = vld [vmem:[%s1250_s7] sm:$0xff]  ;;  %p945_p11 = scmp.ne.s32.totalorder %s753_s24, %s944_s29  ;;  %p952_p1 = scmp.lt.s32.totalorder %s950_s16, %s944_s29 }
  0x1c   : > { %861 = vmatmul.mubr.msk.f32.vlgmr.msra.gmra.mxu0 %vm344_vm1, %v328_v6  ;;  %874 = vmatprep.subr.mxu0 %v1006_v1  ;;  %v821_v30 = vld [vmem:[%s1247_s4] ss:$0 sm:$0xff] }
  0x1d   : > { %875 = vmatpush3.msra.mxu0 %v332_v7  ;;  %882 = vmatprep.mubr.msk.f32.mxu0 %vm1007_vm0, %v1006_v1  ;;  %v824_v38 = vld [vmem:[%s1251_s8] ss:$0 sm:$0xff]  ;;  %p946_p12 = pnand %p945_p11, %p1097_p5  ;;  %p953_p2 = por %p952_p1, %p951_p0 }
  0x1e   : > { %876 = vmatprep.subr.mxu0 %v1006_v1  ;;  %869 = vmatprep.subr.mxu1 %v1006_v1 }
  0x1f   : > { %877 = vmatpush3.msra.mxu0 %v331_v9  ;;  %870 = vmatpush3.msra.mxu1 %v421_v12  ;;  %p947_p13 = pneg %p946_p12 }
  0x20   : > { %878 = vmatprep.subr.mxu0 %v1006_v1  ;;  %885 = vmatprep.subr.mxu1 %v1006_v1 }
  0x21   : > { %879 = vmatpush3.msra.mxu0 %v330_v11  ;;  %p954_p3 = pnand %p953_p2, %p947_p13 }
  0x22   : > { %880 = vmatprep.subr.mxu0 %v1006_v1 }
  0x23   : > { %881 = vmatpush3.msra.mxu0 %v329_v13 }
  0x24   : > { %883 = vmatmul.mubr.msk.f32.vlgmr.msra.gmra.mxu0 %vm344_vm1, %v328_v6  ;;  %896 = vmatprep.subr.mxu0 %v1006_v1 }
  0x25   : > { %900 = vmatprep.mubr.msk.f32.mxu0 %vm1007_vm0, %v1006_v1  ;;  %897 = vmatpush3.msra.mxu0 %v653_v26 }
  0x26   : > { %898 = vmatprep.subr.mxu0 %v1006_v1 }
  0x27   : > { %899 = vmatpush3.msra.mxu0 %v652_v27 }
  0xdc   : > { %v414_v15 = vpop.f32.mrf.mxu0 }
  0xdd   : > { %v415_v16 = vadd.f32 %v817_v14, %v414_v15 }
  0xde   : > { %v862_v17 = vpop.f32.mrf.mxu0 }
  0xdf   : > { %vm418_vm2 = vcmp.ge.f32.partialorder %v415_v16, 0.0  ;;  %v419_v18 = vmul.f32 0.01, %v415_v16 }
  0xe1   : > { %v420_v20 = vsel %vm418_vm2, %v415_v16, %v419_v18 }
  0xe2   : > { %872 = vmatmul.mubr.msk.f32.vlgmr.msra.gmra.mxu1 %vm344_vm1, %v420_v20 }
  0xe3   : > { %886 = vmatpush3.msra.mxu1 %v571_v19  ;;  %893 = vmatprep.mubr.msk.f32.mxu1 %vm1007_vm0, %v1006_v1 }
  0xe4   : > { %887 = vmatprep.subr.mxu1 %v1006_v1  ;;  %v564_v24 = vpop.f32.mrf.mxu0 }
  0xe5   : > { %888 = vmatpush3.msra.mxu1 %v570_v21 }
  0xe6   : > { %889 = vmatprep.subr.mxu1 %v1006_v1  ;;  %v884_v25 = vpop.f32.mrf.mxu0 }
  0xe7   : > { %890 = vmatpush3.msra.mxu1 %v569_v22 }
  0xe8   : > { %891 = vmatprep.subr.mxu1 %v1006_v1 }
  0xe9   : > { %892 = vmatpush3.msra.mxu1 %v568_v23 }
  0xea   : > { %894 = vmatmul.mubr.msk.f32.vlgmr.msra.gmra.mxu1 %vm344_vm1, %v420_v20 }
 0x1a2   : > { %v494_v28 = vpop.f32.mrf.mxu1 }
 0x1a3   : > { %v565_v36 = vadd.f32 %v564_v24, %v494_v28 }
 0x1a4   : > { %v873_v29 = vpop.f32.mrf.mxu1 }
 0x1aa   : > { %v645_v31 = vpop.f32.mrf.mxu1 }
 0x1ab   : > { %v646_v32 = vadd.f32 %v821_v30, %v645_v31 }
 0x1ac   : > { %v895_v33 = vpop.f32.mrf.mxu1 }
 0x1ad   : > { %vm649_vm3 = vcmp.ge.f32.partialorder %v646_v32, 0.0  ;;  %v650_v34 = vmul.f32 0.01, %v646_v32 }
 0x1af   : > { %v651_v35 = vsel %vm649_vm3, %v646_v32, %v650_v34 }
 0x1b0   : > { %901 = vmatmul.mubr.msk.f32.vlgmr.msra.gmra.mxu0 %vm654_vm4, %v651_v35 }
 0x270   : > { %v724_v37 = vpop.f32.mrf.mxu0 }
 0x271   : > { %v728_v39 = vadd.f32 %v724_v37, %v565_v36 }
 0x272   : > { %v902_v40 = vpop.f32.mrf.mxu0 }
 0x273   : > { %v736_v41 = vadd.f32 %v824_v38, %v728_v39 }
 0x275   : > { %737 = vst.msk [vmem:[%s323_s23] sm:$0xff] %vm654_vm4, %v736_v41 }
 0x276   : > { %957 = shalt.err (!%p954_p3)
}
 0x277   : > { %s958_s21 = scalar_lea.hbm %s750_s27, 128  ;;  %s962_s23 = scalar_lea.hbm %s1252_s9, 256 }
 0x278   : > { %p959_p4 = scmp.ne.s32.totalorder %s750_s27, %s958_s21  ;;  %p963_p9 = scmp.lt.s32.totalorder %s750_s27, %s1252_s9 }
 0x279   : > { %p964_p10 = scmp.lt.s32.totalorder %s962_s23, %s958_s21 }
 0x27a   : > { %p960_p7 = pnand %p959_p4, %p1097_p5 }
 0x27b   : > { %p965_p11 = por %p964_p10, %p963_p9 }
 0x27c   : > { %p961_p8 = pneg %p960_p7 }
 0x27e   : > { %p966_p12 = pnand %p965_p11, %p961_p8 }
 0x280   : > { %969 = shalt.err (!%p966_p12)
}
 0x281   : > { %903 = dma.vmem_to_hbm [thread:$0]  (%p1097_p5), %s753_s24, 128, %s750_s27, %s739_s28  }
 0x282 PF: > { %p909_p13 = scmp.ge.s32.totalorder %s1004_s12, 2  ;;  %s764_s29 = sand.u32 1, %s992_s30  }
 0x283   : > { %s765_s17 = scalar_lea.sflag [#allocation3], %s764_s29 }
 0x284   : > { %p906_p0 = pnand %p909_p13, %p1101_p6 }
 0x286   : > { %p907_p1 = pneg %p906_p0 }
 0x288   : > { %987 = dma.done.wait (%p907_p1), %s765_s17, 128  }
 0x289   : > { %989 = vsyncadd (%p907_p1), %s765_s17, 4294967168  ;;  %p19_p2 = scmp.ge.s32.totalorder %s1084_s15, 4   ;;  %s1255_s30 = smov %s996_s10 }
 0x28a   : > { %s1256_s10 = smov %s1000_s11  ;;  %s1257_s11 = smov %s1095_s18 }
 0x28b   : > { %s1258_s12 = smov %s1084_s15  ;;  %21 = sbr.rel (!%p19_p2) target bundleno = 3 (0x3), region = 91 }
 0x290   :  { %770 = vsyncpa [#allocation3], 1 }
 0x291   :  { %772 = vsyncpa [#allocation3 + $0x1], 1 }

</bundles_post_ra>
